<compile_context>
chip_gen: v7x
topology: tpu7x:2x2x1
jax: 0.10.0
libtpu: 0.0.40
codegen_flags: <defaults>
</compile_context>

<pallas_src>
import jax
import jax.numpy as jnp
from jax import lax
from jax.experimental import pallas as pl
from jax.experimental.pallas import tpu as pltpu


def rnn_lstm_kernel(
    x_ref,       # (T, Bp, Ip)      f32
    len_ref,     # (Bp, 1)          i32
    wih1_ref,    # (Ip, 4*Hp)       bf16
    whh1_ref,    # (Hp, 4*Hp)       bf16
    b1_ref,      # (1, 4*Hp)        f32   (b_ih + b_hh of layer 1)
    wcat2_ref,   # (2*Hp, 4*Hp)     bf16  (concat of W_ih2, W_hh2)
    b2_ref,      # (1, 4*Hp)        f32   (b_ih + b_hh of layer 2)
    wfc_ref,     # (Hp, Op)         bf16
    bfc_ref,     # (1, Op)          f32
    out_ref,     # (T*Bp, Op)       f32
    gx1_ref,     # VMEM scratch (T, Bp, 4*Hp) f32
    h2seq_ref,   # VMEM scratch (T, Bp, Hp)   f32
):
    T, Bp, Ip = x_ref.shape
    Hp = whh1_ref.shape[0]

    def sigmoid(v):
        # Exact identity; 1 EUP push (tanh) + VPU mul/add instead of 2 pushes
        # (exp + reciprocal). Gate math stays in f32.
        return 0.5 * jnp.tanh(0.5 * v) + 0.5

    # ---- 1) Precompute layer-1 input projection (+bias) for all timesteps.
    #      One big (T*Bp, Ip) x (Ip, 4Hp) bf16 matmul, f32 accumulation.
    x_flat = x_ref[...].reshape(T * Bp, Ip).astype(jnp.bfloat16)
    gx1 = (
        jnp.dot(x_flat, wih1_ref[...], preferred_element_type=jnp.float32)
        + b1_ref[...]
    )
    gx1_ref[...] = gx1.reshape(T, Bp, 4 * Hp)

    # ---- Hoisted loop invariants (JAX does not CSE broadcasts in loops).
    w_hh1 = whh1_ref[...]                               # bf16 (Hp, 4Hp)
    w_cat2 = wcat2_ref[...]                             # bf16 (2Hp, 4Hp)
    b2 = jnp.broadcast_to(b2_ref[...], (Bp, 4 * Hp))    # f32
    zeros = jnp.zeros((Bp, Hp), jnp.float32)

    def gates_to_state(g, c_prev):
        # PyTorch gate order: input, forget, cell (g), output.
        # Slices are lane-aligned because Hp == 128.
        i_g = sigmoid(g[:, 0 * Hp:1 * Hp])
        f_g = sigmoid(g[:, 1 * Hp:2 * Hp])
        g_g = jnp.tanh(g[:, 2 * Hp:3 * Hp])
        o_g = sigmoid(g[:, 3 * Hp:4 * Hp])
        c_new = f_g * c_prev + i_g * g_g
        h_new = o_g * jnp.tanh(c_new)
        return h_new, c_new

    # ---- 2) Serial recurrence: state lives in registers (loop carries).
    #      Per step: exactly two bf16 matmuls + f32 gate math; no masking.
    def step(t, carry):
        h1, c1, h2, c2 = carry
        # Layer 1: only the recurrent matmul is on the serial path.
        g1 = gx1_ref[t] + jnp.dot(
            h1.astype(jnp.bfloat16), w_hh1, preferred_element_type=jnp.float32
        )
        h1, c1 = gates_to_state(g1, c1)
        # Layer 2: one fused matmul (K = 2*Hp) instead of two.
        cat = jnp.concatenate(
            [h1.astype(jnp.bfloat16), h2.astype(jnp.bfloat16)], axis=1
        )                                                # (Bp, 2*Hp) bf16
        g2 = jnp.dot(cat, w_cat2, preferred_element_type=jnp.float32) + b2
        h2, c2 = gates_to_state(g2, c2)
        h2seq_ref[t] = h2        # raw store; length masking hoisted below
        return (h1, c1, h2, c2)

    lax.fori_loop(0, T, step, (zeros, zeros, zeros, zeros), unroll=True)

    # ---- 3) One vectorized masking pass (pad_packed_sequence zero-padding)
    #      followed by the hoisted FC: a single (T*Bp, Hp) x (Hp, Op) matmul
    #      and one lane-dense store (Op == 128; real 3 columns sliced outside).
    t_ids = lax.broadcasted_iota(jnp.int32, (T, Bp, 1), 0)
    keep = t_ids < len_ref[...][None, :, :]              # (T, Bp, 1)
    h2_masked = jnp.where(keep, h2seq_ref[...], 0.0)     # (T, Bp, Hp)
    h2_flat = h2_masked.reshape(T * Bp, Hp).astype(jnp.bfloat16)
    out_ref[...] = (
        jnp.dot(h2_flat, wfc_ref[...], preferred_element_type=jnp.float32)
        + bfc_ref[...]
    ).astype(out_ref.dtype)


def rnn_forward(x, lengths, params_p, t_out, output_size):
    """x: (B, T, I) f32; lengths: (B,) i32; params_p: padded/fused params."""
    B, T, I = x.shape
    Ip = params_p["w_ih1"].shape[0]
    Hp = params_p["w_hh1"].shape[0]
    Op = params_p["w_fc"].shape[1]
    Bp = ((B + 7) // 8) * 8                      # sublane-align the batch

    x_tbi = jnp.transpose(x[:, :t_out, :], (1, 0, 2))           # (T, B, I)
    x_tbi = jnp.pad(x_tbi, ((0, 0), (0, Bp - B), (0, Ip - I)))  # (T, Bp, Ip)
    len_p = jnp.pad(lengths.astype(jnp.int32), (0, Bp - B)).reshape(Bp, 1)

    out_flat = pl.pallas_call(
        rnn_lstm_kernel,
        out_shape=jax.ShapeDtypeStruct((t_out * Bp, Op), jnp.float32),
        in_specs=[pl.BlockSpec(memory_space=pltpu.VMEM)] * 9,
        out_specs=pl.BlockSpec(memory_space=pltpu.VMEM),
        scratch_shapes=[
            pltpu.VMEM((t_out, Bp, 4 * Hp), jnp.float32),  # precomputed gates_x1
            pltpu.VMEM((t_out, Bp, Hp), jnp.float32),      # raw h2 sequence
        ],
    )(
        x_tbi,
        len_p,
        params_p["w_ih1"],
        params_p["w_hh1"],
        params_p["b1"],
        params_p["w_cat2"],
        params_p["b2"],
        params_p["w_fc"],
        params_p["b_fc"],
    )
    out = out_flat.reshape(t_out, Bp, Op)[:, :B, :output_size]
    return jnp.transpose(out, (1, 0, 2))  # (B, T_out, output_size)


def init_params(key, input_size, hidden_size, output_size):
    """Deterministic init mimicking PyTorch's U(-1/sqrt(H), 1/sqrt(H)).
    Stored transposed vs. PyTorch so the kernel does x @ W, h @ W."""
    H = hidden_size
    bound = 1.0 / (H ** 0.5)
    keys = jax.random.split(key, 10)

    def u(k, shape):
        return jax.random.uniform(k, shape, jnp.float32, -bound, bound)

    return {
        "w_ih1": u(keys[0], (input_size, 4 * H)),
        "w_hh1": u(keys[1], (H, 4 * H)),
        "b1": u(keys[2], (1, 4 * H)) + u(keys[3], (1, 4 * H)),
        "w_ih2": u(keys[4], (H, 4 * H)),
        "w_hh2": u(keys[5], (H, 4 * H)),
        "b2": u(keys[6], (1, 4 * H)) + u(keys[7], (1, 4 * H)),
        "w_fc": u(keys[8], (H, output_size)),
        "b_fc": u(keys[9], (1, output_size)),
    }


def _pad_gates(w, H, Hp):
    """(…, 4H) -> (…, 4Hp): zero-pad each of the 4 gate blocks independently."""
    lead = w.shape[:-1]
    w4 = w.reshape(lead + (4, H))
    pad = [(0, 0)] * len(lead) + [(0, 0), (0, Hp - H)]
    return jnp.pad(w4, pad).reshape(lead + (4 * Hp,))


def pad_and_fuse_params(params, input_size, hidden_size, output_size, Ip, Hp, Op):
    """Zero-pad I->Ip, H->Hp (per gate), O->Op, pre-fuse layer-2 weights and
    cast the matmul weights (only) to bf16 for the MXU; biases stay f32.
    Zero padding is exactly semantics-preserving: padded hidden units get
    i=f=o=0.5, g=tanh(0)=0, so starting from h=c=0 they stay 0 forever
    (holds in bf16 too, since 0 is exact)."""
    H, O, I = hidden_size, output_size, input_size
    w_ih1 = jnp.pad(_pad_gates(params["w_ih1"], H, Hp), ((0, Ip - I), (0, 0)))
    w_hh1 = jnp.pad(_pad_gates(params["w_hh1"], H, Hp), ((0, Hp - H), (0, 0)))
    b1 = _pad_gates(params["b1"], H, Hp)
    w_ih2 = jnp.pad(_pad_gates(params["w_ih2"], H, Hp), ((0, Hp - H), (0, 0)))
    w_hh2 = jnp.pad(_pad_gates(params["w_hh2"], H, Hp), ((0, Hp - H), (0, 0)))
    b2 = _pad_gates(params["b2"], H, Hp)
    # Fused layer-2 weight: gates2 = concat([h1_new, h2_prev], -1) @ w_cat2
    w_cat2 = jnp.concatenate([w_ih2, w_hh2], axis=0)        # (2Hp, 4Hp)
    w_fc = jnp.pad(params["w_fc"], ((0, Hp - H), (0, Op - O)))
    b_fc = jnp.pad(params["b_fc"], ((0, 0), (0, Op - O)))
    bf16 = jnp.bfloat16
    return {
        "w_ih1": w_ih1.astype(bf16),
        "w_hh1": w_hh1.astype(bf16),
        "b1": b1,
        "w_cat2": w_cat2.astype(bf16),
        "b2": b2,
        "w_fc": w_fc.astype(bf16),
        "b_fc": b_fc,
    }


if __name__ == "__main__":
    # Small shapes consistent with the module (hidden_size=50, num_layers=2,
    # output_size=3; input_size kept small instead of 1 + len(ydict)).
    input_size = 16
    hidden_size = 50
    output_size = 3
    B, T = 2, 8

    # Padded (TPU-friendly) sizes: lane-aligned features/gates/output, 8-row batch.
    Ip, Hp, Op = 128, 128, 128

    key = jax.random.PRNGKey(0)
    k_x, k_p = jax.random.split(key)

    x = jax.random.normal(k_x, (B, T, input_size), dtype=jnp.float32)
    lengths_host = [8, 5]                         # descending not required
    lengths = jnp.asarray(lengths_host, dtype=jnp.int32)
    t_out = int(max(lengths_host))                # pad_packed_sequence length

    params = init_params(k_p, input_size, hidden_size, output_size)
    params_p = pad_and_fuse_params(
        params, input_size, hidden_size, output_size, Ip, Hp, Op
    )

    # TODO(synk): final (h_n, c_n) are discarded by the PyTorch module; if ever
    # needed they would have to be frozen at t == lengths[b]-1 to match
    # packed-sequence semantics.
    out = rnn_forward(x, lengths, params_p, t_out, output_size)
    out = jax.block_until_ready(out)

    assert out.shape == (B, t_out, output_size)
    assert bool(jnp.all(jnp.isfinite(out)))
    print("KERNEL_OK")
</pallas_src>

<mosaic_0001>
module attributes {stable_mosaic.version = 11 : i64} {
  func.func @rnn_lstm_kernel(%arg0: memref<8x8x128xf32, #tpu.memory_space<vmem>>, %arg1: memref<8x1xi32, #tpu.memory_space<vmem>>, %arg2: memref<128x512xbf16, #tpu.memory_space<vmem>>, %arg3: memref<128x512xbf16, #tpu.memory_space<vmem>>, %arg4: memref<1x512xf32, #tpu.memory_space<vmem>>, %arg5: memref<256x512xbf16, #tpu.memory_space<vmem>>, %arg6: memref<1x512xf32, #tpu.memory_space<vmem>>, %arg7: memref<128x128xbf16, #tpu.memory_space<vmem>>, %arg8: memref<1x128xf32, #tpu.memory_space<vmem>>, %arg9: memref<64x128xf32, #tpu.memory_space<vmem>>, %arg10: memref<8x8x512xf32, #tpu.memory_space<vmem>>, %arg11: memref<8x8x128xf32, #tpu.memory_space<vmem>>) attributes {dimension_semantics = [], scalar_prefetch = 0 : i64, scratch_operands = 2 : i64, tpu.core_type = #tpu.core_type<tc>} {
    %c0 = arith.constant 0 : index
    %c0_0 = arith.constant 0 : index
    %c0_1 = arith.constant 0 : index
    %0 = vector.load %arg0[%c0, %c0_0, %c0_1] : memref<8x8x128xf32, #tpu.memory_space<vmem>>, vector<8x8x128xf32>
    %1 = vector.shape_cast %0 : vector<8x8x128xf32> to vector<64x128xf32>
    %2 = arith.truncf %1 : vector<64x128xf32> to vector<64x128xbf16>
    %c0_2 = arith.constant 0 : index
    %c0_3 = arith.constant 0 : index
    %3 = vector.load %arg2[%c0_2, %c0_3] : memref<128x512xbf16, #tpu.memory_space<vmem>>, vector<128x512xbf16>
    %cst = arith.constant dense<0.000000e+00> : vector<64x512xf32>
    %4 = tpu.matmul %2, %3, %cst {dimension_numbers = #tpu.dot_dimension_numbers<[1], [0], [0], [1], [0, 0, 1, 1], [], []>} : vector<64x128xbf16>, vector<128x512xbf16>, vector<64x512xf32> -> vector<64x512xf32>
    %c0_4 = arith.constant 0 : index
    %c0_5 = arith.constant 0 : index
    %5 = vector.load %arg4[%c0_4, %c0_5] : memref<1x512xf32, #tpu.memory_space<vmem>>, vector<1x512xf32>
    %6 = vector.broadcast %5 : vector<1x512xf32> to vector<64x512xf32>
    %7 = arith.addf %4, %6 : vector<64x512xf32>
    %8 = vector.shape_cast %7 : vector<64x512xf32> to vector<8x8x512xf32>
    %c0_6 = arith.constant 0 : index
    %c0_7 = arith.constant 0 : index
    %c0_8 = arith.constant 0 : index
    %9 = vector.load %arg10[%c0_6, %c0_7, %c0_8] : memref<8x8x512xf32, #tpu.memory_space<vmem>>, vector<8x8x512xf32>
    tpu.vector_store %arg10[%c0_6, %c0_7, %c0_8], %8 {strides = array<i32>} : memref<8x8x512xf32, #tpu.memory_space<vmem>>, vector<8x8x512xf32>,
    %c0_9 = arith.constant 0 : index
    %c0_10 = arith.constant 0 : index
    %10 = vector.load %arg3[%c0_9, %c0_10] : memref<128x512xbf16, #tpu.memory_space<vmem>>, vector<128x512xbf16>
    %c0_11 = arith.constant 0 : index
    %c0_12 = arith.constant 0 : index
    %11 = vector.load %arg5[%c0_11, %c0_12] : memref<256x512xbf16, #tpu.memory_space<vmem>>, vector<256x512xbf16>
    %c0_13 = arith.constant 0 : index
    %c0_14 = arith.constant 0 : index
    %12 = vector.load %arg6[%c0_13, %c0_14] : memref<1x512xf32, #tpu.memory_space<vmem>>, vector<1x512xf32>
    %13 = vector.shape_cast %12 : vector<1x512xf32> to vector<1x512xf32>
    %14 = vector.broadcast %13 : vector<1x512xf32> to vector<8x512xf32>
    %cst_15 = arith.constant 0.000000e+00 : f32
    %15 = vector.broadcast %cst_15 : f32 to vector<8x128xf32>
    %c0_i32 = arith.constant 0 : i32
    %16 = arith.index_cast %c0_i32 : i32 to index
    %c0_16 = arith.constant 0 : index
    %c0_17 = arith.constant 0 : index
    %17 = vector.load %arg10[%16, %c0_16, %c0_17] : memref<8x8x512xf32, #tpu.memory_space<vmem>>, vector<1x8x512xf32>
    %18 = vector.shape_cast %17 : vector<1x8x512xf32> to vector<8x512xf32>
    %19 = arith.truncf %15 : vector<8x128xf32> to vector<8x128xbf16>
    %cst_18 = arith.constant dense<0.000000e+00> : vector<8x512xf32>
    %20 = tpu.matmul %19, %10, %cst_18 {dimension_numbers = #tpu.dot_dimension_numbers<[1], [0], [0], [1], [0, 0, 1, 1], [], []>} : vector<8x128xbf16>, vector<128x512xbf16>, vector<8x512xf32> -> vector<8x512xf32>
    %21 = arith.addf %18, %20 : vector<8x512xf32>
    %22 = vector.extract_strided_slice %21 {offsets = [0, 0], sizes = [8, 128], strides = [1, 1]} : vector<8x512xf32> to vector<8x128xf32>
    %cst_19 = arith.constant 5.000000e-01 : f32
    %23 = vector.broadcast %cst_19 : f32 to vector<8x128xf32>
    %24 = arith.mulf %23, %22 : vector<8x128xf32>
    %25 = math.tanh %24 : vector<8x128xf32>
    %cst_20 = arith.constant 5.000000e-01 : f32
    %26 = vector.broadcast %cst_20 : f32 to vector<8x128xf32>
    %27 = arith.mulf %26, %25 : vector<8x128xf32>
    %cst_21 = arith.constant 5.000000e-01 : f32
    %28 = vector.broadcast %cst_21 : f32 to vector<8x128xf32>
    %29 = arith.addf %27, %28 : vector<8x128xf32>
    %30 = vector.extract_strided_slice %21 {offsets = [0, 128], sizes = [8, 128], strides = [1, 1]} : vector<8x512xf32> to vector<8x128xf32>
    %cst_22 = arith.constant 5.000000e-01 : f32
    %31 = vector.broadcast %cst_22 : f32 to vector<8x128xf32>
    %32 = arith.mulf %31, %30 : vector<8x128xf32>
    %33 = math.tanh %32 : vector<8x128xf32>
    %cst_23 = arith.constant 5.000000e-01 : f32
    %34 = vector.broadcast %cst_23 : f32 to vector<8x128xf32>
    %35 = arith.mulf %34, %33 : vector<8x128xf32>
    %cst_24 = arith.constant 5.000000e-01 : f32
    %36 = vector.broadcast %cst_24 : f32 to vector<8x128xf32>
    %37 = arith.addf %35, %36 : vector<8x128xf32>
    %38 = vector.extract_strided_slice %21 {offsets = [0, 256], sizes = [8, 128], strides = [1, 1]} : vector<8x512xf32> to vector<8x128xf32>
    %39 = math.tanh %38 : vector<8x128xf32>
    %40 = vector.extract_strided_slice %21 {offsets = [0, 384], sizes = [8, 128], strides = [1, 1]} : vector<8x512xf32> to vector<8x128xf32>
    %cst_25 = arith.constant 5.000000e-01 : f32
    %41 = vector.broadcast %cst_25 : f32 to vector<8x128xf32>
    %42 = arith.mulf %41, %40 : vector<8x128xf32>
    %43 = math.tanh %42 : vector<8x128xf32>
    %cst_26 = arith.constant 5.000000e-01 : f32
    %44 = vector.broadcast %cst_26 : f32 to vector<8x128xf32>
    %45 = arith.mulf %44, %43 : vector<8x128xf32>
    %cst_27 = arith.constant 5.000000e-01 : f32
    %46 = vector.broadcast %cst_27 : f32 to vector<8x128xf32>
    %47 = arith.addf %45, %46 : vector<8x128xf32>
    %48 = arith.mulf %37, %15 : vector<8x128xf32>
    %49 = arith.mulf %29, %39 : vector<8x128xf32>
    %50 = arith.addf %48, %49 : vector<8x128xf32>
    %51 = math.tanh %50 : vector<8x128xf32>
    %52 = arith.mulf %47, %51 : vector<8x128xf32>
    %53 = arith.truncf %52 : vector<8x128xf32> to vector<8x128xbf16>
    %54 = arith.truncf %15 : vector<8x128xf32> to vector<8x128xbf16>
    %55 = tpu.concatenate %53, %54 in 1 : vector<8x128xbf16>, vector<8x128xbf16> -> vector<8x256xbf16>
    %cst_28 = arith.constant dense<0.000000e+00> : vector<8x512xf32>
    %56 = tpu.matmul %55, %11, %cst_28 {dimension_numbers = #tpu.dot_dimension_numbers<[1], [0], [0], [1], [0, 0, 1, 1], [], []>} : vector<8x256xbf16>, vector<256x512xbf16>, vector<8x512xf32> -> vector<8x512xf32>
    %57 = arith.addf %56, %14 : vector<8x512xf32>
    %58 = vector.extract_strided_slice %57 {offsets = [0, 0], sizes = [8, 128], strides = [1, 1]} : vector<8x512xf32> to vector<8x128xf32>
    %cst_29 = arith.constant 5.000000e-01 : f32
    %59 = vector.broadcast %cst_29 : f32 to vector<8x128xf32>
    %60 = arith.mulf %59, %58 : vector<8x128xf32>
    %61 = math.tanh %60 : vector<8x128xf32>
    %cst_30 = arith.constant 5.000000e-01 : f32
    %62 = vector.broadcast %cst_30 : f32 to vector<8x128xf32>
    %63 = arith.mulf %62, %61 : vector<8x128xf32>
    %cst_31 = arith.constant 5.000000e-01 : f32
    %64 = vector.broadcast %cst_31 : f32 to vector<8x128xf32>
    %65 = arith.addf %63, %64 : vector<8x128xf32>
    %66 = vector.extract_strided_slice %57 {offsets = [0, 128], sizes = [8, 128], strides = [1, 1]} : vector<8x512xf32> to vector<8x128xf32>
    %cst_32 = arith.constant 5.000000e-01 : f32
    %67 = vector.broadcast %cst_32 : f32 to vector<8x128xf32>
    %68 = arith.mulf %67, %66 : vector<8x128xf32>
    %69 = math.tanh %68 : vector<8x128xf32>
    %cst_33 = arith.constant 5.000000e-01 : f32
    %70 = vector.broadcast %cst_33 : f32 to vector<8x128xf32>
    %71 = arith.mulf %70, %69 : vector<8x128xf32>
    %cst_34 = arith.constant 5.000000e-01 : f32
    %72 = vector.broadcast %cst_34 : f32 to vector<8x128xf32>
    %73 = arith.addf %71, %72 : vector<8x128xf32>
    %74 = vector.extract_strided_slice %57 {offsets = [0, 256], sizes = [8, 128], strides = [1, 1]} : vector<8x512xf32> to vector<8x128xf32>
    %75 = math.tanh %74 : vector<8x128xf32>
    %76 = vector.extract_strided_slice %57 {offsets = [0, 384], sizes = [8, 128], strides = [1, 1]} : vector<8x512xf32> to vector<8x128xf32>
    %cst_35 = arith.constant 5.000000e-01 : f32
    %77 = vector.broadcast %cst_35 : f32 to vector<8x128xf32>
    %78 = arith.mulf %77, %76 : vector<8x128xf32>
    %79 = math.tanh %78 : vector<8x128xf32>
    %cst_36 = arith.constant 5.000000e-01 : f32
    %80 = vector.broadcast %cst_36 : f32 to vector<8x128xf32>
    %81 = arith.mulf %80, %79 : vector<8x128xf32>
    %cst_37 = arith.constant 5.000000e-01 : f32
    %82 = vector.broadcast %cst_37 : f32 to vector<8x128xf32>
    %83 = arith.addf %81, %82 : vector<8x128xf32>
    %84 = arith.mulf %73, %15 : vector<8x128xf32>
    %85 = arith.mulf %65, %75 : vector<8x128xf32>
    %86 = arith.addf %84, %85 : vector<8x128xf32>
    %87 = math.tanh %86 : vector<8x128xf32>
    %88 = arith.mulf %83, %87 : vector<8x128xf32>
    %89 = arith.index_cast %c0_i32 : i32 to index
    %c0_38 = arith.constant 0 : index
    %c0_39 = arith.constant 0 : index
    %90 = vector.load %arg11[%89, %c0_38, %c0_39] : memref<8x8x128xf32, #tpu.memory_space<vmem>>, vector<1x8x128xf32>
    %91 = vector.shape_cast %90 : vector<1x8x128xf32> to vector<8x128xf32>
    %92 = vector.shape_cast %88 : vector<8x128xf32> to vector<1x8x128xf32>
    tpu.vector_store %arg11[%89, %c0_38, %c0_39], %92 {strides = array<i32>} : memref<8x8x128xf32, #tpu.memory_space<vmem>>, vector<1x8x128xf32>,
    %c1_i32 = arith.constant 1 : i32
    %93 = arith.index_cast %c1_i32 : i32 to index
    %c0_40 = arith.constant 0 : index
    %c0_41 = arith.constant 0 : index
    %94 = vector.load %arg10[%93, %c0_40, %c0_41] : memref<8x8x512xf32, #tpu.memory_space<vmem>>, vector<1x8x512xf32>
    %95 = vector.shape_cast %94 : vector<1x8x512xf32> to vector<8x512xf32>
    %96 = arith.truncf %52 : vector<8x128xf32> to vector<8x128xbf16>
    %cst_42 = arith.constant dense<0.000000e+00> : vector<8x512xf32>
    %97 = tpu.matmul %96, %10, %cst_42 {dimension_numbers = #tpu.dot_dimension_numbers<[1], [0], [0], [1], [0, 0, 1, 1], [], []>} : vector<8x128xbf16>, vector<128x512xbf16>, vector<8x512xf32> -> vector<8x512xf32>
    %98 = arith.addf %95, %97 : vector<8x512xf32>
    %99 = vector.extract_strided_slice %98 {offsets = [0, 0], sizes = [8, 128], strides = [1, 1]} : vector<8x512xf32> to vector<8x128xf32>
    %cst_43 = arith.constant 5.000000e-01 : f32
    %100 = vector.broadcast %cst_43 : f32 to vector<8x128xf32>
    %101 = arith.mulf %100, %99 : vector<8x128xf32>
    %102 = math.tanh %101 : vector<8x128xf32>
    %cst_44 = arith.constant 5.000000e-01 : f32
    %103 = vector.broadcast %cst_44 : f32 to vector<8x128xf32>
    %104 = arith.mulf %103, %102 : vector<8x128xf32>
    %cst_45 = arith.constant 5.000000e-01 : f32
    %105 = vector.broadcast %cst_45 : f32 to vector<8x128xf32>
    %106 = arith.addf %104, %105 : vector<8x128xf32>
    %107 = vector.extract_strided_slice %98 {offsets = [0, 128], sizes = [8, 128], strides = [1, 1]} : vector<8x512xf32> to vector<8x128xf32>
    %cst_46 = arith.constant 5.000000e-01 : f32
    %108 = vector.broadcast %cst_46 : f32 to vector<8x128xf32>
    %109 = arith.mulf %108, %107 : vector<8x128xf32>
    %110 = math.tanh %109 : vector<8x128xf32>
    %cst_47 = arith.constant 5.000000e-01 : f32
    %111 = vector.broadcast %cst_47 : f32 to vector<8x128xf32>
    %112 = arith.mulf %111, %110 : vector<8x128xf32>
    %cst_48 = arith.constant 5.000000e-01 : f32
    %113 = vector.broadcast %cst_48 : f32 to vector<8x128xf32>
    %114 = arith.addf %112, %113 : vector<8x128xf32>
    %115 = vector.extract_strided_slice %98 {offsets = [0, 256], sizes = [8, 128], strides = [1, 1]} : vector<8x512xf32> to vector<8x128xf32>
    %116 = math.tanh %115 : vector<8x128xf32>
    %117 = vector.extract_strided_slice %98 {offsets = [0, 384], sizes = [8, 128], strides = [1, 1]} : vector<8x512xf32> to vector<8x128xf32>
    %cst_49 = arith.constant 5.000000e-01 : f32
    %118 = vector.broadcast %cst_49 : f32 to vector<8x128xf32>
    %119 = arith.mulf %118, %117 : vector<8x128xf32>
    %120 = math.tanh %119 : vector<8x128xf32>
    %cst_50 = arith.constant 5.000000e-01 : f32
    %121 = vector.broadcast %cst_50 : f32 to vector<8x128xf32>
    %122 = arith.mulf %121, %120 : vector<8x128xf32>
    %cst_51 = arith.constant 5.000000e-01 : f32
    %123 = vector.broadcast %cst_51 : f32 to vector<8x128xf32>
    %124 = arith.addf %122, %123 : vector<8x128xf32>
    %125 = arith.mulf %114, %50 : vector<8x128xf32>
    %126 = arith.mulf %106, %116 : vector<8x128xf32>
    %127 = arith.addf %125, %126 : vector<8x128xf32>
    %128 = math.tanh %127 : vector<8x128xf32>
    %129 = arith.mulf %124, %128 : vector<8x128xf32>
    %130 = arith.truncf %129 : vector<8x128xf32> to vector<8x128xbf16>
    %131 = arith.truncf %88 : vector<8x128xf32> to vector<8x128xbf16>
    %132 = tpu.concatenate %130, %131 in 1 : vector<8x128xbf16>, vector<8x128xbf16> -> vector<8x256xbf16>
    %cst_52 = arith.constant dense<0.000000e+00> : vector<8x512xf32>
    %133 = tpu.matmul %132, %11, %cst_52 {dimension_numbers = #tpu.dot_dimension_numbers<[1], [0], [0], [1], [0, 0, 1, 1], [], []>} : vector<8x256xbf16>, vector<256x512xbf16>, vector<8x512xf32> -> vector<8x512xf32>
    %134 = arith.addf %133, %14 : vector<8x512xf32>
    %135 = vector.extract_strided_slice %134 {offsets = [0, 0], sizes = [8, 128], strides = [1, 1]} : vector<8x512xf32> to vector<8x128xf32>
    %cst_53 = arith.constant 5.000000e-01 : f32
    %136 = vector.broadcast %cst_53 : f32 to vector<8x128xf32>
    %137 = arith.mulf %136, %135 : vector<8x128xf32>
    %138 = math.tanh %137 : vector<8x128xf32>
    %cst_54 = arith.constant 5.000000e-01 : f32
    %139 = vector.broadcast %cst_54 : f32 to vector<8x128xf32>
    %140 = arith.mulf %139, %138 : vector<8x128xf32>
    %cst_55 = arith.constant 5.000000e-01 : f32
    %141 = vector.broadcast %cst_55 : f32 to vector<8x128xf32>
    %142 = arith.addf %140, %141 : vector<8x128xf32>
    %143 = vector.extract_strided_slice %134 {offsets = [0, 128], sizes = [8, 128], strides = [1, 1]} : vector<8x512xf32> to vector<8x128xf32>
    %cst_56 = arith.constant 5.000000e-01 : f32
    %144 = vector.broadcast %cst_56 : f32 to vector<8x128xf32>
    %145 = arith.mulf %144, %143 : vector<8x128xf32>
    %146 = math.tanh %145 : vector<8x128xf32>
    %cst_57 = arith.constant 5.000000e-01 : f32
    %147 = vector.broadcast %cst_57 : f32 to vector<8x128xf32>
    %148 = arith.mulf %147, %146 : vector<8x128xf32>
    %cst_58 = arith.constant 5.000000e-01 : f32
    %149 = vector.broadcast %cst_58 : f32 to vector<8x128xf32>
    %150 = arith.addf %148, %149 : vector<8x128xf32>
    %151 = vector.extract_strided_slice %134 {offsets = [0, 256], sizes = [8, 128], strides = [1, 1]} : vector<8x512xf32> to vector<8x128xf32>
    %152 = math.tanh %151 : vector<8x128xf32>
    %153 = vector.extract_strided_slice %134 {offsets = [0, 384], sizes = [8, 128], strides = [1, 1]} : vector<8x512xf32> to vector<8x128xf32>
    %cst_59 = arith.constant 5.000000e-01 : f32
    %154 = vector.broadcast %cst_59 : f32 to vector<8x128xf32>
    %155 = arith.mulf %154, %153 : vector<8x128xf32>
    %156 = math.tanh %155 : vector<8x128xf32>
    %cst_60 = arith.constant 5.000000e-01 : f32
    %157 = vector.broadcast %cst_60 : f32 to vector<8x128xf32>
    %158 = arith.mulf %157, %156 : vector<8x128xf32>
    %cst_61 = arith.constant 5.000000e-01 : f32
    %159 = vector.broadcast %cst_61 : f32 to vector<8x128xf32>
    %160 = arith.addf %158, %159 : vector<8x128xf32>
    %161 = arith.mulf %150, %86 : vector<8x128xf32>
    %162 = arith.mulf %142, %152 : vector<8x128xf32>
    %163 = arith.addf %161, %162 : vector<8x128xf32>
    %164 = math.tanh %163 : vector<8x128xf32>
    %165 = arith.mulf %160, %164 : vector<8x128xf32>
    %166 = arith.index_cast %c1_i32 : i32 to index
    %c0_62 = arith.constant 0 : index
    %c0_63 = arith.constant 0 : index
    %167 = vector.load %arg11[%166, %c0_62, %c0_63] : memref<8x8x128xf32, #tpu.memory_space<vmem>>, vector<1x8x128xf32>
    %168 = vector.shape_cast %167 : vector<1x8x128xf32> to vector<8x128xf32>
    %169 = vector.shape_cast %165 : vector<8x128xf32> to vector<1x8x128xf32>
    tpu.vector_store %arg11[%166, %c0_62, %c0_63], %169 {strides = array<i32>} : memref<8x8x128xf32, #tpu.memory_space<vmem>>, vector<1x8x128xf32>,
    %c2_i32 = arith.constant 2 : i32
    %170 = arith.index_cast %c2_i32 : i32 to index
    %c0_64 = arith.constant 0 : index
    %c0_65 = arith.constant 0 : index
    %171 = vector.load %arg10[%170, %c0_64, %c0_65] : memref<8x8x512xf32, #tpu.memory_space<vmem>>, vector<1x8x512xf32>
    %172 = vector.shape_cast %171 : vector<1x8x512xf32> to vector<8x512xf32>
    %173 = arith.truncf %129 : vector<8x128xf32> to vector<8x128xbf16>
    %cst_66 = arith.constant dense<0.000000e+00> : vector<8x512xf32>
    %174 = tpu.matmul %173, %10, %cst_66 {dimension_numbers = #tpu.dot_dimension_numbers<[1], [0], [0], [1], [0, 0, 1, 1], [], []>} : vector<8x128xbf16>, vector<128x512xbf16>, vector<8x512xf32> -> vector<8x512xf32>
    %175 = arith.addf %172, %174 : vector<8x512xf32>
    %176 = vector.extract_strided_slice %175 {offsets = [0, 0], sizes = [8, 128], strides = [1, 1]} : vector<8x512xf32> to vector<8x128xf32>
    %cst_67 = arith.constant 5.000000e-01 : f32
    %177 = vector.broadcast %cst_67 : f32 to vector<8x128xf32>
    %178 = arith.mulf %177, %176 : vector<8x128xf32>
    %179 = math.tanh %178 : vector<8x128xf32>
    %cst_68 = arith.constant 5.000000e-01 : f32
    %180 = vector.broadcast %cst_68 : f32 to vector<8x128xf32>
    %181 = arith.mulf %180, %179 : vector<8x128xf32>
    %cst_69 = arith.constant 5.000000e-01 : f32
    %182 = vector.broadcast %cst_69 : f32 to vector<8x128xf32>
    %183 = arith.addf %181, %182 : vector<8x128xf32>
    %184 = vector.extract_strided_slice %175 {offsets = [0, 128], sizes = [8, 128], strides = [1, 1]} : vector<8x512xf32> to vector<8x128xf32>
    %cst_70 = arith.constant 5.000000e-01 : f32
    %185 = vector.broadcast %cst_70 : f32 to vector<8x128xf32>
    %186 = arith.mulf %185, %184 : vector<8x128xf32>
    %187 = math.tanh %186 : vector<8x128xf32>
    %cst_71 = arith.constant 5.000000e-01 : f32
    %188 = vector.broadcast %cst_71 : f32 to vector<8x128xf32>
    %189 = arith.mulf %188, %187 : vector<8x128xf32>
    %cst_72 = arith.constant 5.000000e-01 : f32
    %190 = vector.broadcast %cst_72 : f32 to vector<8x128xf32>
    %191 = arith.addf %189, %190 : vector<8x128xf32>
    %192 = vector.extract_strided_slice %175 {offsets = [0, 256], sizes = [8, 128], strides = [1, 1]} : vector<8x512xf32> to vector<8x128xf32>
    %193 = math.tanh %192 : vector<8x128xf32>
    %194 = vector.extract_strided_slice %175 {offsets = [0, 384], sizes = [8, 128], strides = [1, 1]} : vector<8x512xf32> to vector<8x128xf32>
    %cst_73 = arith.constant 5.000000e-01 : f32
    %195 = vector.broadcast %cst_73 : f32 to vector<8x128xf32>
    %196 = arith.mulf %195, %194 : vector<8x128xf32>
    %197 = math.tanh %196 : vector<8x128xf32>
    %cst_74 = arith.constant 5.000000e-01 : f32
    %198 = vector.broadcast %cst_74 : f32 to vector<8x128xf32>
    %199 = arith.mulf %198, %197 : vector<8x128xf32>
    %cst_75 = arith.constant 5.000000e-01 : f32
    %200 = vector.broadcast %cst_75 : f32 to vector<8x128xf32>
    %201 = arith.addf %199, %200 : vector<8x128xf32>
    %202 = arith.mulf %191, %127 : vector<8x128xf32>
    %203 = arith.mulf %183, %193 : vector<8x128xf32>
    %204 = arith.addf %202, %203 : vector<8x128xf32>
    %205 = math.tanh %204 : vector<8x128xf32>
    %206 = arith.mulf %201, %205 : vector<8x128xf32>
    %207 = arith.truncf %206 : vector<8x128xf32> to vector<8x128xbf16>
    %208 = arith.truncf %165 : vector<8x128xf32> to vector<8x128xbf16>
    %209 = tpu.concatenate %207, %208 in 1 : vector<8x128xbf16>, vector<8x128xbf16> -> vector<8x256xbf16>
    %cst_76 = arith.constant dense<0.000000e+00> : vector<8x512xf32>
    %210 = tpu.matmul %209, %11, %cst_76 {dimension_numbers = #tpu.dot_dimension_numbers<[1], [0], [0], [1], [0, 0, 1, 1], [], []>} : vector<8x256xbf16>, vector<256x512xbf16>, vector<8x512xf32> -> vector<8x512xf32>
    %211 = arith.addf %210, %14 : vector<8x512xf32>
    %212 = vector.extract_strided_slice %211 {offsets = [0, 0], sizes = [8, 128], strides = [1, 1]} : vector<8x512xf32> to vector<8x128xf32>
    %cst_77 = arith.constant 5.000000e-01 : f32
    %213 = vector.broadcast %cst_77 : f32 to vector<8x128xf32>
    %214 = arith.mulf %213, %212 : vector<8x128xf32>
    %215 = math.tanh %214 : vector<8x128xf32>
    %cst_78 = arith.constant 5.000000e-01 : f32
    %216 = vector.broadcast %cst_78 : f32 to vector<8x128xf32>
    %217 = arith.mulf %216, %215 : vector<8x128xf32>
    %cst_79 = arith.constant 5.000000e-01 : f32
    %218 = vector.broadcast %cst_79 : f32 to vector<8x128xf32>
    %219 = arith.addf %217, %218 : vector<8x128xf32>
    %220 = vector.extract_strided_slice %211 {offsets = [0, 128], sizes = [8, 128], strides = [1, 1]} : vector<8x512xf32> to vector<8x128xf32>
    %cst_80 = arith.constant 5.000000e-01 : f32
    %221 = vector.broadcast %cst_80 : f32 to vector<8x128xf32>
    %222 = arith.mulf %221, %220 : vector<8x128xf32>
    %223 = math.tanh %222 : vector<8x128xf32>
    %cst_81 = arith.constant 5.000000e-01 : f32
    %224 = vector.broadcast %cst_81 : f32 to vector<8x128xf32>
    %225 = arith.mulf %224, %223 : vector<8x128xf32>
    %cst_82 = arith.constant 5.000000e-01 : f32
    %226 = vector.broadcast %cst_82 : f32 to vector<8x128xf32>
    %227 = arith.addf %225, %226 : vector<8x128xf32>
    %228 = vector.extract_strided_slice %211 {offsets = [0, 256], sizes = [8, 128], strides = [1, 1]} : vector<8x512xf32> to vector<8x128xf32>
    %229 = math.tanh %228 : vector<8x128xf32>
    %230 = vector.extract_strided_slice %211 {offsets = [0, 384], sizes = [8, 128], strides = [1, 1]} : vector<8x512xf32> to vector<8x128xf32>
    %cst_83 = arith.constant 5.000000e-01 : f32
    %231 = vector.broadcast %cst_83 : f32 to vector<8x128xf32>
    %232 = arith.mulf %231, %230 : vector<8x128xf32>
    %233 = math.tanh %232 : vector<8x128xf32>
    %cst_84 = arith.constant 5.000000e-01 : f32
    %234 = vector.broadcast %cst_84 : f32 to vector<8x128xf32>
    %235 = arith.mulf %234, %233 : vector<8x128xf32>
    %cst_85 = arith.constant 5.000000e-01 : f32
    %236 = vector.broadcast %cst_85 : f32 to vector<8x128xf32>
    %237 = arith.addf %235, %236 : vector<8x128xf32>
    %238 = arith.mulf %227, %163 : vector<8x128xf32>
    %239 = arith.mulf %219, %229 : vector<8x128xf32>
    %240 = arith.addf %238, %239 : vector<8x128xf32>
    %241 = math.tanh %240 : vector<8x128xf32>
    %242 = arith.mulf %237, %241 : vector<8x128xf32>
    %243 = arith.index_cast %c2_i32 : i32 to index
    %c0_86 = arith.constant 0 : index
    %c0_87 = arith.constant 0 : index
    %244 = vector.load %arg11[%243, %c0_86, %c0_87] : memref<8x8x128xf32, #tpu.memory_space<vmem>>, vector<1x8x128xf32>
    %245 = vector.shape_cast %244 : vector<1x8x128xf32> to vector<8x128xf32>
    %246 = vector.shape_cast %242 : vector<8x128xf32> to vector<1x8x128xf32>
    tpu.vector_store %arg11[%243, %c0_86, %c0_87], %246 {strides = array<i32>} : memref<8x8x128xf32, #tpu.memory_space<vmem>>, vector<1x8x128xf32>,
    %c3_i32 = arith.constant 3 : i32
    %247 = arith.index_cast %c3_i32 : i32 to index
    %c0_88 = arith.constant 0 : index
    %c0_89 = arith.constant 0 : index
    %248 = vector.load %arg10[%247, %c0_88, %c0_89] : memref<8x8x512xf32, #tpu.memory_space<vmem>>, vector<1x8x512xf32>
    %249 = vector.shape_cast %248 : vector<1x8x512xf32> to vector<8x512xf32>
    %250 = arith.truncf %206 : vector<8x128xf32> to vector<8x128xbf16>
    %cst_90 = arith.constant dense<0.000000e+00> : vector<8x512xf32>
    %251 = tpu.matmul %250, %10, %cst_90 {dimension_numbers = #tpu.dot_dimension_numbers<[1], [0], [0], [1], [0, 0, 1, 1], [], []>} : vector<8x128xbf16>, vector<128x512xbf16>, vector<8x512xf32> -> vector<8x512xf32>
    %252 = arith.addf %249, %251 : vector<8x512xf32>
    %253 = vector.extract_strided_slice %252 {offsets = [0, 0], sizes = [8, 128], strides = [1, 1]} : vector<8x512xf32> to vector<8x128xf32>
    %cst_91 = arith.constant 5.000000e-01 : f32
    %254 = vector.broadcast %cst_91 : f32 to vector<8x128xf32>
    %255 = arith.mulf %254, %253 : vector<8x128xf32>
    %256 = math.tanh %255 : vector<8x128xf32>
    %cst_92 = arith.constant 5.000000e-01 : f32
    %257 = vector.broadcast %cst_92 : f32 to vector<8x128xf32>
    %258 = arith.mulf %257, %256 : vector<8x128xf32>
    %cst_93 = arith.constant 5.000000e-01 : f32
    %259 = vector.broadcast %cst_93 : f32 to vector<8x128xf32>
    %260 = arith.addf %258, %259 : vector<8x128xf32>
    %261 = vector.extract_strided_slice %252 {offsets = [0, 128], sizes = [8, 128], strides = [1, 1]} : vector<8x512xf32> to vector<8x128xf32>
    %cst_94 = arith.constant 5.000000e-01 : f32
    %262 = vector.broadcast %cst_94 : f32 to vector<8x128xf32>
    %263 = arith.mulf %262, %261 : vector<8x128xf32>
    %264 = math.tanh %263 : vector<8x128xf32>
    %cst_95 = arith.constant 5.000000e-01 : f32
    %265 = vector.broadcast %cst_95 : f32 to vector<8x128xf32>
    %266 = arith.mulf %265, %264 : vector<8x128xf32>
    %cst_96 = arith.constant 5.000000e-01 : f32
    %267 = vector.broadcast %cst_96 : f32 to vector<8x128xf32>
    %268 = arith.addf %266, %267 : vector<8x128xf32>
    %269 = vector.extract_strided_slice %252 {offsets = [0, 256], sizes = [8, 128], strides = [1, 1]} : vector<8x512xf32> to vector<8x128xf32>
    %270 = math.tanh %269 : vector<8x128xf32>
    %271 = vector.extract_strided_slice %252 {offsets = [0, 384], sizes = [8, 128], strides = [1, 1]} : vector<8x512xf32> to vector<8x128xf32>
    %cst_97 = arith.constant 5.000000e-01 : f32
    %272 = vector.broadcast %cst_97 : f32 to vector<8x128xf32>
    %273 = arith.mulf %272, %271 : vector<8x128xf32>
    %274 = math.tanh %273 : vector<8x128xf32>
    %cst_98 = arith.constant 5.000000e-01 : f32
    %275 = vector.broadcast %cst_98 : f32 to vector<8x128xf32>
    %276 = arith.mulf %275, %274 : vector<8x128xf32>
    %cst_99 = arith.constant 5.000000e-01 : f32
    %277 = vector.broadcast %cst_99 : f32 to vector<8x128xf32>
    %278 = arith.addf %276, %277 : vector<8x128xf32>
    %279 = arith.mulf %268, %204 : vector<8x128xf32>
    %280 = arith.mulf %260, %270 : vector<8x128xf32>
    %281 = arith.addf %279, %280 : vector<8x128xf32>
    %282 = math.tanh %281 : vector<8x128xf32>
    %283 = arith.mulf %278, %282 : vector<8x128xf32>
    %284 = arith.truncf %283 : vector<8x128xf32> to vector<8x128xbf16>
    %285 = arith.truncf %242 : vector<8x128xf32> to vector<8x128xbf16>
    %286 = tpu.concatenate %284, %285 in 1 : vector<8x128xbf16>, vector<8x128xbf16> -> vector<8x256xbf16>
    %cst_100 = arith.constant dense<0.000000e+00> : vector<8x512xf32>
    %287 = tpu.matmul %286, %11, %cst_100 {dimension_numbers = #tpu.dot_dimension_numbers<[1], [0], [0], [1], [0, 0, 1, 1], [], []>} : vector<8x256xbf16>, vector<256x512xbf16>, vector<8x512xf32> -> vector<8x512xf32>
    %288 = arith.addf %287, %14 : vector<8x512xf32>
    %289 = vector.extract_strided_slice %288 {offsets = [0, 0], sizes = [8, 128], strides = [1, 1]} : vector<8x512xf32> to vector<8x128xf32>
    %cst_101 = arith.constant 5.000000e-01 : f32
    %290 = vector.broadcast %cst_101 : f32 to vector<8x128xf32>
    %291 = arith.mulf %290, %289 : vector<8x128xf32>
    %292 = math.tanh %291 : vector<8x128xf32>
    %cst_102 = arith.constant 5.000000e-01 : f32
    %293 = vector.broadcast %cst_102 : f32 to vector<8x128xf32>
    %294 = arith.mulf %293, %292 : vector<8x128xf32>
    %cst_103 = arith.constant 5.000000e-01 : f32
    %295 = vector.broadcast %cst_103 : f32 to vector<8x128xf32>
    %296 = arith.addf %294, %295 : vector<8x128xf32>
    %297 = vector.extract_strided_slice %288 {offsets = [0, 128], sizes = [8, 128], strides = [1, 1]} : vector<8x512xf32> to vector<8x128xf32>
    %cst_104 = arith.constant 5.000000e-01 : f32
    %298 = vector.broadcast %cst_104 : f32 to vector<8x128xf32>
    %299 = arith.mulf %298, %297 : vector<8x128xf32>
    %300 = math.tanh %299 : vector<8x128xf32>
    %cst_105 = arith.constant 5.000000e-01 : f32
    %301 = vector.broadcast %cst_105 : f32 to vector<8x128xf32>
    %302 = arith.mulf %301, %300 : vector<8x128xf32>
    %cst_106 = arith.constant 5.000000e-01 : f32
    %303 = vector.broadcast %cst_106 : f32 to vector<8x128xf32>
    %304 = arith.addf %302, %303 : vector<8x128xf32>
    %305 = vector.extract_strided_slice %288 {offsets = [0, 256], sizes = [8, 128], strides = [1, 1]} : vector<8x512xf32> to vector<8x128xf32>
    %306 = math.tanh %305 : vector<8x128xf32>
    %307 = vector.extract_strided_slice %288 {offsets = [0, 384], sizes = [8, 128], strides = [1, 1]} : vector<8x512xf32> to vector<8x128xf32>
    %cst_107 = arith.constant 5.000000e-01 : f32
    %308 = vector.broadcast %cst_107 : f32 to vector<8x128xf32>
    %309 = arith.mulf %308, %307 : vector<8x128xf32>
    %310 = math.tanh %309 : vector<8x128xf32>
    %cst_108 = arith.constant 5.000000e-01 : f32
    %311 = vector.broadcast %cst_108 : f32 to vector<8x128xf32>
    %312 = arith.mulf %311, %310 : vector<8x128xf32>
    %cst_109 = arith.constant 5.000000e-01 : f32
    %313 = vector.broadcast %cst_109 : f32 to vector<8x128xf32>
    %314 = arith.addf %312, %313 : vector<8x128xf32>
    %315 = arith.mulf %304, %240 : vector<8x128xf32>
    %316 = arith.mulf %296, %306 : vector<8x128xf32>
    %317 = arith.addf %315, %316 : vector<8x128xf32>
    %318 = math.tanh %317 : vector<8x128xf32>
    %319 = arith.mulf %314, %318 : vector<8x128xf32>
    %320 = arith.index_cast %c3_i32 : i32 to index
    %c0_110 = arith.constant 0 : index
    %c0_111 = arith.constant 0 : index
    %321 = vector.load %arg11[%320, %c0_110, %c0_111] : memref<8x8x128xf32, #tpu.memory_space<vmem>>, vector<1x8x128xf32>
    %322 = vector.shape_cast %321 : vector<1x8x128xf32> to vector<8x128xf32>
    %323 = vector.shape_cast %319 : vector<8x128xf32> to vector<1x8x128xf32>
    tpu.vector_store %arg11[%320, %c0_110, %c0_111], %323 {strides = array<i32>} : memref<8x8x128xf32, #tpu.memory_space<vmem>>, vector<1x8x128xf32>,
    %c4_i32 = arith.constant 4 : i32
    %324 = arith.index_cast %c4_i32 : i32 to index
    %c0_112 = arith.constant 0 : index
    %c0_113 = arith.constant 0 : index
    %325 = vector.load %arg10[%324, %c0_112, %c0_113] : memref<8x8x512xf32, #tpu.memory_space<vmem>>, vector<1x8x512xf32>
    %326 = vector.shape_cast %325 : vector<1x8x512xf32> to vector<8x512xf32>
    %327 = arith.truncf %283 : vector<8x128xf32> to vector<8x128xbf16>
    %cst_114 = arith.constant dense<0.000000e+00> : vector<8x512xf32>
    %328 = tpu.matmul %327, %10, %cst_114 {dimension_numbers = #tpu.dot_dimension_numbers<[1], [0], [0], [1], [0, 0, 1, 1], [], []>} : vector<8x128xbf16>, vector<128x512xbf16>, vector<8x512xf32> -> vector<8x512xf32>
    %329 = arith.addf %326, %328 : vector<8x512xf32>
    %330 = vector.extract_strided_slice %329 {offsets = [0, 0], sizes = [8, 128], strides = [1, 1]} : vector<8x512xf32> to vector<8x128xf32>
    %cst_115 = arith.constant 5.000000e-01 : f32
    %331 = vector.broadcast %cst_115 : f32 to vector<8x128xf32>
    %332 = arith.mulf %331, %330 : vector<8x128xf32>
    %333 = math.tanh %332 : vector<8x128xf32>
    %cst_116 = arith.constant 5.000000e-01 : f32
    %334 = vector.broadcast %cst_116 : f32 to vector<8x128xf32>
    %335 = arith.mulf %334, %333 : vector<8x128xf32>
    %cst_117 = arith.constant 5.000000e-01 : f32
    %336 = vector.broadcast %cst_117 : f32 to vector<8x128xf32>
    %337 = arith.addf %335, %336 : vector<8x128xf32>
    %338 = vector.extract_strided_slice %329 {offsets = [0, 128], sizes = [8, 128], strides = [1, 1]} : vector<8x512xf32> to vector<8x128xf32>
    %cst_118 = arith.constant 5.000000e-01 : f32
    %339 = vector.broadcast %cst_118 : f32 to vector<8x128xf32>
    %340 = arith.mulf %339, %338 : vector<8x128xf32>
    %341 = math.tanh %340 : vector<8x128xf32>
    %cst_119 = arith.constant 5.000000e-01 : f32
    %342 = vector.broadcast %cst_119 : f32 to vector<8x128xf32>
    %343 = arith.mulf %342, %341 : vector<8x128xf32>
    %cst_120 = arith.constant 5.000000e-01 : f32
    %344 = vector.broadcast %cst_120 : f32 to vector<8x128xf32>
    %345 = arith.addf %343, %344 : vector<8x128xf32>
    %346 = vector.extract_strided_slice %329 {offsets = [0, 256], sizes = [8, 128], strides = [1, 1]} : vector<8x512xf32> to vector<8x128xf32>
    %347 = math.tanh %346 : vector<8x128xf32>
    %348 = vector.extract_strided_slice %329 {offsets = [0, 384], sizes = [8, 128], strides = [1, 1]} : vector<8x512xf32> to vector<8x128xf32>
    %cst_121 = arith.constant 5.000000e-01 : f32
    %349 = vector.broadcast %cst_121 : f32 to vector<8x128xf32>
    %350 = arith.mulf %349, %348 : vector<8x128xf32>
    %351 = math.tanh %350 : vector<8x128xf32>
    %cst_122 = arith.constant 5.000000e-01 : f32
    %352 = vector.broadcast %cst_122 : f32 to vector<8x128xf32>
    %353 = arith.mulf %352, %351 : vector<8x128xf32>
    %cst_123 = arith.constant 5.000000e-01 : f32
    %354 = vector.broadcast %cst_123 : f32 to vector<8x128xf32>
    %355 = arith.addf %353, %354 : vector<8x128xf32>
    %356 = arith.mulf %345, %281 : vector<8x128xf32>
    %357 = arith.mulf %337, %347 : vector<8x128xf32>
    %358 = arith.addf %356, %357 : vector<8x128xf32>
    %359 = math.tanh %358 : vector<8x128xf32>
    %360 = arith.mulf %355, %359 : vector<8x128xf32>
    %361 = arith.truncf %360 : vector<8x128xf32> to vector<8x128xbf16>
    %362 = arith.truncf %319 : vector<8x128xf32> to vector<8x128xbf16>
    %363 = tpu.concatenate %361, %362 in 1 : vector<8x128xbf16>, vector<8x128xbf16> -> vector<8x256xbf16>
    %cst_124 = arith.constant dense<0.000000e+00> : vector<8x512xf32>
    %364 = tpu.matmul %363, %11, %cst_124 {dimension_numbers = #tpu.dot_dimension_numbers<[1], [0], [0], [1], [0, 0, 1, 1], [], []>} : vector<8x256xbf16>, vector<256x512xbf16>, vector<8x512xf32> -> vector<8x512xf32>
    %365 = arith.addf %364, %14 : vector<8x512xf32>
    %366 = vector.extract_strided_slice %365 {offsets = [0, 0], sizes = [8, 128], strides = [1, 1]} : vector<8x512xf32> to vector<8x128xf32>
    %cst_125 = arith.constant 5.000000e-01 : f32
    %367 = vector.broadcast %cst_125 : f32 to vector<8x128xf32>
    %368 = arith.mulf %367, %366 : vector<8x128xf32>
    %369 = math.tanh %368 : vector<8x128xf32>
    %cst_126 = arith.constant 5.000000e-01 : f32
    %370 = vector.broadcast %cst_126 : f32 to vector<8x128xf32>
    %371 = arith.mulf %370, %369 : vector<8x128xf32>
    %cst_127 = arith.constant 5.000000e-01 : f32
    %372 = vector.broadcast %cst_127 : f32 to vector<8x128xf32>
    %373 = arith.addf %371, %372 : vector<8x128xf32>
    %374 = vector.extract_strided_slice %365 {offsets = [0, 128], sizes = [8, 128], strides = [1, 1]} : vector<8x512xf32> to vector<8x128xf32>
    %cst_128 = arith.constant 5.000000e-01 : f32
    %375 = vector.broadcast %cst_128 : f32 to vector<8x128xf32>
    %376 = arith.mulf %375, %374 : vector<8x128xf32>
    %377 = math.tanh %376 : vector<8x128xf32>
    %cst_129 = arith.constant 5.000000e-01 : f32
    %378 = vector.broadcast %cst_129 : f32 to vector<8x128xf32>
    %379 = arith.mulf %378, %377 : vector<8x128xf32>
    %cst_130 = arith.constant 5.000000e-01 : f32
    %380 = vector.broadcast %cst_130 : f32 to vector<8x128xf32>
    %381 = arith.addf %379, %380 : vector<8x128xf32>
    %382 = vector.extract_strided_slice %365 {offsets = [0, 256], sizes = [8, 128], strides = [1, 1]} : vector<8x512xf32> to vector<8x128xf32>
    %383 = math.tanh %382 : vector<8x128xf32>
    %384 = vector.extract_strided_slice %365 {offsets = [0, 384], sizes = [8, 128], strides = [1, 1]} : vector<8x512xf32> to vector<8x128xf32>
    %cst_131 = arith.constant 5.000000e-01 : f32
    %385 = vector.broadcast %cst_131 : f32 to vector<8x128xf32>
    %386 = arith.mulf %385, %384 : vector<8x128xf32>
    %387 = math.tanh %386 : vector<8x128xf32>
    %cst_132 = arith.constant 5.000000e-01 : f32
    %388 = vector.broadcast %cst_132 : f32 to vector<8x128xf32>
    %389 = arith.mulf %388, %387 : vector<8x128xf32>
    %cst_133 = arith.constant 5.000000e-01 : f32
    %390 = vector.broadcast %cst_133 : f32 to vector<8x128xf32>
    %391 = arith.addf %389, %390 : vector<8x128xf32>
    %392 = arith.mulf %381, %317 : vector<8x128xf32>
    %393 = arith.mulf %373, %383 : vector<8x128xf32>
    %394 = arith.addf %392, %393 : vector<8x128xf32>
    %395 = math.tanh %394 : vector<8x128xf32>
    %396 = arith.mulf %391, %395 : vector<8x128xf32>
    %397 = arith.index_cast %c4_i32 : i32 to index
    %c0_134 = arith.constant 0 : index
    %c0_135 = arith.constant 0 : index
    %398 = vector.load %arg11[%397, %c0_134, %c0_135] : memref<8x8x128xf32, #tpu.memory_space<vmem>>, vector<1x8x128xf32>
    %399 = vector.shape_cast %398 : vector<1x8x128xf32> to vector<8x128xf32>
    %400 = vector.shape_cast %396 : vector<8x128xf32> to vector<1x8x128xf32>
    tpu.vector_store %arg11[%397, %c0_134, %c0_135], %400 {strides = array<i32>} : memref<8x8x128xf32, #tpu.memory_space<vmem>>, vector<1x8x128xf32>,
    %c5_i32 = arith.constant 5 : i32
    %401 = arith.index_cast %c5_i32 : i32 to index
    %c0_136 = arith.constant 0 : index
    %c0_137 = arith.constant 0 : index
    %402 = vector.load %arg10[%401, %c0_136, %c0_137] : memref<8x8x512xf32, #tpu.memory_space<vmem>>, vector<1x8x512xf32>
    %403 = vector.shape_cast %402 : vector<1x8x512xf32> to vector<8x512xf32>
    %404 = arith.truncf %360 : vector<8x128xf32> to vector<8x128xbf16>
    %cst_138 = arith.constant dense<0.000000e+00> : vector<8x512xf32>
    %405 = tpu.matmul %404, %10, %cst_138 {dimension_numbers = #tpu.dot_dimension_numbers<[1], [0], [0], [1], [0, 0, 1, 1], [], []>} : vector<8x128xbf16>, vector<128x512xbf16>, vector<8x512xf32> -> vector<8x512xf32>
    %406 = arith.addf %403, %405 : vector<8x512xf32>
    %407 = vector.extract_strided_slice %406 {offsets = [0, 0], sizes = [8, 128], strides = [1, 1]} : vector<8x512xf32> to vector<8x128xf32>
    %cst_139 = arith.constant 5.000000e-01 : f32
    %408 = vector.broadcast %cst_139 : f32 to vector<8x128xf32>
    %409 = arith.mulf %408, %407 : vector<8x128xf32>
    %410 = math.tanh %409 : vector<8x128xf32>
    %cst_140 = arith.constant 5.000000e-01 : f32
    %411 = vector.broadcast %cst_140 : f32 to vector<8x128xf32>
    %412 = arith.mulf %411, %410 : vector<8x128xf32>
    %cst_141 = arith.constant 5.000000e-01 : f32
    %413 = vector.broadcast %cst_141 : f32 to vector<8x128xf32>
    %414 = arith.addf %412, %413 : vector<8x128xf32>
    %415 = vector.extract_strided_slice %406 {offsets = [0, 128], sizes = [8, 128], strides = [1, 1]} : vector<8x512xf32> to vector<8x128xf32>
    %cst_142 = arith.constant 5.000000e-01 : f32
    %416 = vector.broadcast %cst_142 : f32 to vector<8x128xf32>
    %417 = arith.mulf %416, %415 : vector<8x128xf32>
    %418 = math.tanh %417 : vector<8x128xf32>
    %cst_143 = arith.constant 5.000000e-01 : f32
    %419 = vector.broadcast %cst_143 : f32 to vector<8x128xf32>
    %420 = arith.mulf %419, %418 : vector<8x128xf32>
    %cst_144 = arith.constant 5.000000e-01 : f32
    %421 = vector.broadcast %cst_144 : f32 to vector<8x128xf32>
    %422 = arith.addf %420, %421 : vector<8x128xf32>
    %423 = vector.extract_strided_slice %406 {offsets = [0, 256], sizes = [8, 128], strides = [1, 1]} : vector<8x512xf32> to vector<8x128xf32>
    %424 = math.tanh %423 : vector<8x128xf32>
    %425 = vector.extract_strided_slice %406 {offsets = [0, 384], sizes = [8, 128], strides = [1, 1]} : vector<8x512xf32> to vector<8x128xf32>
    %cst_145 = arith.constant 5.000000e-01 : f32
    %426 = vector.broadcast %cst_145 : f32 to vector<8x128xf32>
    %427 = arith.mulf %426, %425 : vector<8x128xf32>
    %428 = math.tanh %427 : vector<8x128xf32>
    %cst_146 = arith.constant 5.000000e-01 : f32
    %429 = vector.broadcast %cst_146 : f32 to vector<8x128xf32>
    %430 = arith.mulf %429, %428 : vector<8x128xf32>
    %cst_147 = arith.constant 5.000000e-01 : f32
    %431 = vector.broadcast %cst_147 : f32 to vector<8x128xf32>
    %432 = arith.addf %430, %431 : vector<8x128xf32>
    %433 = arith.mulf %422, %358 : vector<8x128xf32>
    %434 = arith.mulf %414, %424 : vector<8x128xf32>
    %435 = arith.addf %433, %434 : vector<8x128xf32>
    %436 = math.tanh %435 : vector<8x128xf32>
    %437 = arith.mulf %432, %436 : vector<8x128xf32>
    %438 = arith.truncf %437 : vector<8x128xf32> to vector<8x128xbf16>
    %439 = arith.truncf %396 : vector<8x128xf32> to vector<8x128xbf16>
    %440 = tpu.concatenate %438, %439 in 1 : vector<8x128xbf16>, vector<8x128xbf16> -> vector<8x256xbf16>
    %cst_148 = arith.constant dense<0.000000e+00> : vector<8x512xf32>
    %441 = tpu.matmul %440, %11, %cst_148 {dimension_numbers = #tpu.dot_dimension_numbers<[1], [0], [0], [1], [0, 0, 1, 1], [], []>} : vector<8x256xbf16>, vector<256x512xbf16>, vector<8x512xf32> -> vector<8x512xf32>
    %442 = arith.addf %441, %14 : vector<8x512xf32>
    %443 = vector.extract_strided_slice %442 {offsets = [0, 0], sizes = [8, 128], strides = [1, 1]} : vector<8x512xf32> to vector<8x128xf32>
    %cst_149 = arith.constant 5.000000e-01 : f32
    %444 = vector.broadcast %cst_149 : f32 to vector<8x128xf32>
    %445 = arith.mulf %444, %443 : vector<8x128xf32>
    %446 = math.tanh %445 : vector<8x128xf32>
    %cst_150 = arith.constant 5.000000e-01 : f32
    %447 = vector.broadcast %cst_150 : f32 to vector<8x128xf32>
    %448 = arith.mulf %447, %446 : vector<8x128xf32>
    %cst_151 = arith.constant 5.000000e-01 : f32
    %449 = vector.broadcast %cst_151 : f32 to vector<8x128xf32>
    %450 = arith.addf %448, %449 : vector<8x128xf32>
    %451 = vector.extract_strided_slice %442 {offsets = [0, 128], sizes = [8, 128], strides = [1, 1]} : vector<8x512xf32> to vector<8x128xf32>
    %cst_152 = arith.constant 5.000000e-01 : f32
    %452 = vector.broadcast %cst_152 : f32 to vector<8x128xf32>
    %453 = arith.mulf %452, %451 : vector<8x128xf32>
    %454 = math.tanh %453 : vector<8x128xf32>
    %cst_153 = arith.constant 5.000000e-01 : f32
    %455 = vector.broadcast %cst_153 : f32 to vector<8x128xf32>
    %456 = arith.mulf %455, %454 : vector<8x128xf32>
    %cst_154 = arith.constant 5.000000e-01 : f32
    %457 = vector.broadcast %cst_154 : f32 to vector<8x128xf32>
    %458 = arith.addf %456, %457 : vector<8x128xf32>
    %459 = vector.extract_strided_slice %442 {offsets = [0, 256], sizes = [8, 128], strides = [1, 1]} : vector<8x512xf32> to vector<8x128xf32>
    %460 = math.tanh %459 : vector<8x128xf32>
    %461 = vector.extract_strided_slice %442 {offsets = [0, 384], sizes = [8, 128], strides = [1, 1]} : vector<8x512xf32> to vector<8x128xf32>
    %cst_155 = arith.constant 5.000000e-01 : f32
    %462 = vector.broadcast %cst_155 : f32 to vector<8x128xf32>
    %463 = arith.mulf %462, %461 : vector<8x128xf32>
    %464 = math.tanh %463 : vector<8x128xf32>
    %cst_156 = arith.constant 5.000000e-01 : f32
    %465 = vector.broadcast %cst_156 : f32 to vector<8x128xf32>
    %466 = arith.mulf %465, %464 : vector<8x128xf32>
    %cst_157 = arith.constant 5.000000e-01 : f32
    %467 = vector.broadcast %cst_157 : f32 to vector<8x128xf32>
    %468 = arith.addf %466, %467 : vector<8x128xf32>
    %469 = arith.mulf %458, %394 : vector<8x128xf32>
    %470 = arith.mulf %450, %460 : vector<8x128xf32>
    %471 = arith.addf %469, %470 : vector<8x128xf32>
    %472 = math.tanh %471 : vector<8x128xf32>
    %473 = arith.mulf %468, %472 : vector<8x128xf32>
    %474 = arith.index_cast %c5_i32 : i32 to index
    %c0_158 = arith.constant 0 : index
    %c0_159 = arith.constant 0 : index
    %475 = vector.load %arg11[%474, %c0_158, %c0_159] : memref<8x8x128xf32, #tpu.memory_space<vmem>>, vector<1x8x128xf32>
    %476 = vector.shape_cast %475 : vector<1x8x128xf32> to vector<8x128xf32>
    %477 = vector.shape_cast %473 : vector<8x128xf32> to vector<1x8x128xf32>
    tpu.vector_store %arg11[%474, %c0_158, %c0_159], %477 {strides = array<i32>} : memref<8x8x128xf32, #tpu.memory_space<vmem>>, vector<1x8x128xf32>,
    %c6_i32 = arith.constant 6 : i32
    %478 = arith.index_cast %c6_i32 : i32 to index
    %c0_160 = arith.constant 0 : index
    %c0_161 = arith.constant 0 : index
    %479 = vector.load %arg10[%478, %c0_160, %c0_161] : memref<8x8x512xf32, #tpu.memory_space<vmem>>, vector<1x8x512xf32>
    %480 = vector.shape_cast %479 : vector<1x8x512xf32> to vector<8x512xf32>
    %481 = arith.truncf %437 : vector<8x128xf32> to vector<8x128xbf16>
    %cst_162 = arith.constant dense<0.000000e+00> : vector<8x512xf32>
    %482 = tpu.matmul %481, %10, %cst_162 {dimension_numbers = #tpu.dot_dimension_numbers<[1], [0], [0], [1], [0, 0, 1, 1], [], []>} : vector<8x128xbf16>, vector<128x512xbf16>, vector<8x512xf32> -> vector<8x512xf32>
    %483 = arith.addf %480, %482 : vector<8x512xf32>
    %484 = vector.extract_strided_slice %483 {offsets = [0, 0], sizes = [8, 128], strides = [1, 1]} : vector<8x512xf32> to vector<8x128xf32>
    %cst_163 = arith.constant 5.000000e-01 : f32
    %485 = vector.broadcast %cst_163 : f32 to vector<8x128xf32>
    %486 = arith.mulf %485, %484 : vector<8x128xf32>
    %487 = math.tanh %486 : vector<8x128xf32>
    %cst_164 = arith.constant 5.000000e-01 : f32
    %488 = vector.broadcast %cst_164 : f32 to vector<8x128xf32>
    %489 = arith.mulf %488, %487 : vector<8x128xf32>
    %cst_165 = arith.constant 5.000000e-01 : f32
    %490 = vector.broadcast %cst_165 : f32 to vector<8x128xf32>
    %491 = arith.addf %489, %490 : vector<8x128xf32>
    %492 = vector.extract_strided_slice %483 {offsets = [0, 128], sizes = [8, 128], strides = [1, 1]} : vector<8x512xf32> to vector<8x128xf32>
    %cst_166 = arith.constant 5.000000e-01 : f32
    %493 = vector.broadcast %cst_166 : f32 to vector<8x128xf32>
    %494 = arith.mulf %493, %492 : vector<8x128xf32>
    %495 = math.tanh %494 : vector<8x128xf32>
    %cst_167 = arith.constant 5.000000e-01 : f32
    %496 = vector.broadcast %cst_167 : f32 to vector<8x128xf32>
    %497 = arith.mulf %496, %495 : vector<8x128xf32>
    %cst_168 = arith.constant 5.000000e-01 : f32
    %498 = vector.broadcast %cst_168 : f32 to vector<8x128xf32>
    %499 = arith.addf %497, %498 : vector<8x128xf32>
    %500 = vector.extract_strided_slice %483 {offsets = [0, 256], sizes = [8, 128], strides = [1, 1]} : vector<8x512xf32> to vector<8x128xf32>
    %501 = math.tanh %500 : vector<8x128xf32>
    %502 = vector.extract_strided_slice %483 {offsets = [0, 384], sizes = [8, 128], strides = [1, 1]} : vector<8x512xf32> to vector<8x128xf32>
    %cst_169 = arith.constant 5.000000e-01 : f32
    %503 = vector.broadcast %cst_169 : f32 to vector<8x128xf32>
    %504 = arith.mulf %503, %502 : vector<8x128xf32>
    %505 = math.tanh %504 : vector<8x128xf32>
    %cst_170 = arith.constant 5.000000e-01 : f32
    %506 = vector.broadcast %cst_170 : f32 to vector<8x128xf32>
    %507 = arith.mulf %506, %505 : vector<8x128xf32>
    %cst_171 = arith.constant 5.000000e-01 : f32
    %508 = vector.broadcast %cst_171 : f32 to vector<8x128xf32>
    %509 = arith.addf %507, %508 : vector<8x128xf32>
    %510 = arith.mulf %499, %435 : vector<8x128xf32>
    %511 = arith.mulf %491, %501 : vector<8x128xf32>
    %512 = arith.addf %510, %511 : vector<8x128xf32>
    %513 = math.tanh %512 : vector<8x128xf32>
    %514 = arith.mulf %509, %513 : vector<8x128xf32>
    %515 = arith.truncf %514 : vector<8x128xf32> to vector<8x128xbf16>
    %516 = arith.truncf %473 : vector<8x128xf32> to vector<8x128xbf16>
    %517 = tpu.concatenate %515, %516 in 1 : vector<8x128xbf16>, vector<8x128xbf16> -> vector<8x256xbf16>
    %cst_172 = arith.constant dense<0.000000e+00> : vector<8x512xf32>
    %518 = tpu.matmul %517, %11, %cst_172 {dimension_numbers = #tpu.dot_dimension_numbers<[1], [0], [0], [1], [0, 0, 1, 1], [], []>} : vector<8x256xbf16>, vector<256x512xbf16>, vector<8x512xf32> -> vector<8x512xf32>
    %519 = arith.addf %518, %14 : vector<8x512xf32>
    %520 = vector.extract_strided_slice %519 {offsets = [0, 0], sizes = [8, 128], strides = [1, 1]} : vector<8x512xf32> to vector<8x128xf32>
    %cst_173 = arith.constant 5.000000e-01 : f32
    %521 = vector.broadcast %cst_173 : f32 to vector<8x128xf32>
    %522 = arith.mulf %521, %520 : vector<8x128xf32>
    %523 = math.tanh %522 : vector<8x128xf32>
    %cst_174 = arith.constant 5.000000e-01 : f32
    %524 = vector.broadcast %cst_174 : f32 to vector<8x128xf32>
    %525 = arith.mulf %524, %523 : vector<8x128xf32>
    %cst_175 = arith.constant 5.000000e-01 : f32
    %526 = vector.broadcast %cst_175 : f32 to vector<8x128xf32>
    %527 = arith.addf %525, %526 : vector<8x128xf32>
    %528 = vector.extract_strided_slice %519 {offsets = [0, 128], sizes = [8, 128], strides = [1, 1]} : vector<8x512xf32> to vector<8x128xf32>
    %cst_176 = arith.constant 5.000000e-01 : f32
    %529 = vector.broadcast %cst_176 : f32 to vector<8x128xf32>
    %530 = arith.mulf %529, %528 : vector<8x128xf32>
    %531 = math.tanh %530 : vector<8x128xf32>
    %cst_177 = arith.constant 5.000000e-01 : f32
    %532 = vector.broadcast %cst_177 : f32 to vector<8x128xf32>
    %533 = arith.mulf %532, %531 : vector<8x128xf32>
    %cst_178 = arith.constant 5.000000e-01 : f32
    %534 = vector.broadcast %cst_178 : f32 to vector<8x128xf32>
    %535 = arith.addf %533, %534 : vector<8x128xf32>
    %536 = vector.extract_strided_slice %519 {offsets = [0, 256], sizes = [8, 128], strides = [1, 1]} : vector<8x512xf32> to vector<8x128xf32>
    %537 = math.tanh %536 : vector<8x128xf32>
    %538 = vector.extract_strided_slice %519 {offsets = [0, 384], sizes = [8, 128], strides = [1, 1]} : vector<8x512xf32> to vector<8x128xf32>
    %cst_179 = arith.constant 5.000000e-01 : f32
    %539 = vector.broadcast %cst_179 : f32 to vector<8x128xf32>
    %540 = arith.mulf %539, %538 : vector<8x128xf32>
    %541 = math.tanh %540 : vector<8x128xf32>
    %cst_180 = arith.constant 5.000000e-01 : f32
    %542 = vector.broadcast %cst_180 : f32 to vector<8x128xf32>
    %543 = arith.mulf %542, %541 : vector<8x128xf32>
    %cst_181 = arith.constant 5.000000e-01 : f32
    %544 = vector.broadcast %cst_181 : f32 to vector<8x128xf32>
    %545 = arith.addf %543, %544 : vector<8x128xf32>
    %546 = arith.mulf %535, %471 : vector<8x128xf32>
    %547 = arith.mulf %527, %537 : vector<8x128xf32>
    %548 = arith.addf %546, %547 : vector<8x128xf32>
    %549 = math.tanh %548 : vector<8x128xf32>
    %550 = arith.mulf %545, %549 : vector<8x128xf32>
    %551 = arith.index_cast %c6_i32 : i32 to index
    %c0_182 = arith.constant 0 : index
    %c0_183 = arith.constant 0 : index
    %552 = vector.load %arg11[%551, %c0_182, %c0_183] : memref<8x8x128xf32, #tpu.memory_space<vmem>>, vector<1x8x128xf32>
    %553 = vector.shape_cast %552 : vector<1x8x128xf32> to vector<8x128xf32>
    %554 = vector.shape_cast %550 : vector<8x128xf32> to vector<1x8x128xf32>
    tpu.vector_store %arg11[%551, %c0_182, %c0_183], %554 {strides = array<i32>} : memref<8x8x128xf32, #tpu.memory_space<vmem>>, vector<1x8x128xf32>,
    %c7_i32 = arith.constant 7 : i32
    %555 = arith.index_cast %c7_i32 : i32 to index
    %c0_184 = arith.constant 0 : index
    %c0_185 = arith.constant 0 : index
    %556 = vector.load %arg10[%555, %c0_184, %c0_185] : memref<8x8x512xf32, #tpu.memory_space<vmem>>, vector<1x8x512xf32>
    %557 = vector.shape_cast %556 : vector<1x8x512xf32> to vector<8x512xf32>
    %558 = arith.truncf %514 : vector<8x128xf32> to vector<8x128xbf16>
    %cst_186 = arith.constant dense<0.000000e+00> : vector<8x512xf32>
    %559 = tpu.matmul %558, %10, %cst_186 {dimension_numbers = #tpu.dot_dimension_numbers<[1], [0], [0], [1], [0, 0, 1, 1], [], []>} : vector<8x128xbf16>, vector<128x512xbf16>, vector<8x512xf32> -> vector<8x512xf32>
    %560 = arith.addf %557, %559 : vector<8x512xf32>
    %561 = vector.extract_strided_slice %560 {offsets = [0, 0], sizes = [8, 128], strides = [1, 1]} : vector<8x512xf32> to vector<8x128xf32>
    %cst_187 = arith.constant 5.000000e-01 : f32
    %562 = vector.broadcast %cst_187 : f32 to vector<8x128xf32>
    %563 = arith.mulf %562, %561 : vector<8x128xf32>
    %564 = math.tanh %563 : vector<8x128xf32>
    %cst_188 = arith.constant 5.000000e-01 : f32
    %565 = vector.broadcast %cst_188 : f32 to vector<8x128xf32>
    %566 = arith.mulf %565, %564 : vector<8x128xf32>
    %cst_189 = arith.constant 5.000000e-01 : f32
    %567 = vector.broadcast %cst_189 : f32 to vector<8x128xf32>
    %568 = arith.addf %566, %567 : vector<8x128xf32>
    %569 = vector.extract_strided_slice %560 {offsets = [0, 128], sizes = [8, 128], strides = [1, 1]} : vector<8x512xf32> to vector<8x128xf32>
    %cst_190 = arith.constant 5.000000e-01 : f32
    %570 = vector.broadcast %cst_190 : f32 to vector<8x128xf32>
    %571 = arith.mulf %570, %569 : vector<8x128xf32>
    %572 = math.tanh %571 : vector<8x128xf32>
    %cst_191 = arith.constant 5.000000e-01 : f32
    %573 = vector.broadcast %cst_191 : f32 to vector<8x128xf32>
    %574 = arith.mulf %573, %572 : vector<8x128xf32>
    %cst_192 = arith.constant 5.000000e-01 : f32
    %575 = vector.broadcast %cst_192 : f32 to vector<8x128xf32>
    %576 = arith.addf %574, %575 : vector<8x128xf32>
    %577 = vector.extract_strided_slice %560 {offsets = [0, 256], sizes = [8, 128], strides = [1, 1]} : vector<8x512xf32> to vector<8x128xf32>
    %578 = math.tanh %577 : vector<8x128xf32>
    %579 = vector.extract_strided_slice %560 {offsets = [0, 384], sizes = [8, 128], strides = [1, 1]} : vector<8x512xf32> to vector<8x128xf32>
    %cst_193 = arith.constant 5.000000e-01 : f32
    %580 = vector.broadcast %cst_193 : f32 to vector<8x128xf32>
    %581 = arith.mulf %580, %579 : vector<8x128xf32>
    %582 = math.tanh %581 : vector<8x128xf32>
    %cst_194 = arith.constant 5.000000e-01 : f32
    %583 = vector.broadcast %cst_194 : f32 to vector<8x128xf32>
    %584 = arith.mulf %583, %582 : vector<8x128xf32>
    %cst_195 = arith.constant 5.000000e-01 : f32
    %585 = vector.broadcast %cst_195 : f32 to vector<8x128xf32>
    %586 = arith.addf %584, %585 : vector<8x128xf32>
    %587 = arith.mulf %576, %512 : vector<8x128xf32>
    %588 = arith.mulf %568, %578 : vector<8x128xf32>
    %589 = arith.addf %587, %588 : vector<8x128xf32>
    %590 = math.tanh %589 : vector<8x128xf32>
    %591 = arith.mulf %586, %590 : vector<8x128xf32>
    %592 = arith.truncf %591 : vector<8x128xf32> to vector<8x128xbf16>
    %593 = arith.truncf %550 : vector<8x128xf32> to vector<8x128xbf16>
    %594 = tpu.concatenate %592, %593 in 1 : vector<8x128xbf16>, vector<8x128xbf16> -> vector<8x256xbf16>
    %cst_196 = arith.constant dense<0.000000e+00> : vector<8x512xf32>
    %595 = tpu.matmul %594, %11, %cst_196 {dimension_numbers = #tpu.dot_dimension_numbers<[1], [0], [0], [1], [0, 0, 1, 1], [], []>} : vector<8x256xbf16>, vector<256x512xbf16>, vector<8x512xf32> -> vector<8x512xf32>
    %596 = arith.addf %595, %14 : vector<8x512xf32>
    %597 = vector.extract_strided_slice %596 {offsets = [0, 0], sizes = [8, 128], strides = [1, 1]} : vector<8x512xf32> to vector<8x128xf32>
    %cst_197 = arith.constant 5.000000e-01 : f32
    %598 = vector.broadcast %cst_197 : f32 to vector<8x128xf32>
    %599 = arith.mulf %598, %597 : vector<8x128xf32>
    %600 = math.tanh %599 : vector<8x128xf32>
    %cst_198 = arith.constant 5.000000e-01 : f32
    %601 = vector.broadcast %cst_198 : f32 to vector<8x128xf32>
    %602 = arith.mulf %601, %600 : vector<8x128xf32>
    %cst_199 = arith.constant 5.000000e-01 : f32
    %603 = vector.broadcast %cst_199 : f32 to vector<8x128xf32>
    %604 = arith.addf %602, %603 : vector<8x128xf32>
    %605 = vector.extract_strided_slice %596 {offsets = [0, 128], sizes = [8, 128], strides = [1, 1]} : vector<8x512xf32> to vector<8x128xf32>
    %cst_200 = arith.constant 5.000000e-01 : f32
    %606 = vector.broadcast %cst_200 : f32 to vector<8x128xf32>
    %607 = arith.mulf %606, %605 : vector<8x128xf32>
    %608 = math.tanh %607 : vector<8x128xf32>
    %cst_201 = arith.constant 5.000000e-01 : f32
    %609 = vector.broadcast %cst_201 : f32 to vector<8x128xf32>
    %610 = arith.mulf %609, %608 : vector<8x128xf32>
    %cst_202 = arith.constant 5.000000e-01 : f32
    %611 = vector.broadcast %cst_202 : f32 to vector<8x128xf32>
    %612 = arith.addf %610, %611 : vector<8x128xf32>
    %613 = vector.extract_strided_slice %596 {offsets = [0, 256], sizes = [8, 128], strides = [1, 1]} : vector<8x512xf32> to vector<8x128xf32>
    %614 = math.tanh %613 : vector<8x128xf32>
    %615 = vector.extract_strided_slice %596 {offsets = [0, 384], sizes = [8, 128], strides = [1, 1]} : vector<8x512xf32> to vector<8x128xf32>
    %cst_203 = arith.constant 5.000000e-01 : f32
    %616 = vector.broadcast %cst_203 : f32 to vector<8x128xf32>
    %617 = arith.mulf %616, %615 : vector<8x128xf32>
    %618 = math.tanh %617 : vector<8x128xf32>
    %cst_204 = arith.constant 5.000000e-01 : f32
    %619 = vector.broadcast %cst_204 : f32 to vector<8x128xf32>
    %620 = arith.mulf %619, %618 : vector<8x128xf32>
    %cst_205 = arith.constant 5.000000e-01 : f32
    %621 = vector.broadcast %cst_205 : f32 to vector<8x128xf32>
    %622 = arith.addf %620, %621 : vector<8x128xf32>
    %623 = arith.mulf %612, %548 : vector<8x128xf32>
    %624 = arith.mulf %604, %614 : vector<8x128xf32>
    %625 = arith.addf %623, %624 : vector<8x128xf32>
    %626 = math.tanh %625 : vector<8x128xf32>
    %627 = arith.mulf %622, %626 : vector<8x128xf32>
    %628 = arith.index_cast %c7_i32 : i32 to index
    %c0_206 = arith.constant 0 : index
    %c0_207 = arith.constant 0 : index
    %629 = vector.load %arg11[%628, %c0_206, %c0_207] : memref<8x8x128xf32, #tpu.memory_space<vmem>>, vector<1x8x128xf32>
    %630 = vector.shape_cast %629 : vector<1x8x128xf32> to vector<8x128xf32>
    %631 = vector.shape_cast %627 : vector<8x128xf32> to vector<1x8x128xf32>
    tpu.vector_store %arg11[%628, %c0_206, %c0_207], %631 {strides = array<i32>} : memref<8x8x128xf32, #tpu.memory_space<vmem>>, vector<1x8x128xf32>,
    %c8_i32 = arith.constant 8 : i32
    %632 = tpu.iota {dimensions = array<i32: 0>} : vector<8x8x1xi32>
    %c0_208 = arith.constant 0 : index
    %c0_209 = arith.constant 0 : index
    %633 = vector.load %arg1[%c0_208, %c0_209] : memref<8x1xi32, #tpu.memory_space<vmem>>, vector<8x1xi32>
    %634 = vector.shape_cast %633 : vector<8x1xi32> to vector<1x8x1xi32>
    %635 = vector.broadcast %634 : vector<1x8x1xi32> to vector<8x8x1xi32>
    %636 = arith.cmpi slt, %632, %635 : vector<8x8x1xi32>
    %c0_210 = arith.constant 0 : index
    %c0_211 = arith.constant 0 : index
    %c0_212 = arith.constant 0 : index
    %637 = vector.load %arg11[%c0_210, %c0_211, %c0_212] : memref<8x8x128xf32, #tpu.memory_space<vmem>>, vector<8x8x128xf32>
    %cst_213 = arith.constant 0.000000e+00 : f32
    %638 = vector.shape_cast %636 : vector<8x8x1xi1> to vector<8x8x1xi1>
    %639 = vector.broadcast %638 : vector<8x8x1xi1> to vector<8x8x128xi1>
    %640 = vector.broadcast %cst_213 : f32 to vector<8x8x128xf32>
    %641 = arith.select %639, %637, %640 : vector<8x8x128xi1>, vector<8x8x128xf32>
    %642 = vector.shape_cast %641 : vector<8x8x128xf32> to vector<64x128xf32>
    %643 = arith.truncf %642 : vector<64x128xf32> to vector<64x128xbf16>
    %c0_214 = arith.constant 0 : index
    %c0_215 = arith.constant 0 : index
    %644 = vector.load %arg7[%c0_214, %c0_215] : memref<128x128xbf16, #tpu.memory_space<vmem>>, vector<128x128xbf16>
    %cst_216 = arith.constant dense<0.000000e+00> : vector<64x128xf32>
    %645 = tpu.matmul %643, %644, %cst_216 {dimension_numbers = #tpu.dot_dimension_numbers<[1], [0], [0], [1], [0, 0, 1, 1], [], []>} : vector<64x128xbf16>, vector<128x128xbf16>, vector<64x128xf32> -> vector<64x128xf32>
    %c0_217 = arith.constant 0 : index
    %c0_218 = arith.constant 0 : index
    %646 = vector.load %arg8[%c0_217, %c0_218] : memref<1x128xf32, #tpu.memory_space<vmem>>, vector<1x128xf32>
    %647 = vector.broadcast %646 : vector<1x128xf32> to vector<64x128xf32>
    %648 = arith.addf %645, %647 : vector<64x128xf32>
    %c0_219 = arith.constant 0 : index
    %c0_220 = arith.constant 0 : index
    %649 = vector.load %arg9[%c0_219, %c0_220] : memref<64x128xf32, #tpu.memory_space<vmem>>, vector<64x128xf32>
    tpu.vector_store %arg9[%c0_219, %c0_220], %648 {strides = array<i32>} : memref<64x128xf32, #tpu.memory_space<vmem>>, vector<64x128xf32>,
    return
  }
}

</mosaic_0001>

<bundles_post_ra>
// kernel: tpu_custom_call.1
= control target key start
LH: loop header
LB: loop body
LE: loop exit
PB: predicated region body
PF: predicated region fallthrough
CT: control target
= control target key end

     0   :  { %14 = vsyncpa [#allocation5], 0  ;;  %s5703_s0 = inlined_call_operand.hbm [shape: f32[8,8,128], index: 0, kind: input, shape index: {}]   ;;  %s5704_s1 = inlined_call_operand.vmem [shape: s32[8,1], index: 1, kind: input, shape index: {}]   ;;  %s5705_s2 = inlined_call_operand.hbm [shape: bf16[128,512], index: 2, kind: input, shape index: {}]   ;;  %s5706_s3 = inlined_call_operand.hbm [shape: bf16[128,512], index: 3, kind: input, shape index: {}]   ;;  %s5707_s4 = inlined_call_operand.vmem [shape: f32[1,512], index: 4, kind: input, shape index: {}]   ;;  %s5708_s5 = inlined_call_operand.hbm [shape: bf16[256,512], index: 5, kind: input, shape index: {}]   ;;  %s5709_s6 = inlined_call_operand.vmem [shape: f32[1,512], index: 6, kind: input, shape index: {}]   ;;  %s5710_s7 = inlined_call_operand.hbm [shape: bf16[128,128], index: 7, kind: input, shape index: {}]   ;;  %s5711_s8 = inlined_call_operand.vmem [shape: f32[1,128], index: 8, kind: input, shape index: {}]   ;;  %s5712_s9 = inlined_call_operand.hbm [shape: f32[64,128], index: 9, kind: output, shape index: {}]  }
   0x1   :  { %15 = vsyncpa [#allocation8], 0 }
   0x2   :  { %16 = vsyncpa [#allocation11], 0 }
   0x3   :  { %17 = vsyncpa [#allocation6], 0  ;;  %s3936_s30 = smov [#allocation7]   ;;  %s3796_s13 = scalar_lea.hbm %s5705_s2, 4096 }
   0x4   :  { %s37_s10 = sshll.u32 %s3936_s30, 4  ;;  %p3797_p0 = scmp.ne.s32.totalorder %s5705_s2, %s3796_s13  ;;  %s38_s10 = int_to_ptr.vmem [resolvable:$true] %s37_s10 }
   0x5   :  { %p3800_p1 = scmp.lt.u32.totalorder %s3796_s13, %s5705_s2 }
   0x7   :  { %p3802_p2 = pnand %p3800_p1, %p3797_p0 }
   0x9   :  { %3805 = shalt.err (!%p3802_p2)
}
   0xa   :  { %s3806_s18 = scalar_lea.vmem %s38_s10, 4096  ;;  %p3811_p4 = scmp.lt.s32.totalorder %s38_s10, %s38_s10 }
   0xb   :  { %p3807_p3 = scmp.ne.s32.totalorder %s38_s10, %s3806_s18  ;;  %p3812_p5 = scmp.lt.s32.totalorder %s3806_s18, %s3806_s18 }
   0xd   :  { %p3813_p6 = por %p3812_p5, %p3811_p4 }
   0xf   :  { %p3814_p7 = pnand %p3813_p6, %p3807_p3 }
  0x11   :  { %3817 = shalt.err (!%p3814_p7)
}
  0x12   :  { %s3937_s19 = smov 256   ;;  %s3938_s20 = smov 16  }
  0x13   :  { %43 = dma.hbm_to_vmem [thread:$0]  %s5705_s2, 4096, %s38_s10, [#allocation8], %s3937_s19, %s3937_s19, %s3938_s20  }
  0x14   :  { %s3939_s23 = smov [#allocation10]   ;;  %s3940_s25 = smov [#allocation4]  }
  0x15   :  { %s63_s24 = sshll.u32 %s3939_s23, 4  ;;  %s23_s26 = sshll.u32 %s3940_s25, 4  ;;  %s64_s24 = int_to_ptr.vmem [resolvable:$true] %s63_s24  ;;  %s24_s26 = int_to_ptr.vmem [resolvable:$true] %s23_s26 }
  0x16   :  { %s3818_s29 = scalar_lea.hbm %s5708_s5, 8192 }
  0x17   :  { %p3819_p8 = scmp.ne.s32.totalorder %s5708_s5, %s3818_s29  ;;  %p3822_p9 = scmp.lt.u32.totalorder %s3818_s29, %s5708_s5 }
  0x19   :  { %p3824_p10 = pnand %p3822_p9, %p3819_p8 }
  0x1b   :  { %3827 = shalt.err (!%p3824_p10)
}
  0x1c   :  { %s3828_s2 = scalar_lea.vmem %s64_s24, 8192  ;;  %p3833_p12 = scmp.lt.s32.totalorder %s64_s24, %s64_s24 }
  0x1d   :  { %p3829_p11 = scmp.ne.s32.totalorder %s64_s24, %s3828_s2  ;;  %p3834_p13 = scmp.lt.s32.totalorder %s3828_s2, %s3828_s2 }
  0x1f   :  { %p3835_p0 = por %p3834_p13, %p3833_p12 }
  0x21   :  { %p3836_p1 = pnand %p3835_p0, %p3829_p11 }
  0x23   :  { %3839 = shalt.err (!%p3836_p1)
}
  0x24   :  { %69 = dma.hbm_to_vmem [thread:$0]  %s5708_s5, 8192, %s64_s24, [#allocation11], %s3937_s19, %s3937_s19, %s3938_s20  }
  0x25   :  { %s3840_s17 = scalar_lea.hbm %s5703_s0, 1024 }
  0x26   :  { %p3841_p2 = scmp.ne.s32.totalorder %s5703_s0, %s3840_s17  ;;  %p3844_p3 = scmp.lt.u32.totalorder %s3840_s17, %s5703_s0 }
  0x28   :  { %p3846_p4 = pnand %p3844_p3, %p3841_p2 }
  0x2a   :  { %3849 = shalt.err (!%p3846_p4)
}
  0x2b   :  { %s3850_s25 = scalar_lea.vmem %s24_s26, 1024  ;;  %p3855_p6 = scmp.lt.s32.totalorder %s24_s26, %s24_s26 }
  0x2c   :  { %p3851_p5 = scmp.ne.s32.totalorder %s24_s26, %s3850_s25  ;;  %p3856_p7 = scmp.lt.s32.totalorder %s3850_s25, %s3850_s25 }
  0x2e   :  { %p3857_p8 = por %p3856_p7, %p3855_p6 }
  0x30   :  { %p3858_p9 = pnand %p3857_p8, %p3851_p5 }
  0x32   :  { %3861 = shalt.err (!%p3858_p9)
}
  0x33   :  { %s3941_s5 = smov 128   ;;  %s3942_s24 = smov 8  }
  0x34   :  { %29 = dma.hbm_to_vmem [thread:$0]  %s5703_s0, 1024, %s24_s26, [#allocation5], %s3941_s5, %s3941_s5, %s3942_s24  }
  0x35   :  { %s3943_s29 = smov [#allocation9]   ;;  %s3944_s11 = smov [#allocation12]  }
  0x36   :  { %s49_s30 = sshll.u32 %s3943_s29, 4  ;;  %s77_s12 = sshll.u32 %s3944_s11, 4  ;;  %s50_s30 = int_to_ptr.vmem [resolvable:$true] %s49_s30  ;;  %s78_s12 = int_to_ptr.vmem [resolvable:$true] %s77_s12 }
  0x37   :  { %s3862_s10 = scalar_lea.hbm %s5706_s3, 4096 }
  0x38   :  { %p3863_p10 = scmp.ne.s32.totalorder %s5706_s3, %s3862_s10  ;;  %p3866_p11 = scmp.lt.u32.totalorder %s3862_s10, %s5706_s3 }
  0x3a   :  { %p3868_p12 = pnand %p3866_p11, %p3863_p10 }
  0x3c   :  { %3871 = shalt.err (!%p3868_p12)
}
  0x3d   :  { %s3872_s0 = scalar_lea.vmem %s50_s30, 4096  ;;  %p3877_p0 = scmp.lt.s32.totalorder %s50_s30, %s50_s30 }
  0x3e   :  { %p3873_p13 = scmp.ne.s32.totalorder %s50_s30, %s3872_s0  ;;  %p3878_p1 = scmp.lt.s32.totalorder %s3872_s0, %s3872_s0 }
  0x40   :  { %p3879_p2 = por %p3878_p1, %p3877_p0 }
  0x42   :  { %p3880_p3 = pnand %p3879_p2, %p3873_p13 }
  0x44   :  { %3883 = shalt.err (!%p3880_p3)
}
  0x45   :  { %55 = dma.hbm_to_vmem [thread:$0]  %s5706_s3, 4096, %s50_s30, [#allocation8], %s3937_s19, %s3937_s19, %s3938_s20  }
  0x46   :  { %s3884_s23 = scalar_lea.hbm %s5710_s7, 1024 }
  0x47   :  { %p3885_p4 = scmp.ne.s32.totalorder %s5710_s7, %s3884_s23  ;;  %p3888_p5 = scmp.lt.u32.totalorder %s3884_s23, %s5710_s7 }
  0x49   :  { %p3890_p6 = pnand %p3888_p5, %p3885_p4 }
  0x4b   :  { %3893 = shalt.err (!%p3890_p6)
}
  0x4c   :  { %s3894_s11 = scalar_lea.vmem %s78_s12, 1024  ;;  %p3899_p8 = scmp.lt.s32.totalorder %s78_s12, %s78_s12 }
  0x4d   :  { %p3895_p7 = scmp.ne.s32.totalorder %s78_s12, %s3894_s11  ;;  %p3900_p9 = scmp.lt.s32.totalorder %s3894_s11, %s3894_s11 }
  0x4f   :  { %p3901_p10 = por %p3900_p9, %p3899_p8 }
  0x51   :  { %p3902_p11 = pnand %p3901_p10, %p3895_p7 }
  0x53   :  { %3905 = shalt.err (!%p3902_p11)
}
  0x54   :  { %s3945_s3 = smov 64   ;;  %s3946_s19 = smov 4  }
  0x55   :  { %83 = dma.hbm_to_vmem [thread:$0]  %s5710_s7, 1024, %s78_s12, [#allocation11], %s3945_s3, %s3945_s3, %s3946_s19  }
  0x56   :  { %3928 = dma.done.wait [#allocation5], 1024  }
  0x57   :  { %3929 = vsyncadd [#allocation5], 4294966272 }
  0x58   :  { %3930 = dma.done.wait [#allocation8], 8192  }
  0x59   :  { %3931 = vsyncadd [#allocation8], 4294959104 }
  0x5a   :  { %3932 = dma.done.wait [#allocation11], 9216  }
  0x5b   :  { %3933 = vsyncadd [#allocation11], 4294958080  ;;  %v5713_v0 = vmov 0   ;;  %v3237_v1 = vld [vmem:[#allocation7 + $0x4] ss:$16 sps:$4 sm:$0xff]   ;;  %v103_v33 = vld [vmem:[#allocation4 + $0x8] sm:$0xff] }
  0x5c   :  { %360 = vmatprep.mubr.bf16.mxu1 %v5713_v0  ;;  %820 = vmatprep.mubr.bf16.mxu0 %v5713_v0  ;;  %v3239_v2 = vld [vmem:[#allocation7] ss:$16 sps:$4 sm:$0xff]   ;;  %v4075_v3 = vld [vmem:[#allocation9 + $0x4] ss:$16 sps:$4 sm:$0xff]   ;;  %v3287_v34 = vld [vmem:[#allocation7 + $0xc] ss:$16 sps:$4 sm:$0xff]  }
  0x5d   :  { %3235 = vset.pattern.permute.xlu0 %v5713_v0  ;;  %3236 = vset.pattern.permute.xlu1 %v5713_v0  ;;  %v3242_v4 = vld [vmem:[#allocation9] ss:$16 sps:$4 sm:$0xff]   ;;  %v3243_v5 = vld [vmem:[#allocation7 + $0x24] ss:$16 sps:$4 sm:$0xff]   ;;  %v3285_v37 = vld [vmem:[#allocation7 + $0x8] ss:$16 sps:$4 sm:$0xff]  }
  0x5e   :  { %328 = vmatprep.subr.bf16.mxu1 %v3237_v1  ;;  %v3245_v6 = vld [vmem:[#allocation7 + $0x20] ss:$16 sps:$4 sm:$0xff]   ;;  %788 = vmatprep.subr.bf16.mxu0 %v4075_v3  ;;  %v3246_v7 = vld [vmem:[#allocation9 + $0x24] ss:$16 sps:$4 sm:$0xff]   ;;  %v3290_v38 = vld [vmem:[#allocation7 + $0x2c] ss:$16 sps:$4 sm:$0xff]  }
  0x5f   :  { %329 = vmatpush1.bf16.msra.mxu1 %v3239_v2  ;;  %789 = vmatpush1.bf16.msra.mxu0 %v3242_v4  ;;  %v3248_v8 = vld [vmem:[#allocation9 + $0x20] ss:$16 sps:$4 sm:$0xff]   ;;  %v3249_v9 = vld [vmem:[#allocation7 + $0x44] ss:$16 sps:$4 sm:$0xff]   ;;  %v3288_v39 = vld [vmem:[#allocation7 + $0x28] ss:$16 sps:$4 sm:$0xff]  }
  0x60   :  { %330 = vmatprep.subr.bf16.mxu1 %v3243_v5  ;;  %790 = vmatprep.subr.bf16.mxu0 %v3246_v7  ;;  %v3251_v10 = vld [vmem:[#allocation7 + $0x40] ss:$16 sps:$4 sm:$0xff]   ;;  %v3252_v11 = vld [vmem:[#allocation9 + $0x44] ss:$16 sps:$4 sm:$0xff]   ;;  %v105_v41 = vld [vmem:[#allocation4 + $0x18] sm:$0xff] }
  0x61   :  { %v3255_v12 = vld [vmem:[#allocation7 + $0x64] ss:$16 sps:$4 sm:$0xff]   ;;  %v3254_v13 = vld [vmem:[#allocation9 + $0x40] ss:$16 sps:$4 sm:$0xff]   ;;  %v3293_v42 = vld [vmem:[#allocation7 + $0x4c] ss:$16 sps:$4 sm:$0xff]  }
  0x62   :  { %v3258_v14 = vld [vmem:[#allocation9 + $0x64] ss:$16 sps:$4 sm:$0xff]   ;;  %v3257_v15 = vld [vmem:[#allocation7 + $0x60] ss:$16 sps:$4 sm:$0xff]   ;;  %v3291_v44 = vld [vmem:[#allocation7 + $0x48] ss:$16 sps:$4 sm:$0xff]  }
  0x63   :  { %331 = vmatpush1.bf16.msra.mxu1 %v3245_v6  ;;  %791 = vmatpush1.bf16.msra.mxu0 %v3248_v8  ;;  %v3261_v16 = vld [vmem:[#allocation7 + $0x84] ss:$16 sps:$4 sm:$0xff]   ;;  %v3260_v17 = vld [vmem:[#allocation9 + $0x60] ss:$16 sps:$4 sm:$0xff]   ;;  %v3296_v45 = vld [vmem:[#allocation7 + $0x6c] ss:$16 sps:$4 sm:$0xff]  }
  0x64   :  { %332 = vmatprep.subr.bf16.mxu1 %v3249_v9  ;;  %792 = vmatprep.subr.bf16.mxu0 %v3252_v11  ;;  %v4078_v18 = vld [vmem:[#allocation9 + $0x84] ss:$16 sps:$4 sm:$0xff]   ;;  %v3263_v19 = vld [vmem:[#allocation7 + $0x80] ss:$16 sps:$4 sm:$0xff]   ;;  %v3294_v46 = vld [vmem:[#allocation7 + $0x68] ss:$16 sps:$4 sm:$0xff]  }
  0x65   :  { %v3267_v20 = vld [vmem:[#allocation7 + $0xa4] ss:$16 sps:$4 sm:$0xff]   ;;  %v4080_v21 = vld [vmem:[#allocation9 + $0x80] ss:$16 sps:$4 sm:$0xff]   ;;  %v107_v48 = vld [vmem:[#allocation4 + $0x28] sm:$0xff] }
  0x66   :  { %v4083_v22 = vld [vmem:[#allocation9 + $0xa4] ss:$16 sps:$4 sm:$0xff]   ;;  %v3269_v23 = vld [vmem:[#allocation7 + $0xa0] ss:$16 sps:$4 sm:$0xff]   ;;  %v3299_v49 = vld [vmem:[#allocation7 + $0x8c] ss:$16 sps:$4 sm:$0xff]  }
  0x67   :  { %333 = vmatpush1.bf16.msra.mxu1 %v3251_v10  ;;  %793 = vmatpush1.bf16.msra.mxu0 %v3254_v13  ;;  %v3273_v24 = vld [vmem:[#allocation7 + $0xc4] ss:$16 sps:$4 sm:$0xff]   ;;  %v4086_v25 = vld [vmem:[#allocation9 + $0xa0] ss:$16 sps:$4 sm:$0xff]   ;;  %v3297_v50 = vld [vmem:[#allocation7 + $0x88] ss:$16 sps:$4 sm:$0xff]  }
  0x68   :  { %334 = vmatprep.subr.bf16.mxu1 %v3255_v12  ;;  %794 = vmatprep.subr.bf16.mxu0 %v3258_v14  ;;  %v4089_v26 = vld [vmem:[#allocation9 + $0xc4] ss:$16 sps:$4 sm:$0xff]   ;;  %v3275_v27 = vld [vmem:[#allocation7 + $0xc0] ss:$16 sps:$4 sm:$0xff]   ;;  %v3302_v52 = vld [vmem:[#allocation7 + $0xac] ss:$16 sps:$4 sm:$0xff]  }
  0x69   :  { %v3279_v28 = vld [vmem:[#allocation7 + $0xe4] ss:$16 sps:$4 sm:$0xff]   ;;  %v4092_v29 = vld [vmem:[#allocation9 + $0xc0] ss:$16 sps:$4 sm:$0xff]   ;;  %v3300_v53 = vld [vmem:[#allocation7 + $0xa8] ss:$16 sps:$4 sm:$0xff]  }
  0x6a   :  { %v3281_v30 = vld [vmem:[#allocation7 + $0xe0] ss:$16 sps:$4 sm:$0xff]   ;;  %v4095_v31 = vld [vmem:[#allocation9 + $0xe4] ss:$16 sps:$4 sm:$0xff]   ;;  %v109_v55 = vld [vmem:[#allocation4 + $0x38] sm:$0xff] }
  0x6b   :  { %335 = vmatpush1.bf16.msra.mxu1 %v3257_v15  ;;  %795 = vmatpush1.bf16.msra.mxu0 %v3260_v17  ;;  %v102_v32 = vld [vmem:[#allocation4] sm:$0xff]  ;;  %v104_v40 = vld [vmem:[#allocation4 + $0x10] sm:$0xff]  ;;  %v3305_v56 = vld [vmem:[#allocation7 + $0xcc] ss:$16 sps:$4 sm:$0xff]  }
  0x6c   :  { %336 = vmatprep.subr.bf16.mxu1 %v3261_v16  ;;  %796 = vmatprep.subr.bf16.mxu0 %v4078_v18  ;;  %v4098_v35 = vld [vmem:[#allocation9 + $0xe0] ss:$16 sps:$4 sm:$0xff]   ;;  %v110_v36 = vpack.c.bf16 %v103_v33, %v102_v32  ;;  %v111_v43 = vpack.c.bf16 %v105_v41, %v104_v40  ;;  %v3303_v57 = vld [vmem:[#allocation7 + $0xc8] ss:$16 sps:$4 sm:$0xff]   ;;  %v3308_v59 = vld [vmem:[#allocation7 + $0xec] ss:$16 sps:$4 sm:$0xff]  }
  0x6d   :  { %v106_v47 = vld [vmem:[#allocation4 + $0x20] sm:$0xff]  ;;  %v108_v54 = vld [vmem:[#allocation4 + $0x30] sm:$0xff]  ;;  %v3306_v60 = vld [vmem:[#allocation7 + $0xe8] ss:$16 sps:$4 sm:$0xff]  }
  0x6e   :  { %v112_v51 = vpack.c.bf16 %v107_v48, %v106_v47  ;;  %v113_v58 = vpack.c.bf16 %v109_v55, %v108_v54  ;;  %v4107_v61 = vld [vmem:[#allocation9 + $0xc] ss:$16 sps:$4 sm:$0xff]   ;;  %v4110_v62 = vld [vmem:[#allocation9 + $0x8] ss:$16 sps:$4 sm:$0xff]   ;;  %v4162_v15 = vld [vmem:[#allocation10 + $0x4] ss:$16 sps:$4 sm:$0xff]  }
  0x6f   :  { %337 = vmatpush1.bf16.msra.mxu1 %v3263_v19  ;;  %797 = vmatpush1.bf16.msra.mxu0 %v4080_v21  ;;  %5985 = vst [vmem:[#allocation18_spill] sm:$0xff] %v4107_v61  ;;  %v4112_v63 = vld [vmem:[#allocation9 + $0x2c] ss:$16 sps:$4 sm:$0xff]   ;;  %v4115_v1 = vld [vmem:[#allocation9 + $0x28] ss:$16 sps:$4 sm:$0xff]  }
  0x70   :  { %338 = vmatprep.subr.bf16.mxu1 %v3267_v20  ;;  %798 = vmatprep.subr.bf16.mxu0 %v4083_v22  ;;  %v4117_v2 = vld [vmem:[#allocation9 + $0x4c] ss:$16 sps:$4 sm:$0xff]   ;;  %v4122_v4 = vld [vmem:[#allocation9 + $0x48] ss:$16 sps:$4 sm:$0xff]   ;;  %v4166_v17 = vld [vmem:[#allocation10] ss:$16 sps:$4 sm:$0xff]  }
  0x71   :  { %v4126_v5 = vld [vmem:[#allocation9 + $0x6c] ss:$16 sps:$4 sm:$0xff]   ;;  %v4129_v6 = vld [vmem:[#allocation9 + $0x68] ss:$16 sps:$4 sm:$0xff]   ;;  %v4174_v20 = vld [vmem:[#allocation10 + $0x24] ss:$16 sps:$4 sm:$0xff]  }
  0x72   :  { %v4133_v7 = vld [vmem:[#allocation9 + $0x8c] ss:$16 sps:$4 sm:$0xff]   ;;  %v4136_v8 = vld [vmem:[#allocation9 + $0x88] ss:$16 sps:$4 sm:$0xff]   ;;  %v4190_v32 = vld [vmem:[#allocation10 + $0x40] ss:$16 sps:$4 sm:$0xff]  }
  0x73   :  { %339 = vmatpush1.bf16.msra.mxu1 %v3269_v23  ;;  %799 = vmatpush1.bf16.msra.mxu0 %v4086_v25  ;;  %v4139_v9 = vld [vmem:[#allocation9 + $0xac] ss:$16 sps:$4 sm:$0xff]   ;;  %v4142_v10 = vld [vmem:[#allocation9 + $0xa8] ss:$16 sps:$4 sm:$0xff]   ;;  %v4214_v41 = vld [vmem:[#allocation10 + $0x80] ss:$16 sps:$4 sm:$0xff]  }
  0x74   :  { %340 = vmatprep.subr.bf16.mxu1 %v3273_v24  ;;  %800 = vmatprep.subr.bf16.mxu0 %v4089_v26  ;;  %v4146_v11 = vld [vmem:[#allocation9 + $0xcc] ss:$16 sps:$4 sm:$0xff]   ;;  %v4149_v12 = vld [vmem:[#allocation9 + $0xc8] ss:$16 sps:$4 sm:$0xff]   ;;  %v4178_v24 = vld [vmem:[#allocation10 + $0x20] ss:$16 sps:$4 sm:$0xff]  }
  0x75   :  { %v4152_v13 = vld [vmem:[#allocation9 + $0xec] ss:$16 sps:$4 sm:$0xff]   ;;  %v4155_v14 = vld [vmem:[#allocation9 + $0xe8] ss:$16 sps:$4 sm:$0xff]   ;;  %5986 = vst [vmem:[#allocation19_spill] sm:$0xff] %v4214_v41 }
  0x76   :  { %v4164_v16 = vld [vmem:[#allocation10 + $0xc] ss:$16 sps:$4 sm:$0xff]   ;;  %v4168_v19 = vld [vmem:[#allocation10 + $0x8] ss:$16 sps:$4 sm:$0xff]   ;;  %v4234_v47 = vld [vmem:[#allocation10 + $0xc4] ss:$16 sps:$4 sm:$0xff]  }
  0x77   :  { %341 = vmatpush1.bf16.msra.mxu1 %v3275_v27  ;;  %801 = vmatpush1.bf16.msra.mxu0 %v4092_v29  ;;  %v4176_v23 = vld [vmem:[#allocation10 + $0x2c] ss:$16 sps:$4 sm:$0xff]   ;;  %v4180_v27 = vld [vmem:[#allocation10 + $0x28] ss:$16 sps:$4 sm:$0xff]   ;;  %5992 = vst [vmem:[#allocation25_spill] sm:$0xff] %v4234_v47 }
  0x78   :  { %342 = vmatprep.subr.bf16.mxu1 %v3279_v28  ;;  %802 = vmatprep.subr.bf16.mxu0 %v4095_v31  ;;  %v4186_v28 = vld [vmem:[#allocation10 + $0x44] ss:$16 sps:$4 sm:$0xff]   ;;  %v4192_v33 = vld [vmem:[#allocation10 + $0x48] ss:$16 sps:$4 sm:$0xff]   ;;  %v4212_v40 = vld [vmem:[#allocation10 + $0x8c] ss:$16 sps:$4 sm:$0xff]  }
  0x79   :  { %v4236_v48 = vld [vmem:[#allocation10 + $0xcc] ss:$16 sps:$4 sm:$0xff]   ;;  %v4252_v54 = vld [vmem:[#allocation10 + $0xe8] ss:$16 sps:$4 sm:$0xff]   ;;  %v4258_v55 = vld [vmem:[#allocation10 + $0x104] ss:$16 sps:$4 sm:$0xff]  }
  0x7a   :  { %5993 = vst [vmem:[#allocation26_spill] sm:$0xff] %v4236_v48  ;;  %5999 = vst [vmem:[#allocation32_spill] sm:$0xff] %v4252_v54 }
  0x7b   :  { %343 = vmatpush1.bf16.msra.mxu1 %v3281_v30  ;;  %803 = vmatpush1.bf16.msra.mxu0 %v4098_v35  ;;  %v4188_v30 = vld [vmem:[#allocation10 + $0x4c] ss:$16 sps:$4 sm:$0xff]   ;;  %6000 = vst [vmem:[#allocation33_spill] sm:$0xff] %v4258_v55 }
  0x7c   :  { %401 = vmatprep.subr.bf16.mxu1 %v3287_v34  ;;  %1213 = vmatprep.subr.bf16.mxu0 %v4162_v15  ;;  %v4198_v34 = vld [vmem:[#allocation10 + $0x64] ss:$16 sps:$4 sm:$0xff]  }
  0x7e   :  { %361 = vmatmul.mubr.bf16.vlgmr.msra.gmra.mrb[0].mxu1 %v110_v36  ;;  %821 = vmatmul.mubr.bf16.vlgmr.msra.gmra.mrb[0].mxu0 %v5713_v0 }
  0x7f   :  { %402 = vmatpush1.bf16.msra.mxu1 %v3285_v37  ;;  %370 = vmatprep.mubr.bf16.mxu1 %v5713_v0  ;;  %v4202_v37 = vld [vmem:[#allocation10 + $0x60] ss:$16 sps:$4 sm:$0xff]  }
  0x80   :  { %403 = vmatprep.subr.bf16.mxu1 %v3290_v38  ;;  %1245 = vmatprep.mubr.bf16.mxu0 %v5713_v0  ;;  %v4204_v38 = vld [vmem:[#allocation10 + $0x68] ss:$16 sps:$4 sm:$0xff]  }
  0x81   :  { %1214 = vmatpush1.bf16.msra.mxu0 %v4166_v17 }
  0x82   :  { %1215 = vmatprep.subr.bf16.mxu0 %v4174_v20 }
  0x83   :  { %404 = vmatpush1.bf16.msra.mxu1 %v3288_v39  ;;  %v4210_v39 = vld [vmem:[#allocation10 + $0x84] ss:$16 sps:$4 sm:$0xff]  }
  0x84   :  { %405 = vmatprep.subr.bf16.mxu1 %v3293_v42  ;;  %v4216_v42 = vld [vmem:[#allocation10 + $0x88] ss:$16 sps:$4 sm:$0xff]  }
  0x85   :  { %1216 = vmatpush1.bf16.msra.mxu0 %v4178_v24  ;;  %5987 = vst [vmem:[#allocation20_spill] sm:$0xff] %v4216_v42 }
  0x86   :  { %371 = vmatmul.mubr.bf16.gmra.mrb[4].mxu1 %v111_v43  ;;  %1217 = vmatprep.subr.bf16.mxu0 %v4186_v28 }
  0x87   :  { %406 = vmatpush1.bf16.msra.mxu1 %v3291_v44  ;;  %380 = vmatprep.mubr.bf16.mxu1 %v5713_v0  ;;  %v4224_v44 = vld [vmem:[#allocation10 + $0xac] ss:$16 sps:$4 sm:$0xff]  }
  0x88   :  { %407 = vmatprep.subr.bf16.mxu1 %v3296_v45  ;;  %5989 = vst [vmem:[#allocation22_spill] sm:$0xff] %v4224_v44  ;;  %v4226_v45 = vld [vmem:[#allocation10 + $0xa0] ss:$16 sps:$4 sm:$0xff]  }
  0x89   :  { %1218 = vmatpush1.bf16.msra.mxu0 %v4190_v32  ;;  %5990 = vst [vmem:[#allocation23_spill] sm:$0xff] %v4226_v45 }
  0x8a   :  { %1219 = vmatprep.subr.bf16.mxu0 %v4198_v34 }
  0x8b   :  { %408 = vmatpush1.bf16.msra.mxu1 %v3294_v46  ;;  %v4228_v46 = vld [vmem:[#allocation10 + $0xa8] ss:$16 sps:$4 sm:$0xff]  }
  0x8c   :  { %409 = vmatprep.subr.bf16.mxu1 %v3299_v49  ;;  %5991 = vst [vmem:[#allocation24_spill] sm:$0xff] %v4228_v46  ;;  %v4238_v49 = vld [vmem:[#allocation10 + $0xc0] ss:$16 sps:$4 sm:$0xff]  }
  0x8d   :  { %1220 = vmatpush1.bf16.msra.mxu0 %v4202_v37  ;;  %5994 = vst [vmem:[#allocation27_spill] sm:$0xff] %v4238_v49 }
  0x8e   :  { %381 = vmatmul.mubr.bf16.gmra.mrb[8].mxu1 %v112_v51  ;;  %1221 = vmatprep.subr.bf16.mxu0 %v4210_v39 }
  0x8f   :  { %410 = vmatpush1.bf16.msra.mxu1 %v3297_v50  ;;  %390 = vmatprep.mubr.bf16.mxu1 %v5713_v0  ;;  %v4240_v50 = vld [vmem:[#allocation10 + $0xc8] ss:$16 sps:$4 sm:$0xff]  }
  0x90   :  { %411 = vmatprep.subr.bf16.mxu1 %v3302_v52  ;;  %5995 = vst [vmem:[#allocation28_spill] sm:$0xff] %v4240_v50  ;;  %v4248_v52 = vld [vmem:[#allocation10 + $0xec] ss:$16 sps:$4 sm:$0xff]  }
  0x91   :  { %1222 = vmatpush1.bf16.msra.mxu0 %v4214_v41  ;;  %5997 = vst [vmem:[#allocation30_spill] sm:$0xff] %v4248_v52 }
  0x93   :  { %412 = vmatpush1.bf16.msra.mxu1 %v3300_v53  ;;  %v4250_v53 = vld [vmem:[#allocation10 + $0xe0] ss:$16 sps:$4 sm:$0xff]  }
  0x94   :  { %413 = vmatprep.subr.bf16.mxu1 %v3305_v56  ;;  %5998 = vst [vmem:[#allocation31_spill] sm:$0xff] %v4250_v53  ;;  %v4260_v56 = vld [vmem:[#allocation10 + $0x10c] ss:$16 sps:$4 sm:$0xff]  }
  0x95   :  { %6001 = vst [vmem:[#allocation34_spill] sm:$0xff] %v4260_v56 }
  0x96   :  { %391 = vmatmul.mubr.bf16.gmra.mrb[12].mxu1 %v113_v58 }
  0x97   :  { %414 = vmatpush1.bf16.msra.mxu1 %v3303_v57  ;;  %433 = vmatprep.mubr.bf16.mxu1 %v5713_v0  ;;  %v4262_v57 = vld [vmem:[#allocation10 + $0x100] ss:$16 sps:$4 sm:$0xff]  }
  0x98   :  { %415 = vmatprep.subr.bf16.mxu1 %v3308_v59  ;;  %6002 = vst [vmem:[#allocation35_spill] sm:$0xff] %v4262_v57  ;;  %v4270_v59 = vld [vmem:[#allocation10 + $0x124] ss:$16 sps:$4 sm:$0xff]  }
  0x99   :  { %6004 = vst [vmem:[#allocation37_spill] sm:$0xff] %v4270_v59 }
  0x9b   :  { %416 = vmatpush1.bf16.msra.mxu1 %v3306_v60  ;;  %v4272_v60 = vld [vmem:[#allocation10 + $0x12c] ss:$16 sps:$4 sm:$0xff]  }
  0x9c   :  { %829 = vmatprep.subr.bf16.mxu1 %v4107_v61  ;;  %6005 = vst [vmem:[#allocation38_spill] sm:$0xff] %v4272_v60 }
  0x9e   :  { %434 = vmatmul.mubr.bf16.vlgmr.msra.gmra.mrb[16].mxu1 %v110_v36  ;;  %v4200_v36 = vld [vmem:[#allocation10 + $0x6c] ss:$16 sps:$4 sm:$0xff]  }
  0x9f   :  { %830 = vmatpush1.bf16.msra.mxu1 %v4110_v62  ;;  %443 = vmatprep.mubr.bf16.mxu1 %v5713_v0 }
  0xa0   :  { %831 = vmatprep.subr.bf16.mxu1 %v4112_v63 }
  0xa3   :  { %832 = vmatpush1.bf16.msra.mxu1 %v4115_v1 }
  0xa4   :  { %833 = vmatprep.subr.bf16.mxu1 %v4117_v2 }
  0xa6   :  { %444 = vmatmul.mubr.bf16.gmra.mrb[20].mxu1 %v111_v43  ;;  %v4222_v43 = vld [vmem:[#allocation10 + $0xa4] ss:$16 sps:$4 sm:$0xff]  }
  0xa7   :  { %834 = vmatpush1.bf16.msra.mxu1 %v4122_v4  ;;  %453 = vmatprep.mubr.bf16.mxu1 %v5713_v0  ;;  %5988 = vst [vmem:[#allocation21_spill] sm:$0xff] %v4222_v43 }
  0xa8   :  { %835 = vmatprep.subr.bf16.mxu1 %v4126_v5  ;;  %1223 = vmatprep.subr.bf16.mxu0 %v4222_v43 }
  0xa9   :  { %1224 = vmatpush1.bf16.msra.mxu0 %v4226_v45 }
  0xaa   :  { %1225 = vmatprep.subr.bf16.mxu0 %v4234_v47 }
  0xab   :  { %836 = vmatpush1.bf16.msra.mxu1 %v4129_v6 }
  0xac   :  { %837 = vmatprep.subr.bf16.mxu1 %v4133_v7 }
  0xad   :  { %1226 = vmatpush1.bf16.msra.mxu0 %v4238_v49 }
  0xae   :  { %454 = vmatmul.mubr.bf16.gmra.mrb[24].mxu1 %v112_v51  ;;  %v4246_v51 = vld [vmem:[#allocation10 + $0xe4] ss:$16 sps:$4 sm:$0xff]  }
  0xaf   :  { %838 = vmatpush1.bf16.msra.mxu1 %v4136_v8  ;;  %463 = vmatprep.mubr.bf16.mxu1 %v5713_v0  ;;  %5996 = vst [vmem:[#allocation29_spill] sm:$0xff] %v4246_v51 }
  0xb0   :  { %839 = vmatprep.subr.bf16.mxu1 %v4139_v9  ;;  %1227 = vmatprep.subr.bf16.mxu0 %v4246_v51 }
  0xb1   :  { %1228 = vmatpush1.bf16.msra.mxu0 %v4250_v53 }
  0xb2   :  { %1229 = vmatprep.subr.bf16.mxu0 %v4258_v55  ;;  %v4288_v55 = vld [vmem:[#allocation10 + $0x148] ss:$16 sps:$4 sm:$0xff]  }
  0xb3   :  { %840 = vmatpush1.bf16.msra.mxu1 %v4142_v10  ;;  %6011 = vst [vmem:[#allocation44_spill] sm:$0xff] %v4288_v55 }
  0xb4   :  { %841 = vmatprep.subr.bf16.mxu1 %v4146_v11 }
  0xb5   :  { %1230 = vmatpush1.bf16.msra.mxu0 %v4262_v57  ;;  %v4284_v57 = vld [vmem:[#allocation10 + $0x14c] ss:$16 sps:$4 sm:$0xff]  }
  0xb6   :  { %464 = vmatmul.mubr.bf16.gmra.mrb[28].mxu1 %v113_v58  ;;  %v4264_v58 = vld [vmem:[#allocation10 + $0x108] ss:$16 sps:$4 sm:$0xff]   ;;  %1231 = vmatprep.subr.bf16.mxu0 %v4270_v59  ;;  %6009 = vst [vmem:[#allocation42_spill] sm:$0xff] %v4284_v57 }
  0xb7   :  { %842 = vmatpush1.bf16.msra.mxu1 %v4149_v12  ;;  %861 = vmatprep.mubr.bf16.mxu1 %v5713_v0  ;;  %6003 = vst [vmem:[#allocation36_spill] sm:$0xff] %v4264_v58  ;;  %v4300_v59 = vld [vmem:[#allocation10 + $0x168] ss:$16 sps:$4 sm:$0xff]  }
  0xb8   :  { %843 = vmatprep.subr.bf16.mxu1 %v4152_v13  ;;  %6015 = vst [vmem:[#allocation48_spill] sm:$0xff] %v4300_v59 }
  0xbb   :  { %844 = vmatpush1.bf16.msra.mxu1 %v4155_v14 }
  0xbc   :  { %1254 = vmatprep.subr.bf16.mxu1 %v4164_v16 }
  0xbe   :  { %862 = vmatmul.mubr.bf16.vlgmr.msra.gmra.mrb[32].mxu1 %v5713_v0 }
  0xbf   :  { %1286 = vmatprep.mubr.bf16.mxu1 %v5713_v0  ;;  %1255 = vmatpush1.bf16.msra.mxu1 %v4168_v19  ;;  %v4274_v0 = vld [vmem:[#allocation10 + $0x120] ss:$16 sps:$4 sm:$0xff]  }
  0xc0   :  { %1256 = vmatprep.subr.bf16.mxu1 %v4176_v23  ;;  %6006 = vst [vmem:[#allocation39_spill] sm:$0xff] %v4274_v0  ;;  %1232 = vmatpush1.bf16.msra.mxu0 %v4274_v0  ;;  %v4296_v0 = vld [vmem:[#allocation10 + $0x16c] ss:$16 sps:$4 sm:$0xff]  }
  0xc1   :  { %6013 = vst [vmem:[#allocation46_spill] sm:$0xff] %v4296_v0 }
  0xc3   :  { %1257 = vmatpush1.bf16.msra.mxu1 %v4180_v27 }
  0xc4   :  { %1258 = vmatprep.subr.bf16.mxu1 %v4188_v30 }
  0xc7   :  { %1259 = vmatpush1.bf16.msra.mxu1 %v4192_v33 }
  0xc8   :  { %1260 = vmatprep.subr.bf16.mxu1 %v4200_v36 }
  0xcb   :  { %1261 = vmatpush1.bf16.msra.mxu1 %v4204_v38 }
  0xcc   :  { %1262 = vmatprep.subr.bf16.mxu1 %v4212_v40 }
  0xcf   :  { %1263 = vmatpush1.bf16.msra.mxu1 %v4216_v42 }
  0xd0   :  { %1264 = vmatprep.subr.bf16.mxu1 %v4224_v44 }
  0xd3   :  { %1265 = vmatpush1.bf16.msra.mxu1 %v4228_v46 }
  0xd4   :  { %1266 = vmatprep.subr.bf16.mxu1 %v4236_v48 }
  0xd7   :  { %1267 = vmatpush1.bf16.msra.mxu1 %v4240_v50 }
  0xd8   :  { %1268 = vmatprep.subr.bf16.mxu1 %v4248_v52 }
  0xdb   :  { %1269 = vmatpush1.bf16.msra.mxu1 %v4252_v54  ;;  %v4276_v54 = vld [vmem:[#allocation10 + $0x128] ss:$16 sps:$4 sm:$0xff]  }
  0xdc   :  { %1270 = vmatprep.subr.bf16.mxu1 %v4260_v56  ;;  %6007 = vst [vmem:[#allocation40_spill] sm:$0xff] %v4276_v54  ;;  %v4282_v56 = vld [vmem:[#allocation10 + $0x144] ss:$16 sps:$4 sm:$0xff]  }
  0xdd   :  { %6008 = vst [vmem:[#allocation41_spill] sm:$0xff] %v4282_v56  ;;  %1233 = vmatprep.subr.bf16.mxu0 %v4282_v56  ;;  %v4312_v56 = vld [vmem:[#allocation10 + $0x188] ss:$16 sps:$4 sm:$0xff]  }
  0xde   :  { %6019 = vst [vmem:[#allocation52_spill] sm:$0xff] %v4312_v56 }
  0xdf   :  { %1271 = vmatpush1.bf16.msra.mxu1 %v4264_v58  ;;  %v4286_v58 = vld [vmem:[#allocation10 + $0x140] ss:$16 sps:$4 sm:$0xff]  }
  0xe0   :  { %1272 = vmatprep.subr.bf16.mxu1 %v4272_v60  ;;  %6010 = vst [vmem:[#allocation43_spill] sm:$0xff] %v4286_v58  ;;  %1234 = vmatpush1.bf16.msra.mxu0 %v4286_v58  ;;  %v4294_v60 = vld [vmem:[#allocation10 + $0x164] ss:$16 sps:$4 sm:$0xff]   ;;  %v4308_v58 = vld [vmem:[#allocation10 + $0x18c] ss:$16 sps:$4 sm:$0xff]  }
  0xe1   :  { %6012 = vst [vmem:[#allocation45_spill] sm:$0xff] %v4294_v60  ;;  %1235 = vmatprep.subr.bf16.mxu0 %v4294_v60  ;;  %6017 = vst [vmem:[#allocation50_spill] sm:$0xff] %v4308_v58  ;;  %v4324_v60 = vld [vmem:[#allocation10 + $0x1a8] ss:$16 sps:$4 sm:$0xff]  }
  0xe2   :  { %6023 = vst [vmem:[#allocation56_spill] sm:$0xff] %v4324_v60 }
  0xe3   :  { %1273 = vmatpush1.bf16.msra.mxu1 %v4276_v54  ;;  %v4298_v54 = vld [vmem:[#allocation10 + $0x160] ss:$16 sps:$4 sm:$0xff]  }
  0xe4   :  { %1274 = vmatprep.subr.bf16.mxu1 %v4284_v57  ;;  %6014 = vst [vmem:[#allocation47_spill] sm:$0xff] %v4298_v54  ;;  %1236 = vmatpush1.bf16.msra.mxu0 %v4298_v54  ;;  %v4306_v57 = vld [vmem:[#allocation10 + $0x184] ss:$16 sps:$4 sm:$0xff]   ;;  %v4320_v54 = vld [vmem:[#allocation10 + $0x1ac] ss:$16 sps:$4 sm:$0xff]  }
  0xe5   :  { %6016 = vst [vmem:[#allocation49_spill] sm:$0xff] %v4306_v57  ;;  %1237 = vmatprep.subr.bf16.mxu0 %v4306_v57  ;;  %6021 = vst [vmem:[#allocation54_spill] sm:$0xff] %v4320_v54  ;;  %v4336_v57 = vld [vmem:[#allocation10 + $0x1c8] ss:$16 sps:$4 sm:$0xff]  }
  0xe6   :  { %6027 = vst [vmem:[#allocation60_spill] sm:$0xff] %v4336_v57 }
  0xe7   :  { %1275 = vmatpush1.bf16.msra.mxu1 %v4288_v55  ;;  %v4310_v55 = vld [vmem:[#allocation10 + $0x180] ss:$16 sps:$4 sm:$0xff]  }
  0xe8   :  { %1276 = vmatprep.subr.bf16.mxu1 %v4296_v0  ;;  %6018 = vst [vmem:[#allocation51_spill] sm:$0xff] %v4310_v55  ;;  %1238 = vmatpush1.bf16.msra.mxu0 %v4310_v55  ;;  %v4318_v0 = vld [vmem:[#allocation10 + $0x1a4] ss:$16 sps:$4 sm:$0xff]   ;;  %v4332_v55 = vld [vmem:[#allocation10 + $0x1cc] ss:$16 sps:$4 sm:$0xff]  }
  0xe9   :  { %6020 = vst [vmem:[#allocation53_spill] sm:$0xff] %v4318_v0  ;;  %1239 = vmatprep.subr.bf16.mxu0 %v4318_v0  ;;  %6025 = vst [vmem:[#allocation58_spill] sm:$0xff] %v4332_v55  ;;  %v4348_v0 = vld [vmem:[#allocation10 + $0x1e8] ss:$16 sps:$4 sm:$0xff]  }
  0xea   :  { %6031 = vst [vmem:[#allocation64_spill] sm:$0xff] %v4348_v0 }
  0xeb   :  { %1277 = vmatpush1.bf16.msra.mxu1 %v4300_v59  ;;  %v4322_v59 = vld [vmem:[#allocation10 + $0x1a0] ss:$16 sps:$4 sm:$0xff]  }
  0xec   :  { %1278 = vmatprep.subr.bf16.mxu1 %v4308_v58  ;;  %6022 = vst [vmem:[#allocation55_spill] sm:$0xff] %v4322_v59  ;;  %1240 = vmatpush1.bf16.msra.mxu0 %v4322_v59  ;;  %v4330_v58 = vld [vmem:[#allocation10 + $0x1c4] ss:$16 sps:$4 sm:$0xff]   ;;  %v4344_v59 = vld [vmem:[#allocation10 + $0x1ec] ss:$16 sps:$4 sm:$0xff]  }
  0xed   :  { %6024 = vst [vmem:[#allocation57_spill] sm:$0xff] %v4330_v58  ;;  %1241 = vmatprep.subr.bf16.mxu0 %v4330_v58  ;;  %6029 = vst [vmem:[#allocation62_spill] sm:$0xff] %v4344_v59  ;;  %v146_v58 = vld [vmem:[%s5707_s4] sm:$0xf] }
  0xef   :  { %1279 = vmatpush1.bf16.msra.mxu1 %v4312_v56  ;;  %v4334_v56 = vld [vmem:[#allocation10 + $0x1c0] ss:$16 sps:$4 sm:$0xff]  }
  0xf0   :  { %1280 = vmatprep.subr.bf16.mxu1 %v4320_v54  ;;  %6026 = vst [vmem:[#allocation59_spill] sm:$0xff] %v4334_v56  ;;  %1242 = vmatpush1.bf16.msra.mxu0 %v4334_v56  ;;  %v4342_v54 = vld [vmem:[#allocation10 + $0x1e4] ss:$16 sps:$4 sm:$0xff]  }
  0xf1   :  { %6028 = vst [vmem:[#allocation61_spill] sm:$0xff] %v4342_v54  ;;  %1243 = vmatprep.subr.bf16.mxu0 %v4342_v54 }
  0xf3   :  { %1281 = vmatpush1.bf16.msra.mxu1 %v4324_v60  ;;  %v4346_v60 = vld [vmem:[#allocation10 + $0x1e0] ss:$16 sps:$4 sm:$0xff]  }
  0xf4   :  { %1282 = vmatprep.subr.bf16.mxu1 %v4332_v55  ;;  %6030 = vst [vmem:[#allocation63_spill] sm:$0xff] %v4346_v60  ;;  %1244 = vmatpush1.bf16.msra.mxu0 %v4346_v60 }
  0xf5   :  { %1319 = vmatprep.subr.bf16.mxu0 %v4075_v3 }
  0xf7   :  { %1283 = vmatpush1.bf16.msra.mxu1 %v4336_v57  ;;  %v148_v57 = vlaneseq }
  0xf8   :  { %1284 = vmatprep.subr.bf16.mxu1 %v4344_v59 }
  0xf9   :  { %v4356_v56 = vshrl.u32 %v148_v57, 7 }
  0xfb   :  { %1285 = vmatpush1.bf16.msra.mxu1 %v4348_v0  ;;  %v5802_v55 = vsub.s32 0, %v4356_v56  ;;  %v5805_v54 = vsub.s32 1, %v4356_v56 }
  0xfc   :  { %1360 = vmatprep.subr.bf16.mxu1 %v4107_v61 }
  0xfd   :  { %v151_v60 = vrot.slane %v146_v58, %v5802_v55  ;;  %v155_v0 = vrot.slane %v146_v58, %v5805_v54 }
 0x151   :  { %v362_v3 = vpop.f32.mrb[0].mxu1  ;;  %v822_v52 = vpop.f32.mrb[0].mxu0 }
 0x152   :  { %v363_v59 = vadd.f32 %v362_v3, %v151_v60  ;;  %v364_v61 = vpop.f32.mrb[1].mxu1  ;;  %v824_v48 = vpop.f32.mrb[1].mxu0 }
 0x153   :  { %v365_v53 = vadd.f32 %v364_v61, %v155_v0  ;;  %v366_v57 = vpop.f32.mrb[2].mxu1  ;;  %v826_v45 = vpop.f32.mrb[2].mxu0 }
 0x154   :  { %v4367_v51 = vadd.f32 %v366_v57, %v151_v60  ;;  %v870_v50 = vadd.f32 %v822_v52, %v363_v59  ;;  %v368_v49 = vpop.f32.mrb[3].mxu1  ;;  %v827_v44 = vpop.f32.mrb[3].mxu0 }
 0x155   :  { %v4369_v47 = vadd.f32 %v368_v49, %v155_v0  ;;  %v871_v46 = vadd.f32 %v824_v48, %v365_v53 }
 0x156   :  { %6032 = vst [vmem:[#allocation65_spill] sm:$0xff] %v4367_v51 }
 0x157   :  { %6033 = vst [vmem:[#allocation66_spill] sm:$0xff] %v4369_v47 }
 0x159   :  { %v372_v55 = vpop.f32.mrb[4].mxu1 }
 0x15a   :  { %v4371_v43 = vadd.f32 %v372_v55, %v151_v60  ;;  %v374_v54 = vpop.f32.mrb[5].mxu1 }
 0x15b   :  { %v4373_v42 = vadd.f32 %v374_v54, %v155_v0  ;;  %v376_v3 = vpop.f32.mrb[6].mxu1 }
 0x15c   :  { %6034 = vst [vmem:[#allocation67_spill] sm:$0xff] %v4371_v43  ;;  %v4375_v61 = vadd.f32 %v376_v3, %v151_v60  ;;  %v378_v41 = vpop.f32.mrb[7].mxu1 }
 0x15d   :  { %6035 = vst [vmem:[#allocation68_spill] sm:$0xff] %v4373_v42  ;;  %v4377_v57 = vadd.f32 %v378_v41, %v155_v0 }
 0x15e   :  { %6036 = vst [vmem:[#allocation69_spill] sm:$0xff] %v4375_v61 }
 0x15f   :  { %6037 = vst [vmem:[#allocation70_spill] sm:$0xff] %v4377_v57 }
 0x161   :  { %v382_v52 = vpop.f32.mrb[8].mxu1 }
 0x162   :  { %v4379_v59 = vadd.f32 %v382_v52, %v151_v60  ;;  %v384_v49 = vpop.f32.mrb[9].mxu1 }
 0x163   :  { %v4381_v47 = vadd.f32 %v384_v49, %v155_v0  ;;  %v386_v45 = vpop.f32.mrb[10].mxu1  ;;  %v5810_v49 = vsub.s32 2, %v4356_v56 }
 0x164   :  { %6038 = vst [vmem:[#allocation71_spill] sm:$0xff] %v4379_v59  ;;  %v4383_v44 = vadd.f32 %v386_v45, %v151_v60  ;;  %v388_v48 = vpop.f32.mrb[11].mxu1  ;;  %v5811_v45 = vsub.s32 3, %v4356_v56 }
 0x165   :  { %6039 = vst [vmem:[#allocation72_spill] sm:$0xff] %v4381_v47  ;;  %v4385_v53 = vadd.f32 %v388_v48, %v155_v0  ;;  %v159_v48 = vrot.slane %v146_v58, %v5810_v49 }
 0x166   :  { %6040 = vst [vmem:[#allocation73_spill] sm:$0xff] %v4383_v44 }
 0x167   :  { %6041 = vst [vmem:[#allocation74_spill] sm:$0xff] %v4385_v53 }
 0x169   :  { %v392_v54 = vpop.f32.mrb[12].mxu1 }
 0x16a   :  { %v4387_v55 = vadd.f32 %v392_v54, %v151_v60  ;;  %v394_v3 = vpop.f32.mrb[13].mxu1  ;;  %v163_v54 = vrot.slane %v146_v58, %v5811_v45 }
 0x16b   :  { %v4389_v61 = vadd.f32 %v394_v3, %v155_v0  ;;  %v396_v41 = vpop.f32.mrb[14].mxu1 }
 0x16c   :  { %6042 = vst [vmem:[#allocation75_spill] sm:$0xff] %v4387_v55  ;;  %v4391_v57 = vadd.f32 %v396_v41, %v151_v60  ;;  %v398_v52 = vpop.f32.mrb[15].mxu1 }
 0x16d   :  { %6043 = vst [vmem:[#allocation76_spill] sm:$0xff] %v4389_v61  ;;  %v4393_v59 = vadd.f32 %v398_v52, %v155_v0 }
 0x16e   :  { %6044 = vst [vmem:[#allocation77_spill] sm:$0xff] %v4391_v57 }
 0x16f   :  { %6045 = vst [vmem:[#allocation78_spill] sm:$0xff] %v4393_v59 }
 0x171   :  { %v435_v44 = vpop.f32.mrb[16].mxu1 }
 0x172   :  { %v437_v53 = vpop.f32.mrb[17].mxu1 }
 0x173   :  { %v439_v3 = vpop.f32.mrb[18].mxu1 }
 0x174   :  { %v4401_v61 = vadd.f32 %v439_v3, %v159_v48  ;;  %v441_v60 = vpop.f32.mrb[19].mxu1 }
 0x175   :  { %v4403_v41 = vadd.f32 %v441_v60, %v163_v54 }
 0x176   :  { %6046 = vst [vmem:[#allocation79_spill] sm:$0xff] %v4401_v61 }
 0x177   :  { %6047 = vst [vmem:[#allocation80_spill] sm:$0xff] %v4403_v41 }
 0x179   :  { %v445_v0 = vpop.f32.mrb[20].mxu1 }
 0x17a   :  { %v4405_v52 = vadd.f32 %v445_v0, %v159_v48  ;;  %v447_v59 = vpop.f32.mrb[21].mxu1 }
 0x17b   :  { %v4407_v57 = vadd.f32 %v447_v59, %v163_v54  ;;  %v449_v55 = vpop.f32.mrb[22].mxu1  ;;  %v878_v59 = vmul.f32 0.5, %v871_v46 }
 0x17c   :  { %6048 = vst [vmem:[#allocation81_spill] sm:$0xff] %v4405_v52  ;;  %v4409_v47 = vadd.f32 %v449_v55, %v159_v48  ;;  %v451_v49 = vpop.f32.mrb[23].mxu1 }
 0x17d   :  { %6049 = vst [vmem:[#allocation82_spill] sm:$0xff] %v4407_v57  ;;  %v4411_v42 = vadd.f32 %v451_v49, %v163_v54  ;;  %v874_v57 = vmul.f32 0.5, %v870_v50  ;;  %3437 = vtanh.f32 %v878_v59 }
 0x17e   :  { %6050 = vst [vmem:[#allocation83_spill] sm:$0xff] %v4409_v47 }
 0x17f   :  { %6051 = vst [vmem:[#allocation84_spill] sm:$0xff] %v4411_v42  ;;  %3439 = vtanh.f32 %v874_v57 }
 0x181   :  { %v455_v43 = vpop.f32.mrb[24].mxu1 }
 0x182   :  { %v4413_v58 = vadd.f32 %v455_v43, %v159_v48  ;;  %v457_v3 = vpop.f32.mrb[25].mxu1 }
 0x183   :  { %v4415_v45 = vadd.f32 %v457_v3, %v163_v54  ;;  %v459_v60 = vpop.f32.mrb[26].mxu1 }
 0x184   :  { %6052 = vst [vmem:[#allocation85_spill] sm:$0xff] %v4413_v58  ;;  %v4417_v41 = vadd.f32 %v459_v60, %v159_v48  ;;  %v461_v0 = vpop.f32.mrb[27].mxu1  ;;  %v436_v60 = vadd.f32 %v435_v44, %v159_v48 }
 0x185   :  { %6053 = vst [vmem:[#allocation86_spill] sm:$0xff] %v4415_v45  ;;  %v4419_v52 = vadd.f32 %v461_v0, %v163_v54 }
 0x186   :  { %6054 = vst [vmem:[#allocation87_spill] sm:$0xff] %v4417_v41  ;;  %v438_v41 = vadd.f32 %v437_v53, %v163_v54 }
 0x187   :  { %6055 = vst [vmem:[#allocation88_spill] sm:$0xff] %v4419_v52  ;;  %v3438_v59 = vpop.eup %3437 }
 0x189   :  { %v465_v61 = vpop.f32.mrb[28].mxu1 }
 0x18a   :  { %v4421_v55 = vadd.f32 %v465_v61, %v159_v48  ;;  %v467_v49 = vpop.f32.mrb[29].mxu1 }
 0x18b   :  { %v4423_v42 = vadd.f32 %v467_v49, %v163_v54  ;;  %v469_v43 = vpop.f32.mrb[30].mxu1  ;;  %v880_v49 = vmul.f32 0.5, %v3438_v59  ;;  %v6070_v59 = vld [vmem:[#allocation28_spill] sm:$0xff] }
 0x18c   :  { %6056 = vst [vmem:[#allocation89_spill] sm:$0xff] %v4421_v55  ;;  %v4425_v58 = vadd.f32 %v469_v43, %v159_v48  ;;  %v471_v3 = vpop.f32.mrb[31].mxu1  ;;  %v3440_v55 = vpop.eup %3439 }
 0x18d   :  { %6057 = vst [vmem:[#allocation90_spill] sm:$0xff] %v4423_v42  ;;  %v4427_v45 = vadd.f32 %v471_v3, %v163_v54  ;;  %v876_v51 = vmul.f32 0.5, %v3440_v55  ;;  %v881_v57 = vadd.f32 0.5, %v880_v49  ;;  %v4450_v55 = vld [vmem:[#allocation9 + $0x40] ss:$16 sps:$4 sm:$0xff]  }
 0x18e   :  { %6058 = vst [vmem:[#allocation91_spill] sm:$0xff] %v4425_v58  ;;  %v6072_v49 = vld [vmem:[#allocation30_spill] sm:$0xff] }
 0x18f   :  { %6059 = vst [vmem:[#allocation92_spill] sm:$0xff] %v4427_v45  ;;  %v877_v43 = vadd.f32 0.5, %v876_v51  ;;  %v887_v3 = vmul.f32 0.0, %v881_v57  ;;  %v6060_v51 = vmov 0   ;;  %v6073_v57 = vld [vmem:[#allocation31_spill] sm:$0xff] }
 0x191   :  { %v863_v0 = vpop.f32.mrb[32].mxu1 }
 0x192   :  { %v872_v52 = vadd.f32 %v863_v0, %v436_v60  ;;  %v865_v46 = vpop.f32.mrb[33].mxu1  ;;  %v4432_v60 = vld [vmem:[#allocation9] ss:$16 sps:$4 sm:$0xff]   ;;  %v4454_v0 = vld [vmem:[#allocation9 + $0x64] ss:$16 sps:$4 sm:$0xff]  }
 0x193   :  { %v873_v50 = vadd.f32 %v865_v46, %v438_v41  ;;  %v867_v47 = vpop.f32.mrb[34].mxu1  ;;  %v4458_v46 = vld [vmem:[#allocation9 + $0x60] ss:$16 sps:$4 sm:$0xff]  }
 0x194   :  { %3441 = vtanh.f32 %v872_v52  ;;  %v868_v61 = vpop.f32.mrb[35].mxu1 }
 0x195   :  { %v883_v42 = vmul.f32 0.5, %v873_v50  ;;  %v6069_v50 = vld [vmem:[#allocation27_spill] sm:$0xff]  ;;  %v6071_v61 = vld [vmem:[#allocation29_spill] sm:$0xff] }
 0x197   :  { %3443 = vtanh.f32 %v883_v42  ;;  %v4436_v42 = vld [vmem:[#allocation9 + $0x24] ss:$16 sps:$4 sm:$0xff]  }
 0x19e   :  { %v3442_v58 = vpop.eup %3441 }
 0x19f   :  { %v888_v45 = vmul.f32 %v3442_v58, %v877_v43  ;;  %v4446_v58 = vld [vmem:[#allocation9 + $0x44] ss:$16 sps:$4 sm:$0xff]  }
 0x1a0   :  { %v6074_v43 = vld [vmem:[#allocation32_spill] sm:$0xff] }
 0x1a1   :  { %v4429_v44 = vadd.f32 %v888_v45, %v887_v3  ;;  %v3444_v53 = vpop.eup %3443  ;;  %v4442_v45 = vld [vmem:[#allocation9 + $0x20] ss:$16 sps:$4 sm:$0xff]   ;;  %v6075_v3 = vld [vmem:[#allocation33_spill] sm:$0xff] }
 0x1a2   :  { %v885_v48 = vmul.f32 0.5, %v3444_v53  ;;  %v6076_v53 = vld [vmem:[#allocation34_spill] sm:$0xff] }
 0x1a3   :  { %3445 = vtanh.f32 %v4429_v44 }
 0x1a4   :  { %v886_v47 = vadd.f32 0.5, %v885_v48  ;;  %v6077_v48 = vld [vmem:[#allocation35_spill] sm:$0xff] }
 0x1ad   :  { %v3446_v54 = vpop.eup %3445 }
 0x1ae   :  { %v891_v41 = vmul.f32 %v3446_v54, %v886_v47  ;;  %v6078_v47 = vld [vmem:[#allocation36_spill] sm:$0xff]  ;;  %v6079_v54 = vld [vmem:[#allocation37_spill] sm:$0xff] }
 0x1b0   :  { %v892_v52 = vpack.c.bf16 %v891_v41, %v891_v41  ;;  %v6080_v41 = vld [vmem:[#allocation38_spill] sm:$0xff] }
 0x1b2   :  { %1246 = vmatmul.mubr.bf16.vlgmr.msra.gmra.mrb[4].mxu0 %v892_v52  ;;  %1287 = vmatmul.mubr.bf16.vlgmr.msra.gmra.mrb[36].mxu1 %v892_v52 }
 0x1b3   :  { %1320 = vmatpush1.bf16.msra.mxu0 %v4432_v60  ;;  %1361 = vmatpush1.bf16.msra.mxu1 %v4110_v62 }
 0x1b4   :  { %1321 = vmatprep.subr.bf16.mxu0 %v4436_v42  ;;  %1362 = vmatprep.subr.bf16.mxu1 %v4112_v63 }
 0x1b5   :  { %1351 = vmatprep.mubr.bf16.mxu0 %v6060_v51  ;;  %1392 = vmatprep.mubr.bf16.mxu1 %v6060_v51 }
 0x1b7   :  { %1322 = vmatpush1.bf16.msra.mxu0 %v4442_v45  ;;  %1363 = vmatpush1.bf16.msra.mxu1 %v4115_v1 }
 0x1b8   :  { %1323 = vmatprep.subr.bf16.mxu0 %v4446_v58  ;;  %1364 = vmatprep.subr.bf16.mxu1 %v4117_v2 }
 0x1bb   :  { %1324 = vmatpush1.bf16.msra.mxu0 %v4450_v55  ;;  %1365 = vmatpush1.bf16.msra.mxu1 %v4122_v4 }
 0x1bc   :  { %1325 = vmatprep.subr.bf16.mxu0 %v4454_v0  ;;  %1366 = vmatprep.subr.bf16.mxu1 %v4126_v5 }
 0x1bf   :  { %1326 = vmatpush1.bf16.msra.mxu0 %v4458_v46  ;;  %1367 = vmatpush1.bf16.msra.mxu1 %v4129_v6 }
 0x1c0   :  { %1327 = vmatprep.subr.bf16.mxu0 %v4078_v18  ;;  %1368 = vmatprep.subr.bf16.mxu1 %v4133_v7  ;;  %v6061_v18 = vld [vmem:[#allocation19_spill] sm:$0xff] }
 0x1c3   :  { %1328 = vmatpush1.bf16.msra.mxu0 %v4080_v21  ;;  %1369 = vmatpush1.bf16.msra.mxu1 %v4136_v8  ;;  %v6062_v21 = vld [vmem:[#allocation20_spill] sm:$0xff] }
 0x1c4   :  { %1329 = vmatprep.subr.bf16.mxu0 %v4083_v22  ;;  %1370 = vmatprep.subr.bf16.mxu1 %v4139_v9  ;;  %v6063_v22 = vld [vmem:[#allocation21_spill] sm:$0xff] }
 0x1c7   :  { %1330 = vmatpush1.bf16.msra.mxu0 %v4086_v25  ;;  %1371 = vmatpush1.bf16.msra.mxu1 %v4142_v10  ;;  %v6064_v25 = vld [vmem:[#allocation22_spill] sm:$0xff] }
 0x1c8   :  { %1331 = vmatprep.subr.bf16.mxu0 %v4089_v26  ;;  %1372 = vmatprep.subr.bf16.mxu1 %v4146_v11  ;;  %v6065_v26 = vld [vmem:[#allocation23_spill] sm:$0xff] }
 0x1cb   :  { %1332 = vmatpush1.bf16.msra.mxu0 %v4092_v29  ;;  %1373 = vmatpush1.bf16.msra.mxu1 %v4149_v12  ;;  %v6066_v29 = vld [vmem:[#allocation24_spill] sm:$0xff] }
 0x1cc   :  { %1333 = vmatprep.subr.bf16.mxu0 %v4095_v31  ;;  %1374 = vmatprep.subr.bf16.mxu1 %v4152_v13  ;;  %v6067_v31 = vld [vmem:[#allocation25_spill] sm:$0xff] }
 0x1cf   :  { %1334 = vmatpush1.bf16.msra.mxu0 %v4098_v35  ;;  %1375 = vmatpush1.bf16.msra.mxu1 %v4155_v14  ;;  %v6068_v35 = vld [vmem:[#allocation26_spill] sm:$0xff] }
 0x1d0   :  { %1425 = vmatprep.subr.bf16.mxu0 %v4162_v15  ;;  %1466 = vmatprep.subr.bf16.mxu1 %v4164_v16 }
 0x1d2   :  { %1352 = vmatmul.mubr.bf16.vlgmr.msra.gmra.mrb[8].mxu0 %v892_v52  ;;  %1393 = vmatmul.mubr.bf16.vlgmr.msra.gmra.mrb[40].mxu1 %v892_v52  ;;  %v6081_v52 = vld [vmem:[#allocation39_spill] sm:$0xff] }
 0x1d3   :  { %1426 = vmatpush1.bf16.msra.mxu0 %v4166_v17  ;;  %1467 = vmatpush1.bf16.msra.mxu1 %v4168_v19 }
 0x1d4   :  { %1427 = vmatprep.subr.bf16.mxu0 %v4174_v20  ;;  %1468 = vmatprep.subr.bf16.mxu1 %v4176_v23 }
 0x1d7   :  { %1428 = vmatpush1.bf16.msra.mxu0 %v4178_v24  ;;  %1469 = vmatpush1.bf16.msra.mxu1 %v4180_v27 }
 0x1d8   :  { %1429 = vmatprep.subr.bf16.mxu0 %v4186_v28  ;;  %1470 = vmatprep.subr.bf16.mxu1 %v4188_v30 }
 0x1db   :  { %1430 = vmatpush1.bf16.msra.mxu0 %v4190_v32  ;;  %1471 = vmatpush1.bf16.msra.mxu1 %v4192_v33 }
 0x1dc   :  { %1431 = vmatprep.subr.bf16.mxu0 %v4198_v34  ;;  %1472 = vmatprep.subr.bf16.mxu1 %v4200_v36 }
 0x1df   :  { %1432 = vmatpush1.bf16.msra.mxu0 %v4202_v37  ;;  %1473 = vmatpush1.bf16.msra.mxu1 %v4204_v38 }
 0x1e0   :  { %1433 = vmatprep.subr.bf16.mxu0 %v4210_v39  ;;  %1474 = vmatprep.subr.bf16.mxu1 %v4212_v40 }
 0x1e3   :  { %1434 = vmatpush1.bf16.msra.mxu0 %v6061_v18  ;;  %1475 = vmatpush1.bf16.msra.mxu1 %v6062_v21 }
 0x1e4   :  { %1435 = vmatprep.subr.bf16.mxu0 %v6063_v22  ;;  %1476 = vmatprep.subr.bf16.mxu1 %v6064_v25  ;;  %v6115_v22 = vsub.s32 3, %v4356_v56 }
 0x1e7   :  { %1436 = vmatpush1.bf16.msra.mxu0 %v6065_v26  ;;  %1477 = vmatpush1.bf16.msra.mxu1 %v6066_v29 }
 0x1e8   :  { %1437 = vmatprep.subr.bf16.mxu0 %v6067_v31  ;;  %1478 = vmatprep.subr.bf16.mxu1 %v6068_v35 }
 0x1eb   :  { %1438 = vmatpush1.bf16.msra.mxu0 %v6069_v50  ;;  %1479 = vmatpush1.bf16.msra.mxu1 %v6070_v59 }
 0x1ec   :  { %1439 = vmatprep.subr.bf16.mxu0 %v6071_v61  ;;  %1480 = vmatprep.subr.bf16.mxu1 %v6072_v49  ;;  %v6082_v61 = vld [vmem:[#allocation40_spill] sm:$0xff]  ;;  %v6083_v49 = vld [vmem:[#allocation41_spill] sm:$0xff] }
 0x1ef   :  { %1440 = vmatpush1.bf16.msra.mxu0 %v6073_v57  ;;  %1481 = vmatpush1.bf16.msra.mxu1 %v6074_v43  ;;  %v6084_v57 = vld [vmem:[#allocation42_spill] sm:$0xff]  ;;  %v6085_v43 = vld [vmem:[#allocation43_spill] sm:$0xff] }
 0x1f0   :  { %1441 = vmatprep.subr.bf16.mxu0 %v6075_v3  ;;  %1482 = vmatprep.subr.bf16.mxu1 %v6076_v53  ;;  %v6086_v3 = vld [vmem:[#allocation44_spill] sm:$0xff]  ;;  %v6087_v53 = vld [vmem:[#allocation45_spill] sm:$0xff] }
 0x1f3   :  { %1442 = vmatpush1.bf16.msra.mxu0 %v6077_v48  ;;  %1483 = vmatpush1.bf16.msra.mxu1 %v6078_v47  ;;  %v6088_v48 = vld [vmem:[#allocation46_spill] sm:$0xff]  ;;  %v6089_v47 = vld [vmem:[#allocation47_spill] sm:$0xff] }
 0x1f4   :  { %1443 = vmatprep.subr.bf16.mxu0 %v6079_v54  ;;  %1484 = vmatprep.subr.bf16.mxu1 %v6080_v41  ;;  %v6090_v54 = vld [vmem:[#allocation48_spill] sm:$0xff]  ;;  %v6091_v41 = vld [vmem:[#allocation49_spill] sm:$0xff] }
 0x1f7   :  { %1444 = vmatpush1.bf16.msra.mxu0 %v6081_v52  ;;  %1485 = vmatpush1.bf16.msra.mxu1 %v6082_v61  ;;  %v6092_v52 = vld [vmem:[#allocation50_spill] sm:$0xff]  ;;  %v6093_v61 = vld [vmem:[#allocation51_spill] sm:$0xff] }
 0x1f8   :  { %1445 = vmatprep.subr.bf16.mxu0 %v6083_v49  ;;  %1486 = vmatprep.subr.bf16.mxu1 %v6084_v57  ;;  %v6094_v49 = vld [vmem:[#allocation52_spill] sm:$0xff]  ;;  %v6095_v57 = vld [vmem:[#allocation53_spill] sm:$0xff] }
 0x1fb   :  { %1446 = vmatpush1.bf16.msra.mxu0 %v6085_v43  ;;  %1487 = vmatpush1.bf16.msra.mxu1 %v6086_v3  ;;  %v6096_v43 = vld [vmem:[#allocation54_spill] sm:$0xff]  ;;  %v6097_v3 = vld [vmem:[#allocation55_spill] sm:$0xff] }
 0x1fc   :  { %1447 = vmatprep.subr.bf16.mxu0 %v6087_v53  ;;  %1488 = vmatprep.subr.bf16.mxu1 %v6088_v48  ;;  %v6098_v53 = vld [vmem:[#allocation56_spill] sm:$0xff]  ;;  %v6099_v48 = vld [vmem:[#allocation57_spill] sm:$0xff] }
 0x1ff   :  { %1448 = vmatpush1.bf16.msra.mxu0 %v6089_v47  ;;  %1489 = vmatpush1.bf16.msra.mxu1 %v6090_v54  ;;  %v6100_v47 = vld [vmem:[#allocation58_spill] sm:$0xff]  ;;  %v6101_v54 = vld [vmem:[#allocation59_spill] sm:$0xff] }
 0x200   :  { %1449 = vmatprep.subr.bf16.mxu0 %v6091_v41  ;;  %1490 = vmatprep.subr.bf16.mxu1 %v6092_v52  ;;  %v6102_v41 = vld [vmem:[#allocation60_spill] sm:$0xff]  ;;  %v6103_v52 = vld [vmem:[#allocation61_spill] sm:$0xff] }
 0x203   :  { %1450 = vmatpush1.bf16.msra.mxu0 %v6093_v61  ;;  %1491 = vmatpush1.bf16.msra.mxu1 %v6094_v49  ;;  %v6104_v61 = vld [vmem:[#allocation62_spill] sm:$0xff]  ;;  %v6105_v49 = vld [vmem:[#allocation63_spill] sm:$0xff] }
 0x204   :  { %1451 = vmatprep.subr.bf16.mxu0 %v6095_v57  ;;  %1492 = vmatprep.subr.bf16.mxu1 %v6096_v43  ;;  %v6106_v57 = vld [vmem:[#allocation64_spill] sm:$0xff] }
 0x205   :  { %v4542_v43 = vld [vmem:[#allocation9 + $0x4] ss:$16 sps:$4 sm:$0xff]  }
 0x206   :  { %6107 = vst [vmem:[#allocation93_spill] sm:$0xff] %v4542_v43 }
 0x207   :  { %1452 = vmatpush1.bf16.msra.mxu0 %v6097_v3  ;;  %1493 = vmatpush1.bf16.msra.mxu1 %v6098_v53  ;;  %v6108_v53 = vld [vmem:[#allocation18_spill] sm:$0xff] }
 0x208   :  { %1453 = vmatprep.subr.bf16.mxu0 %v6099_v48  ;;  %1494 = vmatprep.subr.bf16.mxu1 %v6100_v47 }
 0x20b   :  { %1454 = vmatpush1.bf16.msra.mxu0 %v6101_v54  ;;  %1495 = vmatpush1.bf16.msra.mxu1 %v6102_v41  ;;  %v602_v54 = vld [vmem:[%s5709_s6] sm:$0xf]  ;;  %v6109_v41 = vsub.s32 0, %v4356_v56 }
 0x20c   :  { %1455 = vmatprep.subr.bf16.mxu0 %v6103_v52  ;;  %1496 = vmatprep.subr.bf16.mxu1 %v6104_v61  ;;  %v6111_v61 = vsub.s32 1, %v4356_v56 }
 0x20d   :  { %v4551_v47 = vrot.slane %v602_v54, %v6109_v41 }
 0x20e   :  { %v4555_v52 = vrot.slane %v602_v54, %v6111_v61 }
 0x20f   :  { %1456 = vmatpush1.bf16.msra.mxu0 %v6105_v49  ;;  %1497 = vmatpush1.bf16.msra.mxu1 %v6106_v57  ;;  %6110 = vst [vmem:[#allocation18_spill] sm:$0xff] %v4551_v47 }
 0x210   :  { %1532 = vmatprep.subr.bf16.mxu0 %v4542_v43  ;;  %1573 = vmatprep.subr.bf16.mxu1 %v6108_v53  ;;  %6112 = vst [vmem:[#allocation94_spill] sm:$0xff] %v4555_v52  ;;  %v6113_v43 = vsub.s32 2, %v4356_v56 }
 0x212   :  { %v4560_v3 = vrot.slane %v602_v54, %v6113_v43 }
 0x214   :  { %6114 = vst [vmem:[#allocation95_spill] sm:$0xff] %v4560_v3 }
 0x285   :  { %v1247_v49 = vpop.f32.mrb[4].mxu0  ;;  %v1288_v57 = vpop.f32.mrb[36].mxu1 }
 0x286   :  { %v1248_v48 = vadd.f32 %v1247_v49, %v4551_v47  ;;  %v1249_v53 = vpop.f32.mrb[5].mxu0  ;;  %v1290_v59 = vpop.f32.mrb[37].mxu1  ;;  %v1289_v61 = vadd.f32 %v1288_v57, %v4560_v3  ;;  %v4566_v49 = vrot.slane %v602_v54, %v6115_v22 }
 0x287   :  { %v1250_v50 = vadd.f32 %v1249_v53, %v4555_v52  ;;  %v1251_v35 = vpop.f32.mrb[6].mxu0  ;;  %v1292_v31 = vpop.f32.mrb[38].mxu1 }
 0x288   :  { %v1295_v41 = vmul.f32 0.5, %v1248_v48  ;;  %v1252_v29 = vpop.f32.mrb[7].mxu0  ;;  %v1293_v26 = vpop.f32.mrb[39].mxu1  ;;  %6116 = vst [vmem:[#allocation96_spill] sm:$0xff] %v4566_v49  ;;  %v1291_v43 = vadd.f32 %v1290_v59, %v4566_v49  ;;  %v6118_v59 = vld [vmem:[#allocation65_spill] sm:$0xff] }
 0x289   :  { %v1299_v25 = vmul.f32 0.5, %v1250_v50 }
 0x28a   :  { %3447 = vtanh.f32 %v1295_v41  ;;  %v1304_v47 = vmul.f32 0.5, %v1291_v43  ;;  %v6119_v43 = vld [vmem:[#allocation79_spill] sm:$0xff] }
 0x28b   :  { %3449 = vtanh.f32 %v1299_v25 }
 0x28c   :  { %3451 = vtanh.f32 %v1289_v61 }
 0x28d   :  { %3453 = vtanh.f32 %v1304_v47 }
 0x294   :  { %v3448_v21 = vpop.eup %3447 }
 0x295   :  { %v3450_v53 = vpop.eup %3449  ;;  %v1297_v35 = vmul.f32 0.5, %v3448_v21 }
 0x296   :  { %v1301_v31 = vmul.f32 0.5, %v3450_v53  ;;  %v3452_v26 = vpop.eup %3451 }
 0x297   :  { %v1298_v29 = vadd.f32 0.5, %v1297_v35  ;;  %v3454_v56 = vpop.eup %3453  ;;  %v6120_v35 = vld [vmem:[#allocation66_spill] sm:$0xff] }
 0x298   :  { %v1302_v50 = vadd.f32 0.5, %v1301_v31  ;;  %v1306_v22 = vmul.f32 0.5, %v3454_v56  ;;  %v6121_v31 = vld [vmem:[#allocation80_spill] sm:$0xff] }
 0x299   :  { %v1309_v48 = vmul.f32 %v3452_v26, %v1298_v29 }
 0x29a   :  { %v1308_v41 = vmul.f32 0.0, %v1302_v50  ;;  %v1307_v47 = vadd.f32 0.5, %v1306_v22 }
 0x29c   :  { %v4569_v57 = vadd.f32 %v1309_v48, %v1308_v41 }
 0x29e   :  { %6117 = vst [vmem:[#allocation97_spill] sm:$0xff] %v4569_v57  ;;  %3455 = vtanh.f32 %v4569_v57 }
 0x2a5   :  { %v1353_v25 = vpop.f32.mrb[8].mxu0  ;;  %v1394_v54 = vpop.f32.mrb[40].mxu1 }
 0x2a6   :  { %v1401_v61 = vadd.f32 %v1353_v25, %v6118_v59  ;;  %v1403_v49 = vadd.f32 %v1394_v54, %v6119_v43  ;;  %v1355_v21 = vpop.f32.mrb[9].mxu0  ;;  %v1396_v53 = vpop.f32.mrb[41].mxu1 }
 0x2a7   :  { %v1402_v3 = vadd.f32 %v1355_v21, %v6120_v35  ;;  %v1404_v29 = vadd.f32 %v1396_v53, %v6121_v31  ;;  %v1357_v26 = vpop.f32.mrb[10].mxu0  ;;  %v1398_v50 = vpop.f32.mrb[42].mxu1 }
 0x2a8   :  { %v3456_v48 = vpop.eup %3455  ;;  %v1405_v41 = vmul.f32 0.5, %v1401_v61  ;;  %v1358_v57 = vpop.f32.mrb[11].mxu0 }
 0x2a9   :  { %v1399_v52 = vpop.f32.mrb[43].mxu1  ;;  %v1409_v56 = vmul.f32 0.5, %v1402_v3  ;;  %v4576_v18 = vmul.f32 %v3456_v48, %v1307_v47  ;;  %v1414_v22 = vmul.f32 0.5, %v1404_v29  ;;  %v6149_v48 = vld [vmem:[#allocation45_spill] sm:$0xff] }
 0x2aa   :  { %3457 = vtanh.f32 %v1405_v41  ;;  %v6150_v41 = vld [vmem:[#allocation46_spill] sm:$0xff] }
 0x2ab   :  { %6122 = vst [vmem:[#allocation65_spill] sm:$0xff] %v4576_v18  ;;  %3459 = vtanh.f32 %v1409_v56  ;;  %v1424_v25 = vpack.c.bf16 %v4576_v18, %v4576_v18  ;;  %v6151_v56 = vld [vmem:[#allocation47_spill] sm:$0xff] }
 0x2ac   :  { %3461 = vtanh.f32 %v1403_v49  ;;  %v4875_v18 = vld [vmem:[#allocation10 + $0xe8] ss:$16 sps:$4 sm:$0xff]  }
 0x2ad   :  { %1457 = vmatprep.mubr.bf16.mxu0 %v1424_v25  ;;  %1498 = vmatprep.mubr.bf16.mxu1 %v1424_v25  ;;  %3463 = vtanh.f32 %v1414_v22  ;;  %v6152_v25 = vld [vmem:[#allocation48_spill] sm:$0xff]  ;;  %v6153_v22 = vld [vmem:[#allocation49_spill] sm:$0xff] }
 0x2b4   :  { %v3458_v54 = vpop.eup %3457 }
 0x2b5   :  { %v3460_v59 = vpop.eup %3459  ;;  %v1407_v43 = vmul.f32 0.5, %v3458_v54  ;;  %v6154_v54 = vld [vmem:[#allocation50_spill] sm:$0xff] }
 0x2b6   :  { %v1411_v21 = vmul.f32 0.5, %v3460_v59  ;;  %v3462_v57 = vpop.eup %3461  ;;  %v6155_v59 = vld [vmem:[#allocation51_spill] sm:$0xff] }
 0x2b7   :  { %v1408_v61 = vadd.f32 0.5, %v1407_v43  ;;  %v3464_v35 = vpop.eup %3463  ;;  %v6156_v43 = vld [vmem:[#allocation52_spill] sm:$0xff] }
 0x2b8   :  { %v1412_v52 = vadd.f32 0.5, %v1411_v21  ;;  %v1416_v31 = vmul.f32 0.5, %v3464_v35  ;;  %v6157_v21 = vld [vmem:[#allocation53_spill] sm:$0xff]  ;;  %v6163_v35 = vld [vmem:[#allocation59_spill] sm:$0xff] }
 0x2b9   :  { %v1419_v3 = vmul.f32 %v3462_v57, %v1408_v61  ;;  %v6158_v61 = vld [vmem:[#allocation54_spill] sm:$0xff]  ;;  %v6159_v57 = vld [vmem:[#allocation55_spill] sm:$0xff] }
 0x2ba   :  { %v1418_v53 = vmul.f32 %v1412_v52, %v4429_v44  ;;  %v1417_v26 = vadd.f32 0.5, %v1416_v31  ;;  %v6148_v44 = vld [vmem:[#allocation44_spill] sm:$0xff] }
 0x2bb   :  { %v6160_v52 = vld [vmem:[#allocation56_spill] sm:$0xff] }
 0x2bc   :  { %v4581_v47 = vadd.f32 %v1419_v3, %v1418_v53  ;;  %v6161_v3 = vld [vmem:[#allocation57_spill] sm:$0xff]  ;;  %v6162_v53 = vld [vmem:[#allocation58_spill] sm:$0xff]  ;;  %v6164_v31 = vld [vmem:[#allocation60_spill] sm:$0xff] }
 0x2be   :  { %3465 = vtanh.f32 %v4581_v47 }
 0x2c8   :  { %v3466_v49 = vpop.eup %3465 }
 0x2c9   :  { %v1422_v29 = vmul.f32 %v3466_v49, %v1417_v26  ;;  %v6165_v26 = vld [vmem:[#allocation61_spill] sm:$0xff]  ;;  %v6166_v49 = vld [vmem:[#allocation62_spill] sm:$0xff] }
 0x2cb   :  { %v1423_v50 = vpack.c.bf16 %v1422_v29, %v1422_v29  ;;  %v6167_v29 = vld [vmem:[#allocation63_spill] sm:$0xff] }
 0x2cd   :  { %1458 = vmatmul.mubr.bf16.vlgmr.msra.gmra.mrb[12].mxu0 %v1423_v50  ;;  %1499 = vmatmul.mubr.bf16.vlgmr.msra.gmra.mrb[44].mxu1 %v1423_v50 }
 0x2ce   :  { %1533 = vmatpush1.bf16.msra.mxu0 %v4432_v60  ;;  %1574 = vmatpush1.bf16.msra.mxu1 %v4110_v62  ;;  %v4600_v62 = vld [vmem:[#allocation9 + $0x84] ss:$16 sps:$4 sm:$0xff]  }
 0x2cf   :  { %1534 = vmatprep.subr.bf16.mxu0 %v4436_v42  ;;  %1575 = vmatprep.subr.bf16.mxu1 %v4112_v63  ;;  %v4604_v63 = vld [vmem:[#allocation9 + $0x80] ss:$16 sps:$4 sm:$0xff]  }
 0x2d0   :  { %1564 = vmatprep.mubr.bf16.mxu0 %v6060_v51  ;;  %1605 = vmatprep.mubr.bf16.mxu1 %v6060_v51 }
 0x2d2   :  { %1535 = vmatpush1.bf16.msra.mxu0 %v4442_v45  ;;  %1576 = vmatpush1.bf16.msra.mxu1 %v4115_v1  ;;  %v4608_v1 = vld [vmem:[#allocation9 + $0xa4] ss:$16 sps:$4 sm:$0xff]  }
 0x2d3   :  { %1536 = vmatprep.subr.bf16.mxu0 %v4446_v58  ;;  %1577 = vmatprep.subr.bf16.mxu1 %v4117_v2  ;;  %v4612_v2 = vld [vmem:[#allocation9 + $0xa0] ss:$16 sps:$4 sm:$0xff]  }
 0x2d6   :  { %1537 = vmatpush1.bf16.msra.mxu0 %v4450_v55  ;;  %1578 = vmatpush1.bf16.msra.mxu1 %v4122_v4  ;;  %v4616_v4 = vld [vmem:[#allocation9 + $0xc4] ss:$16 sps:$4 sm:$0xff]  }
 0x2d7   :  { %1538 = vmatprep.subr.bf16.mxu0 %v4454_v0  ;;  %1579 = vmatprep.subr.bf16.mxu1 %v4126_v5  ;;  %v4620_v5 = vld [vmem:[#allocation9 + $0xc0] ss:$16 sps:$4 sm:$0xff]  }
 0x2da   :  { %1539 = vmatpush1.bf16.msra.mxu0 %v4458_v46  ;;  %1580 = vmatpush1.bf16.msra.mxu1 %v4129_v6  ;;  %v4624_v6 = vld [vmem:[#allocation9 + $0xe4] ss:$16 sps:$4 sm:$0xff]  }
 0x2db   :  { %1540 = vmatprep.subr.bf16.mxu0 %v4600_v62  ;;  %1581 = vmatprep.subr.bf16.mxu1 %v4133_v7  ;;  %v4628_v7 = vld [vmem:[#allocation9 + $0xe0] ss:$16 sps:$4 sm:$0xff]  }
 0x2de   :  { %1541 = vmatpush1.bf16.msra.mxu0 %v4604_v63  ;;  %1582 = vmatpush1.bf16.msra.mxu1 %v4136_v8  ;;  %v6123_v8 = vld [vmem:[#allocation19_spill] sm:$0xff] }
 0x2df   :  { %1542 = vmatprep.subr.bf16.mxu0 %v4608_v1  ;;  %1583 = vmatprep.subr.bf16.mxu1 %v4139_v9  ;;  %v6124_v9 = vld [vmem:[#allocation20_spill] sm:$0xff] }
 0x2e2   :  { %1543 = vmatpush1.bf16.msra.mxu0 %v4612_v2  ;;  %1584 = vmatpush1.bf16.msra.mxu1 %v4142_v10  ;;  %v6125_v10 = vld [vmem:[#allocation21_spill] sm:$0xff] }
 0x2e3   :  { %1544 = vmatprep.subr.bf16.mxu0 %v4616_v4  ;;  %1585 = vmatprep.subr.bf16.mxu1 %v4146_v11  ;;  %v6126_v11 = vld [vmem:[#allocation22_spill] sm:$0xff] }
 0x2e6   :  { %1545 = vmatpush1.bf16.msra.mxu0 %v4620_v5  ;;  %1586 = vmatpush1.bf16.msra.mxu1 %v4149_v12  ;;  %v6127_v12 = vld [vmem:[#allocation23_spill] sm:$0xff] }
 0x2e7   :  { %1546 = vmatprep.subr.bf16.mxu0 %v4624_v6  ;;  %1587 = vmatprep.subr.bf16.mxu1 %v4152_v13  ;;  %v6128_v13 = vld [vmem:[#allocation24_spill] sm:$0xff] }
 0x2ea   :  { %1547 = vmatpush1.bf16.msra.mxu0 %v4628_v7  ;;  %1588 = vmatpush1.bf16.msra.mxu1 %v4155_v14  ;;  %v6129_v14 = vld [vmem:[#allocation25_spill] sm:$0xff] }
 0x2eb   :  { %1638 = vmatprep.subr.bf16.mxu0 %v4162_v15  ;;  %1679 = vmatprep.subr.bf16.mxu1 %v4164_v16  ;;  %v6130_v15 = vld [vmem:[#allocation26_spill] sm:$0xff]  ;;  %v6131_v16 = vld [vmem:[#allocation27_spill] sm:$0xff] }
 0x2ed   :  { %1565 = vmatmul.mubr.bf16.vlgmr.msra.gmra.mrb[16].mxu0 %v1423_v50  ;;  %1606 = vmatmul.mubr.bf16.vlgmr.msra.gmra.mrb[48].mxu1 %v1423_v50  ;;  %v6168_v50 = vld [vmem:[#allocation64_spill] sm:$0xff] }
 0x2ee   :  { %1639 = vmatpush1.bf16.msra.mxu0 %v4166_v17  ;;  %1680 = vmatpush1.bf16.msra.mxu1 %v4168_v19  ;;  %v6132_v17 = vld [vmem:[#allocation28_spill] sm:$0xff]  ;;  %v6133_v19 = vld [vmem:[#allocation29_spill] sm:$0xff] }
 0x2ef   :  { %1640 = vmatprep.subr.bf16.mxu0 %v4174_v20  ;;  %1681 = vmatprep.subr.bf16.mxu1 %v4176_v23  ;;  %v6134_v20 = vld [vmem:[#allocation30_spill] sm:$0xff]  ;;  %v6135_v23 = vld [vmem:[#allocation31_spill] sm:$0xff] }
 0x2f2   :  { %1641 = vmatpush1.bf16.msra.mxu0 %v4178_v24  ;;  %1682 = vmatpush1.bf16.msra.mxu1 %v4180_v27  ;;  %v6136_v24 = vld [vmem:[#allocation32_spill] sm:$0xff]  ;;  %v6137_v27 = vld [vmem:[#allocation33_spill] sm:$0xff] }
 0x2f3   :  { %1642 = vmatprep.subr.bf16.mxu0 %v4186_v28  ;;  %1683 = vmatprep.subr.bf16.mxu1 %v4188_v30  ;;  %v6138_v28 = vld [vmem:[#allocation34_spill] sm:$0xff]  ;;  %v6139_v30 = vld [vmem:[#allocation35_spill] sm:$0xff]  ;;  %6195 = vst [vmem:[#allocation32_spill] sm:$0xff] %v4875_v18 }
 0x2f6   :  { %1643 = vmatpush1.bf16.msra.mxu0 %v4190_v32  ;;  %1684 = vmatpush1.bf16.msra.mxu1 %v4192_v33  ;;  %v6140_v32 = vld [vmem:[#allocation36_spill] sm:$0xff]  ;;  %v6141_v33 = vld [vmem:[#allocation37_spill] sm:$0xff] }
 0x2f7   :  { %1644 = vmatprep.subr.bf16.mxu0 %v4198_v34  ;;  %1685 = vmatprep.subr.bf16.mxu1 %v4200_v36  ;;  %v6142_v34 = vld [vmem:[#allocation38_spill] sm:$0xff]  ;;  %v6143_v36 = vld [vmem:[#allocation39_spill] sm:$0xff] }
 0x2fa   :  { %1645 = vmatpush1.bf16.msra.mxu0 %v4202_v37  ;;  %1686 = vmatpush1.bf16.msra.mxu1 %v4204_v38  ;;  %v6144_v37 = vld [vmem:[#allocation40_spill] sm:$0xff]  ;;  %v6145_v38 = vld [vmem:[#allocation41_spill] sm:$0xff] }
 0x2fb   :  { %1646 = vmatprep.subr.bf16.mxu0 %v4210_v39  ;;  %1687 = vmatprep.subr.bf16.mxu1 %v4212_v40  ;;  %v6146_v39 = vld [vmem:[#allocation42_spill] sm:$0xff]  ;;  %v6147_v40 = vld [vmem:[#allocation43_spill] sm:$0xff] }
 0x2fe   :  { %1647 = vmatpush1.bf16.msra.mxu0 %v6123_v8  ;;  %1688 = vmatpush1.bf16.msra.mxu1 %v6124_v9  ;;  %v6169_v8 = vld [vmem:[#allocation93_spill] sm:$0xff] }
 0x2ff   :  { %1648 = vmatprep.subr.bf16.mxu0 %v6125_v10  ;;  %1689 = vmatprep.subr.bf16.mxu1 %v6126_v11  ;;  %v4697_v9 = vld [vmem:[#allocation9 + $0xc] ss:$16 sps:$4 sm:$0xff]  }
 0x300   :  { %6170 = vst [vmem:[#allocation79_spill] sm:$0xff] %v4697_v9 }
 0x302   :  { %1649 = vmatpush1.bf16.msra.mxu0 %v6127_v12  ;;  %1690 = vmatpush1.bf16.msra.mxu1 %v6128_v13  ;;  %v6171_v12 = vld [vmem:[#allocation18_spill] sm:$0xff] }
 0x303   :  { %1650 = vmatprep.subr.bf16.mxu0 %v6129_v14  ;;  %1691 = vmatprep.subr.bf16.mxu1 %v6130_v15 }
 0x306   :  { %1651 = vmatpush1.bf16.msra.mxu0 %v6131_v16  ;;  %1692 = vmatpush1.bf16.msra.mxu1 %v6132_v17  ;;  %v6172_v16 = vld [vmem:[#allocation94_spill] sm:$0xff] }
 0x307   :  { %1652 = vmatprep.subr.bf16.mxu0 %v6133_v19  ;;  %1693 = vmatprep.subr.bf16.mxu1 %v6134_v20 }
 0x30a   :  { %1653 = vmatpush1.bf16.msra.mxu0 %v6135_v23  ;;  %1694 = vmatpush1.bf16.msra.mxu1 %v6136_v24 }
 0x30b   :  { %1654 = vmatprep.subr.bf16.mxu0 %v6137_v27  ;;  %1695 = vmatprep.subr.bf16.mxu1 %v6138_v28 }
 0x30e   :  { %1655 = vmatpush1.bf16.msra.mxu0 %v6139_v30  ;;  %1696 = vmatpush1.bf16.msra.mxu1 %v6140_v32  ;;  %v6173_v30 = vld [vmem:[#allocation95_spill] sm:$0xff] }
 0x30f   :  { %1656 = vmatprep.subr.bf16.mxu0 %v6141_v33  ;;  %1697 = vmatprep.subr.bf16.mxu1 %v6142_v34  ;;  %v6174_v33 = vld [vmem:[#allocation96_spill] sm:$0xff] }
 0x312   :  { %1657 = vmatpush1.bf16.msra.mxu0 %v6143_v36  ;;  %1698 = vmatpush1.bf16.msra.mxu1 %v6144_v37 }
 0x313   :  { %1658 = vmatprep.subr.bf16.mxu0 %v6145_v38  ;;  %1699 = vmatprep.subr.bf16.mxu1 %v6146_v39 }
 0x316   :  { %1659 = vmatpush1.bf16.msra.mxu0 %v6147_v40  ;;  %1700 = vmatpush1.bf16.msra.mxu1 %v6148_v44 }
 0x317   :  { %1660 = vmatprep.subr.bf16.mxu0 %v6149_v48  ;;  %1701 = vmatprep.subr.bf16.mxu1 %v6150_v41 }
 0x31a   :  { %1661 = vmatpush1.bf16.msra.mxu0 %v6151_v56  ;;  %1702 = vmatpush1.bf16.msra.mxu1 %v6152_v25  ;;  %v6175_v25 = vld [vmem:[#allocation97_spill] sm:$0xff] }
 0x31b   :  { %1662 = vmatprep.subr.bf16.mxu0 %v6153_v22  ;;  %1703 = vmatprep.subr.bf16.mxu1 %v6154_v54 }
 0x31e   :  { %1663 = vmatpush1.bf16.msra.mxu0 %v6155_v59  ;;  %1704 = vmatpush1.bf16.msra.mxu1 %v6156_v43 }
 0x31f   :  { %1664 = vmatprep.subr.bf16.mxu0 %v6157_v21  ;;  %1705 = vmatprep.subr.bf16.mxu1 %v6158_v61 }
 0x322   :  { %1665 = vmatpush1.bf16.msra.mxu0 %v6159_v57  ;;  %1706 = vmatpush1.bf16.msra.mxu1 %v6160_v52  ;;  %v6176_v57 = vld [vmem:[#allocation67_spill] sm:$0xff] }
 0x323   :  { %1666 = vmatprep.subr.bf16.mxu0 %v6161_v3  ;;  %1707 = vmatprep.subr.bf16.mxu1 %v6162_v53  ;;  %v6177_v3 = vld [vmem:[#allocation81_spill] sm:$0xff] }
 0x326   :  { %1667 = vmatpush1.bf16.msra.mxu0 %v6163_v35  ;;  %1708 = vmatpush1.bf16.msra.mxu1 %v6164_v31 }
 0x327   :  { %1668 = vmatprep.subr.bf16.mxu0 %v6165_v26  ;;  %1709 = vmatprep.subr.bf16.mxu1 %v6166_v49  ;;  %v6178_v49 = vld [vmem:[#allocation68_spill] sm:$0xff] }
 0x32a   :  { %1669 = vmatpush1.bf16.msra.mxu0 %v6167_v29  ;;  %1710 = vmatpush1.bf16.msra.mxu1 %v6168_v50  ;;  %v6179_v50 = vld [vmem:[#allocation82_spill] sm:$0xff] }
 0x32b   :  { %1745 = vmatprep.subr.bf16.mxu0 %v6169_v8  ;;  %1786 = vmatprep.subr.bf16.mxu1 %v4697_v9 }
 0x3a0   :  { %v1459_v10 = vpop.f32.mrb[12].mxu0  ;;  %v1500_v11 = vpop.f32.mrb[44].mxu1 }
 0x3a1   :  { %v1460_v13 = vadd.f32 %v1459_v10, %v6171_v12  ;;  %v1461_v14 = vpop.f32.mrb[13].mxu0  ;;  %v1502_v15 = vpop.f32.mrb[45].mxu1  ;;  %v1501_v32 = vadd.f32 %v1500_v11, %v6173_v30 }
 0x3a2   :  { %v1462_v17 = vadd.f32 %v1461_v14, %v6172_v16  ;;  %v1463_v19 = vpop.f32.mrb[14].mxu0  ;;  %v1504_v20 = vpop.f32.mrb[46].mxu1  ;;  %v1503_v34 = vadd.f32 %v1502_v15, %v6174_v33 }
 0x3a3   :  { %v1507_v23 = vmul.f32 0.5, %v1460_v13  ;;  %v1464_v24 = vpop.f32.mrb[15].mxu0  ;;  %v1505_v27 = vpop.f32.mrb[47].mxu1 }
 0x3a4   :  { %v1511_v28 = vmul.f32 0.5, %v1462_v17  ;;  %v1516_v36 = vmul.f32 0.5, %v1503_v34 }
 0x3a5   :  { %3467 = vtanh.f32 %v1507_v23 }
 0x3a6   :  { %3469 = vtanh.f32 %v1511_v28 }
 0x3a7   :  { %3471 = vtanh.f32 %v1501_v32 }
 0x3a8   :  { %3473 = vtanh.f32 %v1516_v36 }
 0x3af   :  { %v3468_v37 = vpop.eup %3467 }
 0x3b0   :  { %v3470_v38 = vpop.eup %3469  ;;  %v1509_v39 = vmul.f32 0.5, %v3468_v37 }
 0x3b1   :  { %v1513_v40 = vmul.f32 0.5, %v3470_v38  ;;  %v3472_v48 = vpop.eup %3471 }
 0x3b2   :  { %v1510_v44 = vadd.f32 0.5, %v1509_v39  ;;  %v3474_v59 = vpop.eup %3473 }
 0x3b3   :  { %v1514_v41 = vadd.f32 0.5, %v1513_v40  ;;  %v1518_v43 = vmul.f32 0.5, %v3474_v59 }
 0x3b4   :  { %v1521_v56 = vmul.f32 %v3472_v48, %v1510_v44 }
 0x3b5   :  { %v1520_v22 = vmul.f32 %v1514_v41, %v6175_v25  ;;  %v1519_v26 = vadd.f32 0.5, %v1518_v43 }
 0x3b7   :  { %v4705_v54 = vadd.f32 %v1521_v56, %v1520_v22 }
 0x3b9   :  { %3475 = vtanh.f32 %v4705_v54 }
 0x3c0   :  { %v1566_v21 = vpop.f32.mrb[16].mxu0  ;;  %v1607_v61 = vpop.f32.mrb[48].mxu1 }
 0x3c1   :  { %v1614_v52 = vadd.f32 %v1566_v21, %v6176_v57  ;;  %v1616_v53 = vadd.f32 %v1607_v61, %v6177_v3  ;;  %v1568_v35 = vpop.f32.mrb[17].mxu0  ;;  %v1609_v31 = vpop.f32.mrb[49].mxu1  ;;  %v4721_v21 = vld [vmem:[#allocation9 + $0x8] ss:$16 sps:$4 sm:$0xff]   ;;  %v4743_v57 = vld [vmem:[#allocation9 + $0x6c] ss:$16 sps:$4 sm:$0xff]  }
 0x3c2   :  { %v1615_v29 = vadd.f32 %v1568_v35, %v6178_v49  ;;  %v1617_v10 = vadd.f32 %v1609_v31, %v6179_v50  ;;  %v1570_v11 = vpop.f32.mrb[18].mxu0  ;;  %v1611_v13 = vpop.f32.mrb[50].mxu1  ;;  %v4731_v61 = vld [vmem:[#allocation9 + $0x28] ss:$16 sps:$4 sm:$0xff]   ;;  %v4782_v31 = vld [vmem:[#allocation10 + $0x4] ss:$16 sps:$4 sm:$0xff]  }
 0x3c3   :  { %v3476_v14 = vpop.eup %3475  ;;  %v1618_v15 = vmul.f32 0.5, %v1614_v52  ;;  %v1571_v17 = vpop.f32.mrb[19].mxu0  ;;  %v4767_v52 = vld [vmem:[#allocation9 + $0xcc] ss:$16 sps:$4 sm:$0xff]   ;;  %v4771_v3 = vld [vmem:[#allocation9 + $0xc8] ss:$16 sps:$4 sm:$0xff]  }
 0x3c4   :  { %v1612_v19 = vpop.f32.mrb[51].mxu1  ;;  %v1622_v20 = vmul.f32 0.5, %v1615_v29  ;;  %v4712_v23 = vmul.f32 %v3476_v14, %v1519_v26  ;;  %v1627_v27 = vmul.f32 0.5, %v1617_v10  ;;  %v4779_v35 = vld [vmem:[#allocation9 + $0xe8] ss:$16 sps:$4 sm:$0xff]  }
 0x3c5   :  { %3477 = vtanh.f32 %v1618_v15  ;;  %v4785_v26 = vld [vmem:[#allocation10 + $0xc] ss:$16 sps:$4 sm:$0xff]   ;;  %v4788_v49 = vld [vmem:[#allocation10] ss:$16 sps:$4 sm:$0xff]   ;;  %v4791_v29 = vld [vmem:[#allocation10 + $0x8] ss:$16 sps:$4 sm:$0xff]  }
 0x3c6   :  { %6180 = vst [vmem:[#allocation66_spill] sm:$0xff] %v4712_v23  ;;  %3479 = vtanh.f32 %v1622_v20  ;;  %v1637_v24 = vpack.c.bf16 %v4712_v23, %v4712_v23  ;;  %v4794_v50 = vld [vmem:[#allocation10 + $0x24] ss:$16 sps:$4 sm:$0xff]   ;;  %v4797_v10 = vld [vmem:[#allocation10 + $0x2c] ss:$16 sps:$4 sm:$0xff]  }
 0x3c7   :  { %3481 = vtanh.f32 %v1616_v53  ;;  %v4775_v53 = vld [vmem:[#allocation9 + $0xec] ss:$16 sps:$4 sm:$0xff]   ;;  %v4800_v11 = vld [vmem:[#allocation10 + $0x20] ss:$16 sps:$4 sm:$0xff]   ;;  %v4803_v13 = vld [vmem:[#allocation10 + $0x28] ss:$16 sps:$4 sm:$0xff]  }
 0x3c8   :  { %1670 = vmatprep.mubr.bf16.mxu0 %v1637_v24  ;;  %1711 = vmatprep.mubr.bf16.mxu1 %v1637_v24  ;;  %3483 = vtanh.f32 %v1627_v27  ;;  %v4806_v14 = vld [vmem:[#allocation10 + $0x44] ss:$16 sps:$4 sm:$0xff]   ;;  %v4809_v15 = vld [vmem:[#allocation10 + $0x4c] ss:$16 sps:$4 sm:$0xff]   ;;  %v4812_v17 = vld [vmem:[#allocation10 + $0x40] ss:$16 sps:$4 sm:$0xff]  }
 0x3c9   :  { %v4815_v19 = vld [vmem:[#allocation10 + $0x48] ss:$16 sps:$4 sm:$0xff]   ;;  %v4818_v20 = vld [vmem:[#allocation10 + $0x64] ss:$16 sps:$4 sm:$0xff]   ;;  %v4821_v24 = vld [vmem:[#allocation10 + $0x6c] ss:$16 sps:$4 sm:$0xff]  }
 0x3ca   :  { %v4824_v27 = vld [vmem:[#allocation10 + $0x60] ss:$16 sps:$4 sm:$0xff]  }
 0x3cb   :  { %v4872_v23 = vld [vmem:[#allocation10 + $0xe0] ss:$16 sps:$4 sm:$0xff]  }
 0x3cc   :  { %6194 = vst [vmem:[#allocation31_spill] sm:$0xff] %v4872_v23 }
 0x3cf   :  { %v3478_v28 = vpop.eup %3477 }
 0x3d0   :  { %v3480_v32 = vpop.eup %3479  ;;  %v1620_v34 = vmul.f32 0.5, %v3478_v28  ;;  %v4827_v28 = vld [vmem:[#allocation10 + $0x68] ss:$16 sps:$4 sm:$0xff]  }
 0x3d1   :  { %v1624_v36 = vmul.f32 0.5, %v3480_v32  ;;  %v3482_v38 = vpop.eup %3481  ;;  %v4830_v32 = vld [vmem:[#allocation10 + $0x84] ss:$16 sps:$4 sm:$0xff]  }
 0x3d2   :  { %v1621_v37 = vadd.f32 0.5, %v1620_v34  ;;  %v3484_v41 = vpop.eup %3483  ;;  %v4833_v34 = vld [vmem:[#allocation10 + $0x8c] ss:$16 sps:$4 sm:$0xff]  }
 0x3d3   :  { %v1625_v39 = vadd.f32 0.5, %v1624_v36  ;;  %v1629_v56 = vmul.f32 0.5, %v3484_v41  ;;  %6181 = vst [vmem:[#allocation80_spill] sm:$0xff] %v4833_v34  ;;  %v4836_v36 = vld [vmem:[#allocation10 + $0x80] ss:$16 sps:$4 sm:$0xff]  }
 0x3d4   :  { %v1632_v40 = vmul.f32 %v3482_v38, %v1621_v37  ;;  %6182 = vst [vmem:[#allocation19_spill] sm:$0xff] %v4836_v36  ;;  %v4839_v37 = vld [vmem:[#allocation10 + $0x88] ss:$16 sps:$4 sm:$0xff]   ;;  %v4842_v38 = vld [vmem:[#allocation10 + $0xa4] ss:$16 sps:$4 sm:$0xff]  }
 0x3d5   :  { %v1631_v44 = vmul.f32 %v1625_v39, %v4581_v47  ;;  %v1630_v25 = vadd.f32 0.5, %v1629_v56  ;;  %v4725_v47 = vld [vmem:[#allocation9 + $0x2c] ss:$16 sps:$4 sm:$0xff]   ;;  %6183 = vst [vmem:[#allocation20_spill] sm:$0xff] %v4839_v37  ;;  %6184 = vst [vmem:[#allocation21_spill] sm:$0xff] %v4842_v38 }
 0x3d6   :  { %v4845_v39 = vld [vmem:[#allocation10 + $0xac] ss:$16 sps:$4 sm:$0xff]   ;;  %v4854_v41 = vld [vmem:[#allocation10 + $0xc4] ss:$16 sps:$4 sm:$0xff]  }
 0x3d7   :  { %v4717_v48 = vadd.f32 %v1632_v40, %v1631_v44  ;;  %6185 = vst [vmem:[#allocation22_spill] sm:$0xff] %v4845_v39  ;;  %v4848_v40 = vld [vmem:[#allocation10 + $0xa0] ss:$16 sps:$4 sm:$0xff]   ;;  %v4851_v44 = vld [vmem:[#allocation10 + $0xa8] ss:$16 sps:$4 sm:$0xff]   ;;  %6188 = vst [vmem:[#allocation25_spill] sm:$0xff] %v4854_v41 }
 0x3d8   :  { %6186 = vst [vmem:[#allocation23_spill] sm:$0xff] %v4848_v40  ;;  %6187 = vst [vmem:[#allocation24_spill] sm:$0xff] %v4851_v44  ;;  %v4857_v56 = vld [vmem:[#allocation10 + $0xcc] ss:$16 sps:$4 sm:$0xff]  }
 0x3d9   :  { %3485 = vtanh.f32 %v4717_v48  ;;  %6189 = vst [vmem:[#allocation26_spill] sm:$0xff] %v4857_v56 }
 0x3e3   :  { %v3486_v22 = vpop.eup %3485 }
 0x3e4   :  { %v1635_v59 = vmul.f32 %v3486_v22, %v1630_v25  ;;  %v4860_v25 = vld [vmem:[#allocation10 + $0xc0] ss:$16 sps:$4 sm:$0xff]   ;;  %v4863_v22 = vld [vmem:[#allocation10 + $0xc8] ss:$16 sps:$4 sm:$0xff]  }
 0x3e5   :  { %6190 = vst [vmem:[#allocation27_spill] sm:$0xff] %v4860_v25  ;;  %6191 = vst [vmem:[#allocation28_spill] sm:$0xff] %v4863_v22 }
 0x3e6   :  { %v1636_v43 = vpack.c.bf16 %v1635_v59, %v1635_v59  ;;  %v4866_v59 = vld [vmem:[#allocation10 + $0xe4] ss:$16 sps:$4 sm:$0xff]  }
 0x3e7   :  { %6192 = vst [vmem:[#allocation29_spill] sm:$0xff] %v4866_v59 }
 0x3e8   :  { %1671 = vmatmul.mubr.bf16.vlgmr.msra.gmra.mrb[20].mxu0 %v1636_v43  ;;  %1712 = vmatmul.mubr.bf16.vlgmr.msra.gmra.mrb[52].mxu1 %v1636_v43 }
 0x3e9   :  { %1746 = vmatpush1.bf16.msra.mxu0 %v4432_v60  ;;  %1787 = vmatpush1.bf16.msra.mxu1 %v4721_v21  ;;  %v4735_v60 = vld [vmem:[#allocation9 + $0x4c] ss:$16 sps:$4 sm:$0xff]  }
 0x3ea   :  { %1747 = vmatprep.subr.bf16.mxu0 %v4436_v42  ;;  %1788 = vmatprep.subr.bf16.mxu1 %v4725_v47  ;;  %v4739_v42 = vld [vmem:[#allocation9 + $0x48] ss:$16 sps:$4 sm:$0xff]  }
 0x3eb   :  { %1777 = vmatprep.mubr.bf16.mxu0 %v6060_v51  ;;  %1818 = vmatprep.mubr.bf16.mxu1 %v6060_v51 }
 0x3ed   :  { %1748 = vmatpush1.bf16.msra.mxu0 %v4442_v45  ;;  %1789 = vmatpush1.bf16.msra.mxu1 %v4731_v61  ;;  %v4747_v45 = vld [vmem:[#allocation9 + $0x68] ss:$16 sps:$4 sm:$0xff]  }
 0x3ee   :  { %1749 = vmatprep.subr.bf16.mxu0 %v4446_v58  ;;  %1790 = vmatprep.subr.bf16.mxu1 %v4735_v60  ;;  %v4751_v58 = vld [vmem:[#allocation9 + $0x8c] ss:$16 sps:$4 sm:$0xff]  }
 0x3f1   :  { %1750 = vmatpush1.bf16.msra.mxu0 %v4450_v55  ;;  %1791 = vmatpush1.bf16.msra.mxu1 %v4739_v42  ;;  %v4755_v55 = vld [vmem:[#allocation9 + $0x88] ss:$16 sps:$4 sm:$0xff]  }
 0x3f2   :  { %1751 = vmatprep.subr.bf16.mxu0 %v4454_v0  ;;  %1792 = vmatprep.subr.bf16.mxu1 %v4743_v57  ;;  %v4759_v0 = vld [vmem:[#allocation9 + $0xac] ss:$16 sps:$4 sm:$0xff]  }
 0x3f5   :  { %1752 = vmatpush1.bf16.msra.mxu0 %v4458_v46  ;;  %1793 = vmatpush1.bf16.msra.mxu1 %v4747_v45  ;;  %v4763_v46 = vld [vmem:[#allocation9 + $0xa8] ss:$16 sps:$4 sm:$0xff]  }
 0x3f6   :  { %1753 = vmatprep.subr.bf16.mxu0 %v4600_v62  ;;  %1794 = vmatprep.subr.bf16.mxu1 %v4751_v58 }
 0x3f9   :  { %1754 = vmatpush1.bf16.msra.mxu0 %v4604_v63  ;;  %1795 = vmatpush1.bf16.msra.mxu1 %v4755_v55 }
 0x3fa   :  { %1755 = vmatprep.subr.bf16.mxu0 %v4608_v1  ;;  %1796 = vmatprep.subr.bf16.mxu1 %v4759_v0 }
 0x3fd   :  { %1756 = vmatpush1.bf16.msra.mxu0 %v4612_v2  ;;  %1797 = vmatpush1.bf16.msra.mxu1 %v4763_v46 }
 0x3fe   :  { %1757 = vmatprep.subr.bf16.mxu0 %v4616_v4  ;;  %1798 = vmatprep.subr.bf16.mxu1 %v4767_v52 }
 0x401   :  { %1758 = vmatpush1.bf16.msra.mxu0 %v4620_v5  ;;  %1799 = vmatpush1.bf16.msra.mxu1 %v4771_v3 }
 0x402   :  { %1759 = vmatprep.subr.bf16.mxu0 %v4624_v6  ;;  %1800 = vmatprep.subr.bf16.mxu1 %v4775_v53 }
 0x405   :  { %1760 = vmatpush1.bf16.msra.mxu0 %v4628_v7  ;;  %1801 = vmatpush1.bf16.msra.mxu1 %v4779_v35 }
 0x406   :  { %1851 = vmatprep.subr.bf16.mxu0 %v4782_v31  ;;  %1892 = vmatprep.subr.bf16.mxu1 %v4785_v26 }
 0x408   :  { %1778 = vmatmul.mubr.bf16.vlgmr.msra.gmra.mrb[24].mxu0 %v1636_v43  ;;  %1819 = vmatmul.mubr.bf16.vlgmr.msra.gmra.mrb[56].mxu1 %v1636_v43  ;;  %v4869_v43 = vld [vmem:[#allocation10 + $0xec] ss:$16 sps:$4 sm:$0xff]  }
 0x409   :  { %1852 = vmatpush1.bf16.msra.mxu0 %v4788_v49  ;;  %1893 = vmatpush1.bf16.msra.mxu1 %v4791_v29  ;;  %6193 = vst [vmem:[#allocation30_spill] sm:$0xff] %v4869_v43 }
 0x40a   :  { %1853 = vmatprep.subr.bf16.mxu0 %v4794_v50  ;;  %1894 = vmatprep.subr.bf16.mxu1 %v4797_v10 }
 0x40d   :  { %1854 = vmatpush1.bf16.msra.mxu0 %v4800_v11  ;;  %1895 = vmatpush1.bf16.msra.mxu1 %v4803_v13 }
 0x40e   :  { %1855 = vmatprep.subr.bf16.mxu0 %v4806_v14  ;;  %1896 = vmatprep.subr.bf16.mxu1 %v4809_v15 }
 0x411   :  { %1856 = vmatpush1.bf16.msra.mxu0 %v4812_v17  ;;  %1897 = vmatpush1.bf16.msra.mxu1 %v4815_v19 }
 0x412   :  { %1857 = vmatprep.subr.bf16.mxu0 %v4818_v20  ;;  %1898 = vmatprep.subr.bf16.mxu1 %v4821_v24 }
 0x415   :  { %1858 = vmatpush1.bf16.msra.mxu0 %v4824_v27  ;;  %1899 = vmatpush1.bf16.msra.mxu1 %v4827_v28 }
 0x416   :  { %1859 = vmatprep.subr.bf16.mxu0 %v4830_v32  ;;  %1900 = vmatprep.subr.bf16.mxu1 %v4833_v34 }
 0x419   :  { %1860 = vmatpush1.bf16.msra.mxu0 %v4836_v36  ;;  %1901 = vmatpush1.bf16.msra.mxu1 %v4839_v37 }
 0x41a   :  { %1861 = vmatprep.subr.bf16.mxu0 %v4842_v38  ;;  %1902 = vmatprep.subr.bf16.mxu1 %v4845_v39 }
 0x41d   :  { %1862 = vmatpush1.bf16.msra.mxu0 %v4848_v40  ;;  %1903 = vmatpush1.bf16.msra.mxu1 %v4851_v44 }
 0x41e   :  { %1863 = vmatprep.subr.bf16.mxu0 %v4854_v41  ;;  %1904 = vmatprep.subr.bf16.mxu1 %v4857_v56 }
 0x421   :  { %1864 = vmatpush1.bf16.msra.mxu0 %v4860_v25  ;;  %1905 = vmatpush1.bf16.msra.mxu1 %v4863_v22  ;;  %v4878_v25 = vld [vmem:[#allocation10 + $0x104] ss:$16 sps:$4 sm:$0xff]   ;;  %v4881_v22 = vld [vmem:[#allocation10 + $0x10c] ss:$16 sps:$4 sm:$0xff]  }
 0x422   :  { %1865 = vmatprep.subr.bf16.mxu0 %v4866_v59  ;;  %1906 = vmatprep.subr.bf16.mxu1 %v4869_v43  ;;  %6196 = vst [vmem:[#allocation33_spill] sm:$0xff] %v4878_v25  ;;  %6197 = vst [vmem:[#allocation34_spill] sm:$0xff] %v4881_v22  ;;  %v4884_v59 = vld [vmem:[#allocation10 + $0x100] ss:$16 sps:$4 sm:$0xff]   ;;  %v4887_v43 = vld [vmem:[#allocation10 + $0x108] ss:$16 sps:$4 sm:$0xff]  }
 0x423   :  { %6198 = vst [vmem:[#allocation35_spill] sm:$0xff] %v4884_v59  ;;  %6199 = vst [vmem:[#allocation36_spill] sm:$0xff] %v4887_v43 }
 0x425   :  { %1866 = vmatpush1.bf16.msra.mxu0 %v4872_v23  ;;  %1907 = vmatpush1.bf16.msra.mxu1 %v4875_v18  ;;  %v4890_v23 = vld [vmem:[#allocation10 + $0x124] ss:$16 sps:$4 sm:$0xff]   ;;  %v4893_v18 = vld [vmem:[#allocation10 + $0x12c] ss:$16 sps:$4 sm:$0xff]  }
 0x426   :  { %1867 = vmatprep.subr.bf16.mxu0 %v4878_v25  ;;  %1908 = vmatprep.subr.bf16.mxu1 %v4881_v22  ;;  %6200 = vst [vmem:[#allocation37_spill] sm:$0xff] %v4890_v23  ;;  %6201 = vst [vmem:[#allocation38_spill] sm:$0xff] %v4893_v18  ;;  %v4896_v25 = vld [vmem:[#allocation10 + $0x120] ss:$16 sps:$4 sm:$0xff]   ;;  %v4899_v22 = vld [vmem:[#allocation10 + $0x128] ss:$16 sps:$4 sm:$0xff]  }
 0x427   :  { %6202 = vst [vmem:[#allocation39_spill] sm:$0xff] %v4896_v25  ;;  %6203 = vst [vmem:[#allocation40_spill] sm:$0xff] %v4899_v22 }
 0x429   :  { %1868 = vmatpush1.bf16.msra.mxu0 %v4884_v59  ;;  %1909 = vmatpush1.bf16.msra.mxu1 %v4887_v43  ;;  %v4902_v59 = vld [vmem:[#allocation10 + $0x144] ss:$16 sps:$4 sm:$0xff]   ;;  %v4905_v43 = vld [vmem:[#allocation10 + $0x14c] ss:$16 sps:$4 sm:$0xff]  }
 0x42a   :  { %1869 = vmatprep.subr.bf16.mxu0 %v4890_v23  ;;  %1910 = vmatprep.subr.bf16.mxu1 %v4893_v18  ;;  %6204 = vst [vmem:[#allocation41_spill] sm:$0xff] %v4902_v59  ;;  %6205 = vst [vmem:[#allocation42_spill] sm:$0xff] %v4905_v43  ;;  %v4908_v23 = vld [vmem:[#allocation10 + $0x140] ss:$16 sps:$4 sm:$0xff]   ;;  %v4911_v18 = vld [vmem:[#allocation10 + $0x148] ss:$16 sps:$4 sm:$0xff]  }
 0x42b   :  { %6206 = vst [vmem:[#allocation43_spill] sm:$0xff] %v4908_v23  ;;  %6207 = vst [vmem:[#allocation44_spill] sm:$0xff] %v4911_v18 }
 0x42d   :  { %1870 = vmatpush1.bf16.msra.mxu0 %v4896_v25  ;;  %1911 = vmatpush1.bf16.msra.mxu1 %v4899_v22  ;;  %v4914_v25 = vld [vmem:[#allocation10 + $0x164] ss:$16 sps:$4 sm:$0xff]   ;;  %v4917_v22 = vld [vmem:[#allocation10 + $0x16c] ss:$16 sps:$4 sm:$0xff]  }
 0x42e   :  { %1871 = vmatprep.subr.bf16.mxu0 %v4902_v59  ;;  %1912 = vmatprep.subr.bf16.mxu1 %v4905_v43  ;;  %6208 = vst [vmem:[#allocation45_spill] sm:$0xff] %v4914_v25  ;;  %6209 = vst [vmem:[#allocation46_spill] sm:$0xff] %v4917_v22  ;;  %v4920_v59 = vld [vmem:[#allocation10 + $0x160] ss:$16 sps:$4 sm:$0xff]   ;;  %v4923_v43 = vld [vmem:[#allocation10 + $0x168] ss:$16 sps:$4 sm:$0xff]  }
 0x42f   :  { %6210 = vst [vmem:[#allocation47_spill] sm:$0xff] %v4920_v59  ;;  %6211 = vst [vmem:[#allocation48_spill] sm:$0xff] %v4923_v43 }
 0x431   :  { %1872 = vmatpush1.bf16.msra.mxu0 %v4908_v23  ;;  %1913 = vmatpush1.bf16.msra.mxu1 %v4911_v18  ;;  %v4926_v23 = vld [vmem:[#allocation10 + $0x184] ss:$16 sps:$4 sm:$0xff]   ;;  %v4929_v18 = vld [vmem:[#allocation10 + $0x18c] ss:$16 sps:$4 sm:$0xff]  }
 0x432   :  { %1873 = vmatprep.subr.bf16.mxu0 %v4914_v25  ;;  %1914 = vmatprep.subr.bf16.mxu1 %v4917_v22  ;;  %6212 = vst [vmem:[#allocation49_spill] sm:$0xff] %v4926_v23  ;;  %6213 = vst [vmem:[#allocation50_spill] sm:$0xff] %v4929_v18  ;;  %v4932_v25 = vld [vmem:[#allocation10 + $0x180] ss:$16 sps:$4 sm:$0xff]   ;;  %v4935_v22 = vld [vmem:[#allocation10 + $0x188] ss:$16 sps:$4 sm:$0xff]  }
 0x433   :  { %6214 = vst [vmem:[#allocation51_spill] sm:$0xff] %v4932_v25  ;;  %6215 = vst [vmem:[#allocation52_spill] sm:$0xff] %v4935_v22 }
 0x435   :  { %1874 = vmatpush1.bf16.msra.mxu0 %v4920_v59  ;;  %1915 = vmatpush1.bf16.msra.mxu1 %v4923_v43  ;;  %v4938_v59 = vld [vmem:[#allocation10 + $0x1a4] ss:$16 sps:$4 sm:$0xff]   ;;  %v4941_v43 = vld [vmem:[#allocation10 + $0x1ac] ss:$16 sps:$4 sm:$0xff]  }
 0x436   :  { %1875 = vmatprep.subr.bf16.mxu0 %v4926_v23  ;;  %1916 = vmatprep.subr.bf16.mxu1 %v4929_v18  ;;  %6216 = vst [vmem:[#allocation53_spill] sm:$0xff] %v4938_v59  ;;  %6217 = vst [vmem:[#allocation54_spill] sm:$0xff] %v4941_v43  ;;  %v4944_v23 = vld [vmem:[#allocation10 + $0x1a0] ss:$16 sps:$4 sm:$0xff]   ;;  %v4947_v18 = vld [vmem:[#allocation10 + $0x1a8] ss:$16 sps:$4 sm:$0xff]  }
 0x437   :  { %6218 = vst [vmem:[#allocation55_spill] sm:$0xff] %v4944_v23  ;;  %6219 = vst [vmem:[#allocation56_spill] sm:$0xff] %v4947_v18 }
 0x439   :  { %1876 = vmatpush1.bf16.msra.mxu0 %v4932_v25  ;;  %1917 = vmatpush1.bf16.msra.mxu1 %v4935_v22  ;;  %v4950_v25 = vld [vmem:[#allocation10 + $0x1c4] ss:$16 sps:$4 sm:$0xff]   ;;  %v4953_v22 = vld [vmem:[#allocation10 + $0x1cc] ss:$16 sps:$4 sm:$0xff]  }
 0x43a   :  { %1877 = vmatprep.subr.bf16.mxu0 %v4938_v59  ;;  %1918 = vmatprep.subr.bf16.mxu1 %v4941_v43  ;;  %6220 = vst [vmem:[#allocation57_spill] sm:$0xff] %v4950_v25  ;;  %6221 = vst [vmem:[#allocation58_spill] sm:$0xff] %v4953_v22  ;;  %v4956_v59 = vld [vmem:[#allocation10 + $0x1c0] ss:$16 sps:$4 sm:$0xff]   ;;  %v4959_v43 = vld [vmem:[#allocation10 + $0x1c8] ss:$16 sps:$4 sm:$0xff]  }
 0x43b   :  { %6222 = vst [vmem:[#allocation59_spill] sm:$0xff] %v4956_v59  ;;  %6223 = vst [vmem:[#allocation60_spill] sm:$0xff] %v4959_v43 }
 0x43d   :  { %1878 = vmatpush1.bf16.msra.mxu0 %v4944_v23  ;;  %1919 = vmatpush1.bf16.msra.mxu1 %v4947_v18  ;;  %v4962_v23 = vld [vmem:[#allocation10 + $0x1e4] ss:$16 sps:$4 sm:$0xff]   ;;  %v4965_v18 = vld [vmem:[#allocation10 + $0x1ec] ss:$16 sps:$4 sm:$0xff]  }
 0x43e   :  { %1879 = vmatprep.subr.bf16.mxu0 %v4950_v25  ;;  %1920 = vmatprep.subr.bf16.mxu1 %v4953_v22  ;;  %6224 = vst [vmem:[#allocation61_spill] sm:$0xff] %v4962_v23  ;;  %6225 = vst [vmem:[#allocation62_spill] sm:$0xff] %v4965_v18  ;;  %v4968_v25 = vld [vmem:[#allocation10 + $0x1e0] ss:$16 sps:$4 sm:$0xff]   ;;  %v4971_v22 = vld [vmem:[#allocation10 + $0x1e8] ss:$16 sps:$4 sm:$0xff]  }
 0x43f   :  { %6226 = vst [vmem:[#allocation63_spill] sm:$0xff] %v4968_v25  ;;  %6227 = vst [vmem:[#allocation64_spill] sm:$0xff] %v4971_v22 }
 0x441   :  { %1880 = vmatpush1.bf16.msra.mxu0 %v4956_v59  ;;  %1921 = vmatpush1.bf16.msra.mxu1 %v4959_v43 }
 0x442   :  { %1881 = vmatprep.subr.bf16.mxu0 %v4962_v23  ;;  %1922 = vmatprep.subr.bf16.mxu1 %v4965_v18 }
 0x445   :  { %1882 = vmatpush1.bf16.msra.mxu0 %v4968_v25  ;;  %1923 = vmatpush1.bf16.msra.mxu1 %v4971_v22 }
 0x446   :  { %1958 = vmatprep.subr.bf16.mxu0 %v6169_v8  ;;  %1999 = vmatprep.subr.bf16.mxu1 %v4697_v9 }
 0x4bb   :  { %v1672_v43 = vpop.f32.mrb[20].mxu0  ;;  %v1713_v59 = vpop.f32.mrb[52].mxu1 }
 0x4bc   :  { %v1673_v23 = vadd.f32 %v1672_v43, %v6171_v12  ;;  %v1674_v56 = vpop.f32.mrb[21].mxu0  ;;  %v1715_v41 = vpop.f32.mrb[53].mxu1  ;;  %v1714_v22 = vadd.f32 %v1713_v59, %v6173_v30 }
 0x4bd   :  { %v1675_v18 = vadd.f32 %v1674_v56, %v6172_v16  ;;  %v1676_v44 = vpop.f32.mrb[22].mxu0  ;;  %v1717_v40 = vpop.f32.mrb[54].mxu1  ;;  %v1716_v8 = vadd.f32 %v1715_v41, %v6174_v33  ;;  %v6231_v33 = vld [vmem:[#allocation70_spill] sm:$0xff] }
 0x4be   :  { %v1720_v39 = vmul.f32 0.5, %v1673_v23  ;;  %v1677_v25 = vpop.f32.mrb[23].mxu0  ;;  %v1718_v38 = vpop.f32.mrb[55].mxu1 }
 0x4bf   :  { %v1724_v37 = vmul.f32 0.5, %v1675_v18  ;;  %v1729_v9 = vmul.f32 0.5, %v1716_v8  ;;  %v6230_v8 = vld [vmem:[#allocation83_spill] sm:$0xff] }
 0x4c0   :  { %3487 = vtanh.f32 %v1720_v39 }
 0x4c1   :  { %3489 = vtanh.f32 %v1724_v37 }
 0x4c2   :  { %3491 = vtanh.f32 %v1714_v22  ;;  %v6229_v22 = vld [vmem:[#allocation69_spill] sm:$0xff] }
 0x4c3   :  { %3493 = vtanh.f32 %v1729_v9 }
 0x4ca   :  { %v3488_v36 = vpop.eup %3487 }
 0x4cb   :  { %v3490_v43 = vpop.eup %3489  ;;  %v1722_v12 = vmul.f32 0.5, %v3488_v36 }
 0x4cc   :  { %v1726_v34 = vmul.f32 0.5, %v3490_v43  ;;  %v3492_v44 = vpop.eup %3491 }
 0x4cd   :  { %v1723_v56 = vadd.f32 0.5, %v1722_v12  ;;  %v3494_v37 = vpop.eup %3493 }
 0x4ce   :  { %v1727_v40 = vadd.f32 0.5, %v1726_v34  ;;  %v1731_v39 = vmul.f32 0.5, %v3494_v37 }
 0x4cf   :  { %v1734_v23 = vmul.f32 %v3492_v44, %v1723_v56  ;;  %v6232_v56 = vld [vmem:[#allocation84_spill] sm:$0xff] }
 0x4d0   :  { %v1733_v38 = vmul.f32 %v1727_v40, %v4705_v54  ;;  %v1732_v12 = vadd.f32 0.5, %v1731_v39 }
 0x4d2   :  { %v4981_v18 = vadd.f32 %v1734_v23, %v1733_v38 }
 0x4d4   :  { %6228 = vst [vmem:[#allocation93_spill] sm:$0xff] %v4981_v18  ;;  %3495 = vtanh.f32 %v4981_v18 }
 0x4db   :  { %v1779_v25 = vpop.f32.mrb[24].mxu0  ;;  %v1820_v41 = vpop.f32.mrb[56].mxu1 }
 0x4dc   :  { %v1827_v59 = vadd.f32 %v1779_v25, %v6229_v22  ;;  %v1829_v36 = vadd.f32 %v1820_v41, %v6230_v8  ;;  %v1781_v43 = vpop.f32.mrb[25].mxu0  ;;  %v1822_v9 = vpop.f32.mrb[57].mxu1 }
 0x4dd   :  { %v1828_v34 = vadd.f32 %v1781_v43, %v6231_v33  ;;  %v1830_v44 = vadd.f32 %v1822_v9, %v6232_v56  ;;  %v1783_v54 = vpop.f32.mrb[26].mxu0  ;;  %v1824_v40 = vpop.f32.mrb[58].mxu1 }
 0x4de   :  { %v3496_v23 = vpop.eup %3495  ;;  %v1831_v38 = vmul.f32 0.5, %v1827_v59  ;;  %v1784_v18 = vpop.f32.mrb[27].mxu0 }
 0x4df   :  { %v1825_v30 = vpop.f32.mrb[59].mxu1  ;;  %v1835_v37 = vmul.f32 0.5, %v1828_v34  ;;  %v4988_v16 = vmul.f32 %v3496_v23, %v1732_v12  ;;  %v1840_v33 = vmul.f32 0.5, %v1830_v44  ;;  %v4996_v23 = vld [vmem:[#allocation9] ss:$16 sps:$4 sm:$0xff]  }
 0x4e0   :  { %3497 = vtanh.f32 %v1831_v38  ;;  %v5000_v38 = vld [vmem:[#allocation9 + $0x24] ss:$16 sps:$4 sm:$0xff]  }
 0x4e1   :  { %6233 = vst [vmem:[#allocation97_spill] sm:$0xff] %v4988_v16  ;;  %3499 = vtanh.f32 %v1835_v37  ;;  %v1850_v25 = vpack.c.bf16 %v4988_v16, %v4988_v16  ;;  %v5010_v37 = vld [vmem:[#allocation9 + $0x44] ss:$16 sps:$4 sm:$0xff]  }
 0x4e2   :  { %3501 = vtanh.f32 %v1829_v36  ;;  %v6256_v16 = vld [vmem:[#allocation40_spill] sm:$0xff] }
 0x4e3   :  { %1883 = vmatprep.mubr.bf16.mxu0 %v1850_v25  ;;  %1924 = vmatprep.mubr.bf16.mxu1 %v1850_v25  ;;  %3503 = vtanh.f32 %v1840_v33  ;;  %v5014_v25 = vld [vmem:[#allocation9 + $0x40] ss:$16 sps:$4 sm:$0xff]   ;;  %v5018_v33 = vld [vmem:[#allocation9 + $0x64] ss:$16 sps:$4 sm:$0xff]  }
 0x4ea   :  { %v3498_v39 = vpop.eup %3497 }
 0x4eb   :  { %v3500_v41 = vpop.eup %3499  ;;  %v1833_v22 = vmul.f32 0.5, %v3498_v39  ;;  %v5022_v39 = vld [vmem:[#allocation9 + $0x60] ss:$16 sps:$4 sm:$0xff]  }
 0x4ec   :  { %v1837_v8 = vmul.f32 0.5, %v3500_v41  ;;  %v3502_v18 = vpop.eup %3501  ;;  %v6242_v41 = vld [vmem:[#allocation26_spill] sm:$0xff] }
 0x4ed   :  { %v1834_v59 = vadd.f32 0.5, %v1833_v22  ;;  %v3504_v34 = vpop.eup %3503  ;;  %v6243_v22 = vld [vmem:[#allocation27_spill] sm:$0xff] }
 0x4ee   :  { %v1838_v30 = vadd.f32 0.5, %v1837_v8  ;;  %v1842_v56 = vmul.f32 0.5, %v3504_v34  ;;  %v6244_v8 = vld [vmem:[#allocation28_spill] sm:$0xff]  ;;  %v6250_v34 = vld [vmem:[#allocation34_spill] sm:$0xff] }
 0x4ef   :  { %v1845_v43 = vmul.f32 %v3502_v18, %v1834_v59  ;;  %v6245_v59 = vld [vmem:[#allocation29_spill] sm:$0xff]  ;;  %v6246_v18 = vld [vmem:[#allocation30_spill] sm:$0xff] }
 0x4f0   :  { %v1844_v9 = vmul.f32 %v1838_v30, %v4717_v48  ;;  %v1843_v54 = vadd.f32 0.5, %v1842_v56  ;;  %v5006_v48 = vld [vmem:[#allocation9 + $0x20] ss:$16 sps:$4 sm:$0xff]   ;;  %v6247_v30 = vld [vmem:[#allocation31_spill] sm:$0xff] }
 0x4f1   :  { %v6251_v56 = vld [vmem:[#allocation35_spill] sm:$0xff] }
 0x4f2   :  { %v4993_v12 = vadd.f32 %v1845_v43, %v1844_v9  ;;  %v6248_v43 = vld [vmem:[#allocation32_spill] sm:$0xff]  ;;  %v6249_v9 = vld [vmem:[#allocation33_spill] sm:$0xff] }
 0x4f4   :  { %3505 = vtanh.f32 %v4993_v12 }
 0x4fe   :  { %v3506_v36 = vpop.eup %3505 }
 0x4ff   :  { %v1848_v44 = vmul.f32 %v3506_v36, %v1843_v54  ;;  %v6252_v54 = vld [vmem:[#allocation36_spill] sm:$0xff]  ;;  %v6253_v36 = vld [vmem:[#allocation37_spill] sm:$0xff] }
 0x501   :  { %v1849_v40 = vpack.c.bf16 %v1848_v44, %v1848_v44  ;;  %v6254_v44 = vld [vmem:[#allocation38_spill] sm:$0xff] }
 0x503   :  { %1884 = vmatmul.mubr.bf16.vlgmr.msra.gmra.mrb[28].mxu0 %v1849_v40  ;;  %1925 = vmatmul.mubr.bf16.vlgmr.msra.gmra.mrb[60].mxu1 %v1849_v40 }
 0x504   :  { %1959 = vmatpush1.bf16.msra.mxu0 %v4996_v23  ;;  %2000 = vmatpush1.bf16.msra.mxu1 %v4721_v21 }
 0x505   :  { %1960 = vmatprep.subr.bf16.mxu0 %v5000_v38  ;;  %2001 = vmatprep.subr.bf16.mxu1 %v4725_v47 }
 0x506   :  { %1990 = vmatprep.mubr.bf16.mxu0 %v6060_v51  ;;  %2031 = vmatprep.mubr.bf16.mxu1 %v6060_v51 }
 0x508   :  { %1961 = vmatpush1.bf16.msra.mxu0 %v5006_v48  ;;  %2002 = vmatpush1.bf16.msra.mxu1 %v4731_v61 }
 0x509   :  { %1962 = vmatprep.subr.bf16.mxu0 %v5010_v37  ;;  %2003 = vmatprep.subr.bf16.mxu1 %v4735_v60 }
 0x50c   :  { %1963 = vmatpush1.bf16.msra.mxu0 %v5014_v25  ;;  %2004 = vmatpush1.bf16.msra.mxu1 %v4739_v42 }
 0x50d   :  { %1964 = vmatprep.subr.bf16.mxu0 %v5018_v33  ;;  %2005 = vmatprep.subr.bf16.mxu1 %v4743_v57 }
 0x510   :  { %1965 = vmatpush1.bf16.msra.mxu0 %v5022_v39  ;;  %2006 = vmatpush1.bf16.msra.mxu1 %v4747_v45 }
 0x511   :  { %1966 = vmatprep.subr.bf16.mxu0 %v4600_v62  ;;  %2007 = vmatprep.subr.bf16.mxu1 %v4751_v58  ;;  %v6234_v62 = vld [vmem:[#allocation80_spill] sm:$0xff] }
 0x514   :  { %1967 = vmatpush1.bf16.msra.mxu0 %v4604_v63  ;;  %2008 = vmatpush1.bf16.msra.mxu1 %v4755_v55  ;;  %v6235_v63 = vld [vmem:[#allocation19_spill] sm:$0xff] }
 0x515   :  { %1968 = vmatprep.subr.bf16.mxu0 %v4608_v1  ;;  %2009 = vmatprep.subr.bf16.mxu1 %v4759_v0  ;;  %v6236_v1 = vld [vmem:[#allocation20_spill] sm:$0xff] }
 0x518   :  { %1969 = vmatpush1.bf16.msra.mxu0 %v4612_v2  ;;  %2010 = vmatpush1.bf16.msra.mxu1 %v4763_v46  ;;  %v6237_v2 = vld [vmem:[#allocation21_spill] sm:$0xff] }
 0x519   :  { %1970 = vmatprep.subr.bf16.mxu0 %v4616_v4  ;;  %2011 = vmatprep.subr.bf16.mxu1 %v4767_v52  ;;  %v6238_v4 = vld [vmem:[#allocation22_spill] sm:$0xff] }
 0x51c   :  { %1971 = vmatpush1.bf16.msra.mxu0 %v4620_v5  ;;  %2012 = vmatpush1.bf16.msra.mxu1 %v4771_v3  ;;  %v6239_v5 = vld [vmem:[#allocation23_spill] sm:$0xff] }
 0x51d   :  { %1972 = vmatprep.subr.bf16.mxu0 %v4624_v6  ;;  %2013 = vmatprep.subr.bf16.mxu1 %v4775_v53  ;;  %v6240_v6 = vld [vmem:[#allocation24_spill] sm:$0xff] }
 0x520   :  { %1973 = vmatpush1.bf16.msra.mxu0 %v4628_v7  ;;  %2014 = vmatpush1.bf16.msra.mxu1 %v4779_v35  ;;  %v6241_v7 = vld [vmem:[#allocation25_spill] sm:$0xff] }
 0x521   :  { %2064 = vmatprep.subr.bf16.mxu0 %v4782_v31  ;;  %2105 = vmatprep.subr.bf16.mxu1 %v4785_v26 }
 0x523   :  { %1991 = vmatmul.mubr.bf16.vlgmr.msra.gmra.mrb[32].mxu0 %v1849_v40  ;;  %2032 = vmatmul.mubr.bf16.vlgmr.msra.gmra.mrb[64].mxu1 %v1849_v40  ;;  %v6255_v40 = vld [vmem:[#allocation39_spill] sm:$0xff] }
 0x524   :  { %2065 = vmatpush1.bf16.msra.mxu0 %v4788_v49  ;;  %2106 = vmatpush1.bf16.msra.mxu1 %v4791_v29 }
 0x525   :  { %2066 = vmatprep.subr.bf16.mxu0 %v4794_v50  ;;  %2107 = vmatprep.subr.bf16.mxu1 %v4797_v10 }
 0x528   :  { %2067 = vmatpush1.bf16.msra.mxu0 %v4800_v11  ;;  %2108 = vmatpush1.bf16.msra.mxu1 %v4803_v13 }
 0x529   :  { %2068 = vmatprep.subr.bf16.mxu0 %v4806_v14  ;;  %2109 = vmatprep.subr.bf16.mxu1 %v4809_v15 }
 0x52c   :  { %2069 = vmatpush1.bf16.msra.mxu0 %v4812_v17  ;;  %2110 = vmatpush1.bf16.msra.mxu1 %v4815_v19 }
 0x52d   :  { %2070 = vmatprep.subr.bf16.mxu0 %v4818_v20  ;;  %2111 = vmatprep.subr.bf16.mxu1 %v4821_v24 }
 0x530   :  { %2071 = vmatpush1.bf16.msra.mxu0 %v4824_v27  ;;  %2112 = vmatpush1.bf16.msra.mxu1 %v4827_v28 }
 0x531   :  { %2072 = vmatprep.subr.bf16.mxu0 %v4830_v32  ;;  %2113 = vmatprep.subr.bf16.mxu1 %v6234_v62 }
 0x534   :  { %2073 = vmatpush1.bf16.msra.mxu0 %v6235_v63  ;;  %2114 = vmatpush1.bf16.msra.mxu1 %v6236_v1 }
 0x535   :  { %2074 = vmatprep.subr.bf16.mxu0 %v6237_v2  ;;  %2115 = vmatprep.subr.bf16.mxu1 %v6238_v4 }
 0x538   :  { %2075 = vmatpush1.bf16.msra.mxu0 %v6239_v5  ;;  %2116 = vmatpush1.bf16.msra.mxu1 %v6240_v6  ;;  %v6285_v6 = vld [vmem:[#allocation95_spill] sm:$0xff] }
 0x539   :  { %2076 = vmatprep.subr.bf16.mxu0 %v6241_v7  ;;  %2117 = vmatprep.subr.bf16.mxu1 %v6242_v41 }
 0x53c   :  { %2077 = vmatpush1.bf16.msra.mxu0 %v6243_v22  ;;  %2118 = vmatpush1.bf16.msra.mxu1 %v6244_v8  ;;  %v6284_v8 = vld [vmem:[#allocation94_spill] sm:$0xff] }
 0x53d   :  { %2078 = vmatprep.subr.bf16.mxu0 %v6245_v59  ;;  %2119 = vmatprep.subr.bf16.mxu1 %v6246_v18  ;;  %v6257_v18 = vld [vmem:[#allocation41_spill] sm:$0xff] }
 0x540   :  { %2079 = vmatpush1.bf16.msra.mxu0 %v6247_v30  ;;  %2120 = vmatpush1.bf16.msra.mxu1 %v6248_v43  ;;  %v6258_v30 = vld [vmem:[#allocation42_spill] sm:$0xff]  ;;  %v6259_v43 = vld [vmem:[#allocation43_spill] sm:$0xff] }
 0x541   :  { %2080 = vmatprep.subr.bf16.mxu0 %v6249_v9  ;;  %2121 = vmatprep.subr.bf16.mxu1 %v6250_v34  ;;  %v6260_v9 = vld [vmem:[#allocation44_spill] sm:$0xff]  ;;  %v6261_v34 = vld [vmem:[#allocation45_spill] sm:$0xff] }
 0x544   :  { %2081 = vmatpush1.bf16.msra.mxu0 %v6251_v56  ;;  %2122 = vmatpush1.bf16.msra.mxu1 %v6252_v54  ;;  %v6262_v56 = vld [vmem:[#allocation46_spill] sm:$0xff]  ;;  %v6263_v54 = vld [vmem:[#allocation47_spill] sm:$0xff] }
 0x545   :  { %2082 = vmatprep.subr.bf16.mxu0 %v6253_v36  ;;  %2123 = vmatprep.subr.bf16.mxu1 %v6254_v44  ;;  %v6264_v36 = vld [vmem:[#allocation48_spill] sm:$0xff]  ;;  %v6265_v44 = vld [vmem:[#allocation49_spill] sm:$0xff] }
 0x548   :  { %2083 = vmatpush1.bf16.msra.mxu0 %v6255_v40  ;;  %2124 = vmatpush1.bf16.msra.mxu1 %v6256_v16  ;;  %v6266_v40 = vld [vmem:[#allocation50_spill] sm:$0xff]  ;;  %v6267_v16 = vld [vmem:[#allocation51_spill] sm:$0xff] }
 0x549   :  { %2084 = vmatprep.subr.bf16.mxu0 %v6257_v18  ;;  %2125 = vmatprep.subr.bf16.mxu1 %v6258_v30  ;;  %v6268_v18 = vld [vmem:[#allocation52_spill] sm:$0xff]  ;;  %v6269_v30 = vld [vmem:[#allocation53_spill] sm:$0xff] }
 0x54c   :  { %2085 = vmatpush1.bf16.msra.mxu0 %v6259_v43  ;;  %2126 = vmatpush1.bf16.msra.mxu1 %v6260_v9  ;;  %v6270_v43 = vld [vmem:[#allocation54_spill] sm:$0xff]  ;;  %v6271_v9 = vld [vmem:[#allocation55_spill] sm:$0xff] }
 0x54d   :  { %2086 = vmatprep.subr.bf16.mxu0 %v6261_v34  ;;  %2127 = vmatprep.subr.bf16.mxu1 %v6262_v56  ;;  %v6272_v34 = vld [vmem:[#allocation56_spill] sm:$0xff]  ;;  %v6273_v56 = vld [vmem:[#allocation57_spill] sm:$0xff] }
 0x550   :  { %2087 = vmatpush1.bf16.msra.mxu0 %v6263_v54  ;;  %2128 = vmatpush1.bf16.msra.mxu1 %v6264_v36  ;;  %v6274_v54 = vld [vmem:[#allocation58_spill] sm:$0xff]  ;;  %v6275_v36 = vld [vmem:[#allocation59_spill] sm:$0xff] }
 0x551   :  { %2088 = vmatprep.subr.bf16.mxu0 %v6265_v44  ;;  %2129 = vmatprep.subr.bf16.mxu1 %v6266_v40  ;;  %v6276_v44 = vld [vmem:[#allocation60_spill] sm:$0xff]  ;;  %v6277_v40 = vld [vmem:[#allocation61_spill] sm:$0xff] }
 0x554   :  { %2089 = vmatpush1.bf16.msra.mxu0 %v6267_v16  ;;  %2130 = vmatpush1.bf16.msra.mxu1 %v6268_v18  ;;  %v6278_v16 = vld [vmem:[#allocation62_spill] sm:$0xff]  ;;  %v6279_v18 = vld [vmem:[#allocation63_spill] sm:$0xff] }
 0x555   :  { %2090 = vmatprep.subr.bf16.mxu0 %v6269_v30  ;;  %2131 = vmatprep.subr.bf16.mxu1 %v6270_v43  ;;  %v6280_v30 = vld [vmem:[#allocation64_spill] sm:$0xff] }
 0x556   :  { %v5106_v43 = vld [vmem:[#allocation9 + $0x4] ss:$16 sps:$4 sm:$0xff]  }
 0x557   :  { %6281 = vst [vmem:[#allocation67_spill] sm:$0xff] %v5106_v43 }
 0x558   :  { %2091 = vmatpush1.bf16.msra.mxu0 %v6271_v9  ;;  %2132 = vmatpush1.bf16.msra.mxu1 %v6272_v34  ;;  %v6282_v34 = vld [vmem:[#allocation79_spill] sm:$0xff]  ;;  %v6283_v9 = vld [vmem:[#allocation18_spill] sm:$0xff] }
 0x559   :  { %2092 = vmatprep.subr.bf16.mxu0 %v6273_v56  ;;  %2133 = vmatprep.subr.bf16.mxu1 %v6274_v54 }
 0x55c   :  { %2093 = vmatpush1.bf16.msra.mxu0 %v6275_v36  ;;  %2134 = vmatpush1.bf16.msra.mxu1 %v6276_v44 }
 0x55d   :  { %2094 = vmatprep.subr.bf16.mxu0 %v6277_v40  ;;  %2135 = vmatprep.subr.bf16.mxu1 %v6278_v16 }
 0x560   :  { %2095 = vmatpush1.bf16.msra.mxu0 %v6279_v18  ;;  %2136 = vmatpush1.bf16.msra.mxu1 %v6280_v30 }
 0x561   :  { %2171 = vmatprep.subr.bf16.mxu0 %v5106_v43  ;;  %2212 = vmatprep.subr.bf16.mxu1 %v6282_v34  ;;  %v6286_v34 = vld [vmem:[#allocation96_spill] sm:$0xff] }
 0x5d6   :  { %v1885_v56 = vpop.f32.mrb[28].mxu0  ;;  %v1926_v54 = vpop.f32.mrb[60].mxu1 }
 0x5d7   :  { %v1886_v36 = vadd.f32 %v1885_v56, %v6283_v9  ;;  %v1887_v59 = vpop.f32.mrb[29].mxu0  ;;  %v1928_v44 = vpop.f32.mrb[61].mxu1  ;;  %v1927_v5 = vadd.f32 %v1926_v54, %v6285_v6  ;;  %v6291_v6 = vld [vmem:[#allocation72_spill] sm:$0xff] }
 0x5d8   :  { %v1888_v40 = vadd.f32 %v1887_v59, %v6284_v8  ;;  %v1889_v22 = vpop.f32.mrb[30].mxu0  ;;  %v1930_v16 = vpop.f32.mrb[62].mxu1  ;;  %v1929_v43 = vadd.f32 %v1928_v44, %v6286_v34  ;;  %v6290_v34 = vld [vmem:[#allocation85_spill] sm:$0xff] }
 0x5d9   :  { %v1933_v41 = vmul.f32 0.5, %v1886_v36  ;;  %v1890_v18 = vpop.f32.mrb[31].mxu0  ;;  %v1931_v7 = vpop.f32.mrb[63].mxu1 }
 0x5da   :  { %v1937_v30 = vmul.f32 0.5, %v1888_v40  ;;  %v1942_v4 = vmul.f32 0.5, %v1929_v43  ;;  %v6287_v18 = vld [vmem:[#allocation93_spill] sm:$0xff]  ;;  %v6289_v43 = vld [vmem:[#allocation71_spill] sm:$0xff] }
 0x5db   :  { %3507 = vtanh.f32 %v1933_v41 }
 0x5dc   :  { %3509 = vtanh.f32 %v1937_v30 }
 0x5dd   :  { %3511 = vtanh.f32 %v1927_v5 }
 0x5de   :  { %3513 = vtanh.f32 %v1942_v4 }
 0x5e5   :  { %v3508_v2 = vpop.eup %3507 }
 0x5e6   :  { %v3510_v56 = vpop.eup %3509  ;;  %v1935_v9 = vmul.f32 0.5, %v3508_v2 }
 0x5e7   :  { %v1939_v1 = vmul.f32 0.5, %v3510_v56  ;;  %v3512_v22 = vpop.eup %3511 }
 0x5e8   :  { %v1936_v59 = vadd.f32 0.5, %v1935_v9  ;;  %v3514_v41 = vpop.eup %3513 }
 0x5e9   :  { %v1940_v16 = vadd.f32 0.5, %v1939_v1  ;;  %v1944_v5 = vmul.f32 0.5, %v3514_v41 }
 0x5ea   :  { %v1947_v36 = vmul.f32 %v3512_v22, %v1936_v59  ;;  %v6292_v59 = vld [vmem:[#allocation86_spill] sm:$0xff] }
 0x5eb   :  { %v1946_v7 = vmul.f32 %v1940_v16, %v6287_v18  ;;  %v1945_v9 = vadd.f32 0.5, %v1944_v5 }
 0x5ed   :  { %v5115_v40 = vadd.f32 %v1947_v36, %v1946_v7 }
 0x5ef   :  { %6288 = vst [vmem:[#allocation81_spill] sm:$0xff] %v5115_v40  ;;  %3515 = vtanh.f32 %v5115_v40 }
 0x5f6   :  { %v1992_v30 = vpop.f32.mrb[32].mxu0  ;;  %v2033_v54 = vpop.f32.mrb[64].mxu1 }
 0x5f7   :  { %v2040_v44 = vadd.f32 %v1992_v30, %v6289_v43  ;;  %v2042_v2 = vadd.f32 %v2033_v54, %v6290_v34  ;;  %v1994_v56 = vpop.f32.mrb[33].mxu0  ;;  %v2035_v4 = vpop.f32.mrb[65].mxu1 }
 0x5f8   :  { %v2041_v1 = vadd.f32 %v1994_v56, %v6291_v6  ;;  %v2043_v22 = vadd.f32 %v2035_v4, %v6292_v59  ;;  %v1996_v16 = vpop.f32.mrb[34].mxu0  ;;  %v2037_v36 = vpop.f32.mrb[66].mxu1 }
 0x5f9   :  { %v3516_v18 = vpop.eup %3515  ;;  %v2044_v7 = vmul.f32 0.5, %v2040_v44  ;;  %v1997_v40 = vpop.f32.mrb[35].mxu0 }
 0x5fa   :  { %v2038_v8 = vpop.f32.mrb[67].mxu1  ;;  %v2048_v41 = vmul.f32 0.5, %v2041_v1  ;;  %v5122_v63 = vmul.f32 %v3516_v18, %v1945_v9  ;;  %v2053_v6 = vmul.f32 0.5, %v2043_v22  ;;  %v6320_v18 = vld [vmem:[#allocation45_spill] sm:$0xff] }
 0x5fb   :  { %3517 = vtanh.f32 %v2044_v7  ;;  %v6321_v7 = vld [vmem:[#allocation46_spill] sm:$0xff] }
 0x5fc   :  { %6293 = vst [vmem:[#allocation68_spill] sm:$0xff] %v5122_v63  ;;  %3519 = vtanh.f32 %v2048_v41  ;;  %v2063_v34 = vpack.c.bf16 %v5122_v63, %v5122_v63  ;;  %v6322_v41 = vld [vmem:[#allocation47_spill] sm:$0xff] }
 0x5fd   :  { %3521 = vtanh.f32 %v2042_v2  ;;  %v5421_v63 = vld [vmem:[#allocation10 + $0xe8] ss:$16 sps:$4 sm:$0xff]  }
 0x5fe   :  { %2096 = vmatprep.mubr.bf16.mxu0 %v2063_v34  ;;  %2137 = vmatprep.mubr.bf16.mxu1 %v2063_v34  ;;  %3523 = vtanh.f32 %v2053_v6  ;;  %v6323_v34 = vld [vmem:[#allocation48_spill] sm:$0xff]  ;;  %v6324_v6 = vld [vmem:[#allocation49_spill] sm:$0xff] }
 0x605   :  { %v3518_v5 = vpop.eup %3517 }
 0x606   :  { %v3520_v30 = vpop.eup %3519  ;;  %v2046_v54 = vmul.f32 0.5, %v3518_v5  ;;  %v6325_v5 = vld [vmem:[#allocation50_spill] sm:$0xff] }
 0x607   :  { %v2050_v43 = vmul.f32 0.5, %v3520_v30  ;;  %v3522_v40 = vpop.eup %3521  ;;  %v6326_v30 = vld [vmem:[#allocation51_spill] sm:$0xff] }
 0x608   :  { %v2047_v44 = vadd.f32 0.5, %v2046_v54  ;;  %v3524_v1 = vpop.eup %3523  ;;  %v6327_v54 = vld [vmem:[#allocation52_spill] sm:$0xff] }
 0x609   :  { %v2051_v8 = vadd.f32 0.5, %v2050_v43  ;;  %v2055_v59 = vmul.f32 0.5, %v3524_v1  ;;  %v6328_v43 = vld [vmem:[#allocation53_spill] sm:$0xff]  ;;  %v6334_v1 = vld [vmem:[#allocation59_spill] sm:$0xff] }
 0x60a   :  { %v2058_v56 = vmul.f32 %v3522_v40, %v2047_v44  ;;  %v6329_v44 = vld [vmem:[#allocation54_spill] sm:$0xff]  ;;  %v6330_v40 = vld [vmem:[#allocation55_spill] sm:$0xff] }
 0x60b   :  { %v2057_v4 = vmul.f32 %v2051_v8, %v4993_v12  ;;  %v2056_v16 = vadd.f32 0.5, %v2055_v59  ;;  %v6318_v12 = vld [vmem:[#allocation43_spill] sm:$0xff]  ;;  %v6331_v8 = vld [vmem:[#allocation56_spill] sm:$0xff] }
 0x60c   :  { %v6335_v59 = vld [vmem:[#allocation60_spill] sm:$0xff] }
 0x60d   :  { %v5127_v9 = vadd.f32 %v2058_v56, %v2057_v4  ;;  %v6332_v56 = vld [vmem:[#allocation57_spill] sm:$0xff]  ;;  %v6333_v4 = vld [vmem:[#allocation58_spill] sm:$0xff] }
 0x60f   :  { %3525 = vtanh.f32 %v5127_v9 }
 0x619   :  { %v3526_v2 = vpop.eup %3525 }
 0x61a   :  { %v2061_v22 = vmul.f32 %v3526_v2, %v2056_v16  ;;  %v6336_v16 = vld [vmem:[#allocation61_spill] sm:$0xff]  ;;  %v6337_v2 = vld [vmem:[#allocation62_spill] sm:$0xff] }
 0x61c   :  { %v2062_v36 = vpack.c.bf16 %v2061_v22, %v2061_v22  ;;  %v6338_v22 = vld [vmem:[#allocation63_spill] sm:$0xff] }
 0x61e   :  { %2097 = vmatmul.mubr.bf16.vlgmr.msra.gmra.mrb[36].mxu0 %v2062_v36  ;;  %2138 = vmatmul.mubr.bf16.vlgmr.msra.gmra.mrb[68].mxu1 %v2062_v36 }
 0x61f   :  { %2172 = vmatpush1.bf16.msra.mxu0 %v4996_v23  ;;  %2213 = vmatpush1.bf16.msra.mxu1 %v4721_v21  ;;  %v5146_v21 = vld [vmem:[#allocation9 + $0x84] ss:$16 sps:$4 sm:$0xff]  }
 0x620   :  { %2173 = vmatprep.subr.bf16.mxu0 %v5000_v38  ;;  %2214 = vmatprep.subr.bf16.mxu1 %v4725_v47  ;;  %v5150_v47 = vld [vmem:[#allocation9 + $0x80] ss:$16 sps:$4 sm:$0xff]  }
 0x621   :  { %2203 = vmatprep.mubr.bf16.mxu0 %v6060_v51  ;;  %2244 = vmatprep.mubr.bf16.mxu1 %v6060_v51 }
 0x623   :  { %2174 = vmatpush1.bf16.msra.mxu0 %v5006_v48  ;;  %2215 = vmatpush1.bf16.msra.mxu1 %v4731_v61  ;;  %v5154_v61 = vld [vmem:[#allocation9 + $0xa4] ss:$16 sps:$4 sm:$0xff]  }
 0x624   :  { %2175 = vmatprep.subr.bf16.mxu0 %v5010_v37  ;;  %2216 = vmatprep.subr.bf16.mxu1 %v4735_v60  ;;  %v5158_v60 = vld [vmem:[#allocation9 + $0xa0] ss:$16 sps:$4 sm:$0xff]  }
 0x627   :  { %2176 = vmatpush1.bf16.msra.mxu0 %v5014_v25  ;;  %2217 = vmatpush1.bf16.msra.mxu1 %v4739_v42  ;;  %v5162_v42 = vld [vmem:[#allocation9 + $0xc4] ss:$16 sps:$4 sm:$0xff]  }
 0x628   :  { %2177 = vmatprep.subr.bf16.mxu0 %v5018_v33  ;;  %2218 = vmatprep.subr.bf16.mxu1 %v4743_v57  ;;  %v5166_v57 = vld [vmem:[#allocation9 + $0xc0] ss:$16 sps:$4 sm:$0xff]  }
 0x62b   :  { %2178 = vmatpush1.bf16.msra.mxu0 %v5022_v39  ;;  %2219 = vmatpush1.bf16.msra.mxu1 %v4747_v45  ;;  %v5170_v45 = vld [vmem:[#allocation9 + $0xe4] ss:$16 sps:$4 sm:$0xff]  }
 0x62c   :  { %2179 = vmatprep.subr.bf16.mxu0 %v5146_v21  ;;  %2220 = vmatprep.subr.bf16.mxu1 %v4751_v58  ;;  %v5174_v58 = vld [vmem:[#allocation9 + $0xe0] ss:$16 sps:$4 sm:$0xff]  }
 0x62f   :  { %2180 = vmatpush1.bf16.msra.mxu0 %v5150_v47  ;;  %2221 = vmatpush1.bf16.msra.mxu1 %v4755_v55  ;;  %v6294_v55 = vld [vmem:[#allocation19_spill] sm:$0xff] }
 0x630   :  { %2181 = vmatprep.subr.bf16.mxu0 %v5154_v61  ;;  %2222 = vmatprep.subr.bf16.mxu1 %v4759_v0  ;;  %v6295_v0 = vld [vmem:[#allocation20_spill] sm:$0xff] }
 0x633   :  { %2182 = vmatpush1.bf16.msra.mxu0 %v5158_v60  ;;  %2223 = vmatpush1.bf16.msra.mxu1 %v4763_v46  ;;  %v6296_v46 = vld [vmem:[#allocation21_spill] sm:$0xff] }
 0x634   :  { %2183 = vmatprep.subr.bf16.mxu0 %v5162_v42  ;;  %2224 = vmatprep.subr.bf16.mxu1 %v4767_v52  ;;  %v6297_v52 = vld [vmem:[#allocation22_spill] sm:$0xff] }
 0x635   :  { %6365 = vst [vmem:[#allocation22_spill] sm:$0xff] %v5421_v63 }
 0x637   :  { %2184 = vmatpush1.bf16.msra.mxu0 %v5166_v57  ;;  %2225 = vmatpush1.bf16.msra.mxu1 %v4771_v3  ;;  %v6298_v3 = vld [vmem:[#allocation23_spill] sm:$0xff] }
 0x638   :  { %2185 = vmatprep.subr.bf16.mxu0 %v5170_v45  ;;  %2226 = vmatprep.subr.bf16.mxu1 %v4775_v53  ;;  %v6299_v53 = vld [vmem:[#allocation24_spill] sm:$0xff] }
 0x63b   :  { %2186 = vmatpush1.bf16.msra.mxu0 %v5174_v58  ;;  %2227 = vmatpush1.bf16.msra.mxu1 %v4779_v35  ;;  %v6300_v35 = vld [vmem:[#allocation25_spill] sm:$0xff] }
 0x63c   :  { %2277 = vmatprep.subr.bf16.mxu0 %v4782_v31  ;;  %2318 = vmatprep.subr.bf16.mxu1 %v4785_v26  ;;  %v6301_v31 = vld [vmem:[#allocation26_spill] sm:$0xff]  ;;  %v6302_v26 = vld [vmem:[#allocation27_spill] sm:$0xff] }
 0x63e   :  { %2204 = vmatmul.mubr.bf16.vlgmr.msra.gmra.mrb[40].mxu0 %v2062_v36  ;;  %2245 = vmatmul.mubr.bf16.vlgmr.msra.gmra.mrb[72].mxu1 %v2062_v36  ;;  %v6339_v36 = vld [vmem:[#allocation64_spill] sm:$0xff] }
 0x63f   :  { %2278 = vmatpush1.bf16.msra.mxu0 %v4788_v49  ;;  %2319 = vmatpush1.bf16.msra.mxu1 %v4791_v29  ;;  %v6303_v49 = vld [vmem:[#allocation28_spill] sm:$0xff]  ;;  %v6304_v29 = vld [vmem:[#allocation29_spill] sm:$0xff] }
 0x640   :  { %2279 = vmatprep.subr.bf16.mxu0 %v4794_v50  ;;  %2320 = vmatprep.subr.bf16.mxu1 %v4797_v10  ;;  %v6305_v50 = vld [vmem:[#allocation30_spill] sm:$0xff]  ;;  %v6306_v10 = vld [vmem:[#allocation31_spill] sm:$0xff] }
 0x643   :  { %2280 = vmatpush1.bf16.msra.mxu0 %v4800_v11  ;;  %2321 = vmatpush1.bf16.msra.mxu1 %v4803_v13  ;;  %v6307_v11 = vld [vmem:[#allocation32_spill] sm:$0xff]  ;;  %v6308_v13 = vld [vmem:[#allocation33_spill] sm:$0xff] }
 0x644   :  { %2281 = vmatprep.subr.bf16.mxu0 %v4806_v14  ;;  %2322 = vmatprep.subr.bf16.mxu1 %v4809_v15  ;;  %v6309_v14 = vld [vmem:[#allocation34_spill] sm:$0xff]  ;;  %v6310_v15 = vld [vmem:[#allocation35_spill] sm:$0xff] }
 0x647   :  { %2282 = vmatpush1.bf16.msra.mxu0 %v4812_v17  ;;  %2323 = vmatpush1.bf16.msra.mxu1 %v4815_v19  ;;  %v6311_v17 = vld [vmem:[#allocation36_spill] sm:$0xff]  ;;  %v6312_v19 = vld [vmem:[#allocation37_spill] sm:$0xff] }
 0x648   :  { %2283 = vmatprep.subr.bf16.mxu0 %v4818_v20  ;;  %2324 = vmatprep.subr.bf16.mxu1 %v4821_v24  ;;  %v6313_v20 = vld [vmem:[#allocation38_spill] sm:$0xff]  ;;  %v6314_v24 = vld [vmem:[#allocation39_spill] sm:$0xff] }
 0x64b   :  { %2284 = vmatpush1.bf16.msra.mxu0 %v4824_v27  ;;  %2325 = vmatpush1.bf16.msra.mxu1 %v4827_v28  ;;  %v6315_v27 = vld [vmem:[#allocation40_spill] sm:$0xff]  ;;  %v6316_v28 = vld [vmem:[#allocation41_spill] sm:$0xff] }
 0x64c   :  { %2285 = vmatprep.subr.bf16.mxu0 %v4830_v32  ;;  %2326 = vmatprep.subr.bf16.mxu1 %v6234_v62  ;;  %v6317_v32 = vld [vmem:[#allocation42_spill] sm:$0xff]  ;;  %v6319_v62 = vld [vmem:[#allocation44_spill] sm:$0xff] }
 0x64f   :  { %2286 = vmatpush1.bf16.msra.mxu0 %v6294_v55  ;;  %2327 = vmatpush1.bf16.msra.mxu1 %v6295_v0  ;;  %v6340_v55 = vld [vmem:[#allocation67_spill] sm:$0xff] }
 0x650   :  { %2287 = vmatprep.subr.bf16.mxu0 %v6296_v46  ;;  %2328 = vmatprep.subr.bf16.mxu1 %v6297_v52  ;;  %v5243_v0 = vld [vmem:[#allocation9 + $0xc] ss:$16 sps:$4 sm:$0xff]  }
 0x653   :  { %2288 = vmatpush1.bf16.msra.mxu0 %v6298_v3  ;;  %2329 = vmatpush1.bf16.msra.mxu1 %v6299_v53  ;;  %v6341_v3 = vld [vmem:[#allocation18_spill] sm:$0xff] }
 0x654   :  { %2289 = vmatprep.subr.bf16.mxu0 %v6300_v35  ;;  %2330 = vmatprep.subr.bf16.mxu1 %v6301_v31 }
 0x657   :  { %2290 = vmatpush1.bf16.msra.mxu0 %v6302_v26  ;;  %2331 = vmatpush1.bf16.msra.mxu1 %v6303_v49  ;;  %v6342_v26 = vld [vmem:[#allocation94_spill] sm:$0xff] }
 0x658   :  { %2291 = vmatprep.subr.bf16.mxu0 %v6304_v29  ;;  %2332 = vmatprep.subr.bf16.mxu1 %v6305_v50 }
 0x65b   :  { %2292 = vmatpush1.bf16.msra.mxu0 %v6306_v10  ;;  %2333 = vmatpush1.bf16.msra.mxu1 %v6307_v11 }
 0x65c   :  { %2293 = vmatprep.subr.bf16.mxu0 %v6308_v13  ;;  %2334 = vmatprep.subr.bf16.mxu1 %v6309_v14 }
 0x65f   :  { %2294 = vmatpush1.bf16.msra.mxu0 %v6310_v15  ;;  %2335 = vmatpush1.bf16.msra.mxu1 %v6311_v17  ;;  %v6343_v15 = vld [vmem:[#allocation95_spill] sm:$0xff] }
 0x660   :  { %2295 = vmatprep.subr.bf16.mxu0 %v6312_v19  ;;  %2336 = vmatprep.subr.bf16.mxu1 %v6313_v20  ;;  %v6344_v19 = vld [vmem:[#allocation96_spill] sm:$0xff] }
 0x663   :  { %2296 = vmatpush1.bf16.msra.mxu0 %v6314_v24  ;;  %2337 = vmatpush1.bf16.msra.mxu1 %v6315_v27 }
 0x664   :  { %2297 = vmatprep.subr.bf16.mxu0 %v6316_v28  ;;  %2338 = vmatprep.subr.bf16.mxu1 %v6317_v32 }
 0x667   :  { %2298 = vmatpush1.bf16.msra.mxu0 %v6318_v12  ;;  %2339 = vmatpush1.bf16.msra.mxu1 %v6319_v62 }
 0x668   :  { %2299 = vmatprep.subr.bf16.mxu0 %v6320_v18  ;;  %2340 = vmatprep.subr.bf16.mxu1 %v6321_v7 }
 0x66b   :  { %2300 = vmatpush1.bf16.msra.mxu0 %v6322_v41  ;;  %2341 = vmatpush1.bf16.msra.mxu1 %v6323_v34  ;;  %v6345_v34 = vld [vmem:[#allocation81_spill] sm:$0xff] }
 0x66c   :  { %2301 = vmatprep.subr.bf16.mxu0 %v6324_v6  ;;  %2342 = vmatprep.subr.bf16.mxu1 %v6325_v5 }
 0x66f   :  { %2302 = vmatpush1.bf16.msra.mxu0 %v6326_v30  ;;  %2343 = vmatpush1.bf16.msra.mxu1 %v6327_v54 }
 0x670   :  { %2303 = vmatprep.subr.bf16.mxu0 %v6328_v43  ;;  %2344 = vmatprep.subr.bf16.mxu1 %v6329_v44 }
 0x673   :  { %2304 = vmatpush1.bf16.msra.mxu0 %v6330_v40  ;;  %2345 = vmatpush1.bf16.msra.mxu1 %v6331_v8  ;;  %v6346_v40 = vld [vmem:[#allocation73_spill] sm:$0xff] }
 0x674   :  { %2305 = vmatprep.subr.bf16.mxu0 %v6332_v56  ;;  %2346 = vmatprep.subr.bf16.mxu1 %v6333_v4  ;;  %v6347_v56 = vld [vmem:[#allocation87_spill] sm:$0xff] }
 0x677   :  { %2306 = vmatpush1.bf16.msra.mxu0 %v6334_v1  ;;  %2347 = vmatpush1.bf16.msra.mxu1 %v6335_v59 }
 0x678   :  { %2307 = vmatprep.subr.bf16.mxu0 %v6336_v16  ;;  %2348 = vmatprep.subr.bf16.mxu1 %v6337_v2  ;;  %v6348_v2 = vld [vmem:[#allocation74_spill] sm:$0xff] }
 0x67b   :  { %2308 = vmatpush1.bf16.msra.mxu0 %v6338_v22  ;;  %2349 = vmatpush1.bf16.msra.mxu1 %v6339_v36  ;;  %v6349_v36 = vld [vmem:[#allocation88_spill] sm:$0xff] }
 0x67c   :  { %2384 = vmatprep.subr.bf16.mxu0 %v6340_v55  ;;  %2425 = vmatprep.subr.bf16.mxu1 %v5243_v0 }
 0x6f1   :  { %v2098_v46 = vpop.f32.mrb[36].mxu0  ;;  %v2139_v52 = vpop.f32.mrb[68].mxu1 }
 0x6f2   :  { %v2099_v53 = vadd.f32 %v2098_v46, %v6341_v3  ;;  %v2100_v35 = vpop.f32.mrb[37].mxu0  ;;  %v2141_v31 = vpop.f32.mrb[69].mxu1  ;;  %v2140_v17 = vadd.f32 %v2139_v52, %v6343_v15 }
 0x6f3   :  { %v2101_v49 = vadd.f32 %v2100_v35, %v6342_v26  ;;  %v2102_v29 = vpop.f32.mrb[38].mxu0  ;;  %v2143_v50 = vpop.f32.mrb[70].mxu1  ;;  %v2142_v20 = vadd.f32 %v2141_v31, %v6344_v19 }
 0x6f4   :  { %v2146_v10 = vmul.f32 0.5, %v2099_v53  ;;  %v2103_v11 = vpop.f32.mrb[39].mxu0  ;;  %v2144_v13 = vpop.f32.mrb[71].mxu1 }
 0x6f5   :  { %v2150_v14 = vmul.f32 0.5, %v2101_v49  ;;  %v2155_v24 = vmul.f32 0.5, %v2142_v20 }
 0x6f6   :  { %3527 = vtanh.f32 %v2146_v10 }
 0x6f7   :  { %3529 = vtanh.f32 %v2150_v14 }
 0x6f8   :  { %3531 = vtanh.f32 %v2140_v17 }
 0x6f9   :  { %3533 = vtanh.f32 %v2155_v24 }
 0x700   :  { %v3528_v27 = vpop.eup %3527 }
 0x701   :  { %v3530_v28 = vpop.eup %3529  ;;  %v2148_v32 = vmul.f32 0.5, %v3528_v27 }
 0x702   :  { %v2152_v12 = vmul.f32 0.5, %v3530_v28  ;;  %v3532_v18 = vpop.eup %3531 }
 0x703   :  { %v2149_v62 = vadd.f32 0.5, %v2148_v32  ;;  %v3534_v30 = vpop.eup %3533 }
 0x704   :  { %v2153_v7 = vadd.f32 0.5, %v2152_v12  ;;  %v2157_v54 = vmul.f32 0.5, %v3534_v30 }
 0x705   :  { %v2160_v41 = vmul.f32 %v3532_v18, %v2149_v62 }
 0x706   :  { %v2159_v6 = vmul.f32 %v2153_v7, %v6345_v34  ;;  %v2158_v16 = vadd.f32 0.5, %v2157_v54 }
 0x708   :  { %v5251_v5 = vadd.f32 %v2160_v41, %v2159_v6 }
 0x70a   :  { %3535 = vtanh.f32 %v5251_v5 }
 0x711   :  { %v2205_v43 = vpop.f32.mrb[40].mxu0  ;;  %v2246_v44 = vpop.f32.mrb[72].mxu1 }
 0x712   :  { %v2253_v8 = vadd.f32 %v2205_v43, %v6346_v40  ;;  %v2255_v4 = vadd.f32 %v2246_v44, %v6347_v56  ;;  %v2207_v1 = vpop.f32.mrb[41].mxu0  ;;  %v2248_v59 = vpop.f32.mrb[73].mxu1  ;;  %v5267_v43 = vld [vmem:[#allocation9 + $0x8] ss:$16 sps:$4 sm:$0xff]   ;;  %v5289_v40 = vld [vmem:[#allocation9 + $0x6c] ss:$16 sps:$4 sm:$0xff]  }
 0x713   :  { %v2254_v22 = vadd.f32 %v2207_v1, %v6348_v2  ;;  %v2256_v46 = vadd.f32 %v2248_v59, %v6349_v36  ;;  %v2209_v52 = vpop.f32.mrb[42].mxu0  ;;  %v2250_v53 = vpop.f32.mrb[74].mxu1  ;;  %v5277_v44 = vld [vmem:[#allocation9 + $0x28] ss:$16 sps:$4 sm:$0xff]   ;;  %v5328_v59 = vld [vmem:[#allocation10 + $0x4] ss:$16 sps:$4 sm:$0xff]  }
 0x714   :  { %v3536_v35 = vpop.eup %3535  ;;  %v2257_v31 = vmul.f32 0.5, %v2253_v8  ;;  %v2210_v49 = vpop.f32.mrb[43].mxu0  ;;  %v5313_v8 = vld [vmem:[#allocation9 + $0xcc] ss:$16 sps:$4 sm:$0xff]   ;;  %v5317_v56 = vld [vmem:[#allocation9 + $0xc8] ss:$16 sps:$4 sm:$0xff]  }
 0x715   :  { %v2251_v29 = vpop.f32.mrb[75].mxu1  ;;  %v2261_v50 = vmul.f32 0.5, %v2254_v22  ;;  %v5258_v10 = vmul.f32 %v3536_v35, %v2158_v16  ;;  %v2266_v13 = vmul.f32 0.5, %v2256_v46  ;;  %v5325_v1 = vld [vmem:[#allocation9 + $0xe8] ss:$16 sps:$4 sm:$0xff]  }
 0x716   :  { %3537 = vtanh.f32 %v2257_v31  ;;  %v5331_v16 = vld [vmem:[#allocation10 + $0xc] ss:$16 sps:$4 sm:$0xff]   ;;  %v5334_v2 = vld [vmem:[#allocation10] ss:$16 sps:$4 sm:$0xff]   ;;  %v5337_v22 = vld [vmem:[#allocation10 + $0x8] ss:$16 sps:$4 sm:$0xff]  }
 0x717   :  { %6350 = vst [vmem:[#allocation82_spill] sm:$0xff] %v5258_v10  ;;  %3539 = vtanh.f32 %v2261_v50  ;;  %v2276_v11 = vpack.c.bf16 %v5258_v10, %v5258_v10  ;;  %v5340_v36 = vld [vmem:[#allocation10 + $0x24] ss:$16 sps:$4 sm:$0xff]   ;;  %v5343_v46 = vld [vmem:[#allocation10 + $0x2c] ss:$16 sps:$4 sm:$0xff]  }
 0x718   :  { %3541 = vtanh.f32 %v2255_v4  ;;  %v5321_v4 = vld [vmem:[#allocation9 + $0xec] ss:$16 sps:$4 sm:$0xff]   ;;  %v5346_v52 = vld [vmem:[#allocation10 + $0x20] ss:$16 sps:$4 sm:$0xff]   ;;  %v5349_v53 = vld [vmem:[#allocation10 + $0x28] ss:$16 sps:$4 sm:$0xff]  }
 0x719   :  { %2309 = vmatprep.mubr.bf16.mxu0 %v2276_v11  ;;  %2350 = vmatprep.mubr.bf16.mxu1 %v2276_v11  ;;  %3543 = vtanh.f32 %v2266_v13  ;;  %v5352_v35 = vld [vmem:[#allocation10 + $0x44] ss:$16 sps:$4 sm:$0xff]   ;;  %v5355_v31 = vld [vmem:[#allocation10 + $0x4c] ss:$16 sps:$4 sm:$0xff]   ;;  %v5358_v49 = vld [vmem:[#allocation10 + $0x40] ss:$16 sps:$4 sm:$0xff]  }
 0x71a   :  { %v5361_v29 = vld [vmem:[#allocation10 + $0x48] ss:$16 sps:$4 sm:$0xff]   ;;  %v5364_v50 = vld [vmem:[#allocation10 + $0x64] ss:$16 sps:$4 sm:$0xff]   ;;  %v5367_v11 = vld [vmem:[#allocation10 + $0x6c] ss:$16 sps:$4 sm:$0xff]  }
 0x71b   :  { %v5370_v13 = vld [vmem:[#allocation10 + $0x60] ss:$16 sps:$4 sm:$0xff]  }
 0x71c   :  { %v5418_v10 = vld [vmem:[#allocation10 + $0xe0] ss:$16 sps:$4 sm:$0xff]  }
 0x71d   :  { %6364 = vst [vmem:[#allocation21_spill] sm:$0xff] %v5418_v10 }
 0x720   :  { %v3538_v14 = vpop.eup %3537 }
 0x721   :  { %v3540_v17 = vpop.eup %3539  ;;  %v2259_v20 = vmul.f32 0.5, %v3538_v14  ;;  %v5373_v14 = vld [vmem:[#allocation10 + $0x68] ss:$16 sps:$4 sm:$0xff]  }
 0x722   :  { %v2263_v24 = vmul.f32 0.5, %v3540_v17  ;;  %v3542_v28 = vpop.eup %3541  ;;  %v5376_v17 = vld [vmem:[#allocation10 + $0x84] ss:$16 sps:$4 sm:$0xff]  }
 0x723   :  { %v2260_v27 = vadd.f32 0.5, %v2259_v20  ;;  %v3544_v7 = vpop.eup %3543  ;;  %v5379_v20 = vld [vmem:[#allocation10 + $0x8c] ss:$16 sps:$4 sm:$0xff]  }
 0x724   :  { %v2264_v32 = vadd.f32 0.5, %v2263_v24  ;;  %v2268_v41 = vmul.f32 0.5, %v3544_v7  ;;  %6351 = vst [vmem:[#allocation69_spill] sm:$0xff] %v5379_v20  ;;  %v5382_v24 = vld [vmem:[#allocation10 + $0x80] ss:$16 sps:$4 sm:$0xff]  }
 0x725   :  { %v2271_v12 = vmul.f32 %v3542_v28, %v2260_v27  ;;  %6352 = vst [vmem:[#allocation83_spill] sm:$0xff] %v5382_v24  ;;  %v5385_v27 = vld [vmem:[#allocation10 + $0x88] ss:$16 sps:$4 sm:$0xff]   ;;  %v5388_v28 = vld [vmem:[#allocation10 + $0xa4] ss:$16 sps:$4 sm:$0xff]  }
 0x726   :  { %v2270_v62 = vmul.f32 %v2264_v32, %v5127_v9  ;;  %v2269_v34 = vadd.f32 0.5, %v2268_v41  ;;  %v5271_v9 = vld [vmem:[#allocation9 + $0x2c] ss:$16 sps:$4 sm:$0xff]   ;;  %6353 = vst [vmem:[#allocation70_spill] sm:$0xff] %v5385_v27  ;;  %6354 = vst [vmem:[#allocation84_spill] sm:$0xff] %v5388_v28 }
 0x727   :  { %v5391_v32 = vld [vmem:[#allocation10 + $0xac] ss:$16 sps:$4 sm:$0xff]   ;;  %v5400_v7 = vld [vmem:[#allocation10 + $0xc4] ss:$16 sps:$4 sm:$0xff]  }
 0x728   :  { %v5263_v18 = vadd.f32 %v2271_v12, %v2270_v62  ;;  %6355 = vst [vmem:[#allocation80_spill] sm:$0xff] %v5391_v32  ;;  %v5394_v12 = vld [vmem:[#allocation10 + $0xa0] ss:$16 sps:$4 sm:$0xff]   ;;  %v5397_v62 = vld [vmem:[#allocation10 + $0xa8] ss:$16 sps:$4 sm:$0xff]   ;;  %6358 = vst [vmem:[#allocation71_spill] sm:$0xff] %v5400_v7 }
 0x729   :  { %6356 = vst [vmem:[#allocation79_spill] sm:$0xff] %v5394_v12  ;;  %6357 = vst [vmem:[#allocation93_spill] sm:$0xff] %v5397_v62  ;;  %v5403_v41 = vld [vmem:[#allocation10 + $0xcc] ss:$16 sps:$4 sm:$0xff]  }
 0x72a   :  { %3545 = vtanh.f32 %v5263_v18  ;;  %6359 = vst [vmem:[#allocation85_spill] sm:$0xff] %v5403_v41 }
 0x734   :  { %v3546_v6 = vpop.eup %3545 }
 0x735   :  { %v2274_v30 = vmul.f32 %v3546_v6, %v2269_v34  ;;  %v5406_v34 = vld [vmem:[#allocation10 + $0xc0] ss:$16 sps:$4 sm:$0xff]   ;;  %v5409_v6 = vld [vmem:[#allocation10 + $0xc8] ss:$16 sps:$4 sm:$0xff]  }
 0x736   :  { %6360 = vst [vmem:[#allocation72_spill] sm:$0xff] %v5406_v34  ;;  %6361 = vst [vmem:[#allocation86_spill] sm:$0xff] %v5409_v6 }
 0x737   :  { %v2275_v54 = vpack.c.bf16 %v2274_v30, %v2274_v30  ;;  %v5412_v30 = vld [vmem:[#allocation10 + $0xe4] ss:$16 sps:$4 sm:$0xff]  }
 0x738   :  { %6362 = vst [vmem:[#allocation19_spill] sm:$0xff] %v5412_v30 }
 0x739   :  { %2310 = vmatmul.mubr.bf16.vlgmr.msra.gmra.mrb[44].mxu0 %v2275_v54  ;;  %2351 = vmatmul.mubr.bf16.vlgmr.msra.gmra.mrb[76].mxu1 %v2275_v54 }
 0x73a   :  { %2385 = vmatpush1.bf16.msra.mxu0 %v4996_v23  ;;  %2426 = vmatpush1.bf16.msra.mxu1 %v5267_v43  ;;  %v5281_v23 = vld [vmem:[#allocation9 + $0x4c] ss:$16 sps:$4 sm:$0xff]  }
 0x73b   :  { %2386 = vmatprep.subr.bf16.mxu0 %v5000_v38  ;;  %2427 = vmatprep.subr.bf16.mxu1 %v5271_v9  ;;  %v5285_v38 = vld [vmem:[#allocation9 + $0x48] ss:$16 sps:$4 sm:$0xff]  }
 0x73c   :  { %2416 = vmatprep.mubr.bf16.mxu0 %v6060_v51  ;;  %2457 = vmatprep.mubr.bf16.mxu1 %v6060_v51 }
 0x73e   :  { %2387 = vmatpush1.bf16.msra.mxu0 %v5006_v48  ;;  %2428 = vmatpush1.bf16.msra.mxu1 %v5277_v44  ;;  %v5293_v48 = vld [vmem:[#allocation9 + $0x68] ss:$16 sps:$4 sm:$0xff]  }
 0x73f   :  { %2388 = vmatprep.subr.bf16.mxu0 %v5010_v37  ;;  %2429 = vmatprep.subr.bf16.mxu1 %v5281_v23  ;;  %v5297_v37 = vld [vmem:[#allocation9 + $0x8c] ss:$16 sps:$4 sm:$0xff]  }
 0x742   :  { %2389 = vmatpush1.bf16.msra.mxu0 %v5014_v25  ;;  %2430 = vmatpush1.bf16.msra.mxu1 %v5285_v38  ;;  %v5301_v25 = vld [vmem:[#allocation9 + $0x88] ss:$16 sps:$4 sm:$0xff]  }
 0x743   :  { %2390 = vmatprep.subr.bf16.mxu0 %v5018_v33  ;;  %2431 = vmatprep.subr.bf16.mxu1 %v5289_v40  ;;  %v5305_v33 = vld [vmem:[#allocation9 + $0xac] ss:$16 sps:$4 sm:$0xff]  }
 0x746   :  { %2391 = vmatpush1.bf16.msra.mxu0 %v5022_v39  ;;  %2432 = vmatpush1.bf16.msra.mxu1 %v5293_v48  ;;  %v5309_v39 = vld [vmem:[#allocation9 + $0xa8] ss:$16 sps:$4 sm:$0xff]  }
 0x747   :  { %2392 = vmatprep.subr.bf16.mxu0 %v5146_v21  ;;  %2433 = vmatprep.subr.bf16.mxu1 %v5297_v37 }
 0x74a   :  { %2393 = vmatpush1.bf16.msra.mxu0 %v5150_v47  ;;  %2434 = vmatpush1.bf16.msra.mxu1 %v5301_v25 }
 0x74b   :  { %2394 = vmatprep.subr.bf16.mxu0 %v5154_v61  ;;  %2435 = vmatprep.subr.bf16.mxu1 %v5305_v33 }
 0x74e   :  { %2395 = vmatpush1.bf16.msra.mxu0 %v5158_v60  ;;  %2436 = vmatpush1.bf16.msra.mxu1 %v5309_v39 }
 0x74f   :  { %2396 = vmatprep.subr.bf16.mxu0 %v5162_v42  ;;  %2437 = vmatprep.subr.bf16.mxu1 %v5313_v8 }
 0x752   :  { %2397 = vmatpush1.bf16.msra.mxu0 %v5166_v57  ;;  %2438 = vmatpush1.bf16.msra.mxu1 %v5317_v56 }
 0x753   :  { %2398 = vmatprep.subr.bf16.mxu0 %v5170_v45  ;;  %2439 = vmatprep.subr.bf16.mxu1 %v5321_v4 }
 0x756   :  { %2399 = vmatpush1.bf16.msra.mxu0 %v5174_v58  ;;  %2440 = vmatpush1.bf16.msra.mxu1 %v5325_v1 }
 0x757   :  { %2490 = vmatprep.subr.bf16.mxu0 %v5328_v59  ;;  %2531 = vmatprep.subr.bf16.mxu1 %v5331_v16 }
 0x759   :  { %2417 = vmatmul.mubr.bf16.vlgmr.msra.gmra.mrb[48].mxu0 %v2275_v54  ;;  %2458 = vmatmul.mubr.bf16.vlgmr.msra.gmra.mrb[80].mxu1 %v2275_v54  ;;  %v5415_v54 = vld [vmem:[#allocation10 + $0xec] ss:$16 sps:$4 sm:$0xff]  }
 0x75a   :  { %2491 = vmatpush1.bf16.msra.mxu0 %v5334_v2  ;;  %2532 = vmatpush1.bf16.msra.mxu1 %v5337_v22  ;;  %6363 = vst [vmem:[#allocation20_spill] sm:$0xff] %v5415_v54 }
 0x75b   :  { %2492 = vmatprep.subr.bf16.mxu0 %v5340_v36  ;;  %2533 = vmatprep.subr.bf16.mxu1 %v5343_v46 }
 0x75e   :  { %2493 = vmatpush1.bf16.msra.mxu0 %v5346_v52  ;;  %2534 = vmatpush1.bf16.msra.mxu1 %v5349_v53 }
 0x75f   :  { %2494 = vmatprep.subr.bf16.mxu0 %v5352_v35  ;;  %2535 = vmatprep.subr.bf16.mxu1 %v5355_v31 }
 0x762   :  { %2495 = vmatpush1.bf16.msra.mxu0 %v5358_v49  ;;  %2536 = vmatpush1.bf16.msra.mxu1 %v5361_v29 }
 0x763   :  { %2496 = vmatprep.subr.bf16.mxu0 %v5364_v50  ;;  %2537 = vmatprep.subr.bf16.mxu1 %v5367_v11 }
 0x766   :  { %2497 = vmatpush1.bf16.msra.mxu0 %v5370_v13  ;;  %2538 = vmatpush1.bf16.msra.mxu1 %v5373_v14 }
 0x767   :  { %2498 = vmatprep.subr.bf16.mxu0 %v5376_v17  ;;  %2539 = vmatprep.subr.bf16.mxu1 %v5379_v20 }
 0x76a   :  { %2499 = vmatpush1.bf16.msra.mxu0 %v5382_v24  ;;  %2540 = vmatpush1.bf16.msra.mxu1 %v5385_v27 }
 0x76b   :  { %2500 = vmatprep.subr.bf16.mxu0 %v5388_v28  ;;  %2541 = vmatprep.subr.bf16.mxu1 %v5391_v32 }
 0x76e   :  { %2501 = vmatpush1.bf16.msra.mxu0 %v5394_v12  ;;  %2542 = vmatpush1.bf16.msra.mxu1 %v5397_v62 }
 0x76f   :  { %2502 = vmatprep.subr.bf16.mxu0 %v5400_v7  ;;  %2543 = vmatprep.subr.bf16.mxu1 %v5403_v41 }
 0x772   :  { %2503 = vmatpush1.bf16.msra.mxu0 %v5406_v34  ;;  %2544 = vmatpush1.bf16.msra.mxu1 %v5409_v6  ;;  %v5424_v34 = vld [vmem:[#allocation10 + $0x104] ss:$16 sps:$4 sm:$0xff]   ;;  %v5427_v6 = vld [vmem:[#allocation10 + $0x10c] ss:$16 sps:$4 sm:$0xff]  }
 0x773   :  { %2504 = vmatprep.subr.bf16.mxu0 %v5412_v30  ;;  %2545 = vmatprep.subr.bf16.mxu1 %v5415_v54  ;;  %6366 = vst [vmem:[#allocation23_spill] sm:$0xff] %v5424_v34  ;;  %6367 = vst [vmem:[#allocation24_spill] sm:$0xff] %v5427_v6  ;;  %v5430_v30 = vld [vmem:[#allocation10 + $0x100] ss:$16 sps:$4 sm:$0xff]   ;;  %v5433_v54 = vld [vmem:[#allocation10 + $0x108] ss:$16 sps:$4 sm:$0xff]  }
 0x774   :  { %6368 = vst [vmem:[#allocation25_spill] sm:$0xff] %v5430_v30  ;;  %6369 = vst [vmem:[#allocation26_spill] sm:$0xff] %v5433_v54 }
 0x776   :  { %2505 = vmatpush1.bf16.msra.mxu0 %v5418_v10  ;;  %2546 = vmatpush1.bf16.msra.mxu1 %v5421_v63  ;;  %v5436_v10 = vld [vmem:[#allocation10 + $0x124] ss:$16 sps:$4 sm:$0xff]   ;;  %v5439_v63 = vld [vmem:[#allocation10 + $0x12c] ss:$16 sps:$4 sm:$0xff]  }
 0x777   :  { %2506 = vmatprep.subr.bf16.mxu0 %v5424_v34  ;;  %2547 = vmatprep.subr.bf16.mxu1 %v5427_v6  ;;  %6370 = vst [vmem:[#allocation27_spill] sm:$0xff] %v5436_v10  ;;  %6371 = vst [vmem:[#allocation28_spill] sm:$0xff] %v5439_v63  ;;  %v5442_v34 = vld [vmem:[#allocation10 + $0x120] ss:$16 sps:$4 sm:$0xff]   ;;  %v5445_v6 = vld [vmem:[#allocation10 + $0x128] ss:$16 sps:$4 sm:$0xff]  }
 0x778   :  { %6372 = vst [vmem:[#allocation29_spill] sm:$0xff] %v5442_v34  ;;  %6373 = vst [vmem:[#allocation30_spill] sm:$0xff] %v5445_v6 }
 0x77a   :  { %2507 = vmatpush1.bf16.msra.mxu0 %v5430_v30  ;;  %2548 = vmatpush1.bf16.msra.mxu1 %v5433_v54  ;;  %v5448_v30 = vld [vmem:[#allocation10 + $0x144] ss:$16 sps:$4 sm:$0xff]   ;;  %v5451_v54 = vld [vmem:[#allocation10 + $0x14c] ss:$16 sps:$4 sm:$0xff]  }
 0x77b   :  { %2508 = vmatprep.subr.bf16.mxu0 %v5436_v10  ;;  %2549 = vmatprep.subr.bf16.mxu1 %v5439_v63  ;;  %6374 = vst [vmem:[#allocation31_spill] sm:$0xff] %v5448_v30  ;;  %6375 = vst [vmem:[#allocation32_spill] sm:$0xff] %v5451_v54  ;;  %v5454_v10 = vld [vmem:[#allocation10 + $0x140] ss:$16 sps:$4 sm:$0xff]   ;;  %v5457_v63 = vld [vmem:[#allocation10 + $0x148] ss:$16 sps:$4 sm:$0xff]  }
 0x77c   :  { %6376 = vst [vmem:[#allocation33_spill] sm:$0xff] %v5454_v10  ;;  %6377 = vst [vmem:[#allocation34_spill] sm:$0xff] %v5457_v63 }
 0x77e   :  { %2509 = vmatpush1.bf16.msra.mxu0 %v5442_v34  ;;  %2550 = vmatpush1.bf16.msra.mxu1 %v5445_v6  ;;  %v5460_v34 = vld [vmem:[#allocation10 + $0x164] ss:$16 sps:$4 sm:$0xff]   ;;  %v5463_v6 = vld [vmem:[#allocation10 + $0x16c] ss:$16 sps:$4 sm:$0xff]  }
 0x77f   :  { %2510 = vmatprep.subr.bf16.mxu0 %v5448_v30  ;;  %2551 = vmatprep.subr.bf16.mxu1 %v5451_v54  ;;  %6378 = vst [vmem:[#allocation35_spill] sm:$0xff] %v5460_v34  ;;  %6379 = vst [vmem:[#allocation36_spill] sm:$0xff] %v5463_v6  ;;  %v5466_v30 = vld [vmem:[#allocation10 + $0x160] ss:$16 sps:$4 sm:$0xff]   ;;  %v5469_v54 = vld [vmem:[#allocation10 + $0x168] ss:$16 sps:$4 sm:$0xff]  }
 0x780   :  { %6380 = vst [vmem:[#allocation37_spill] sm:$0xff] %v5466_v30  ;;  %6381 = vst [vmem:[#allocation38_spill] sm:$0xff] %v5469_v54 }
 0x782   :  { %2511 = vmatpush1.bf16.msra.mxu0 %v5454_v10  ;;  %2552 = vmatpush1.bf16.msra.mxu1 %v5457_v63  ;;  %v5472_v10 = vld [vmem:[#allocation10 + $0x184] ss:$16 sps:$4 sm:$0xff]   ;;  %v5475_v63 = vld [vmem:[#allocation10 + $0x18c] ss:$16 sps:$4 sm:$0xff]  }
 0x783   :  { %2512 = vmatprep.subr.bf16.mxu0 %v5460_v34  ;;  %2553 = vmatprep.subr.bf16.mxu1 %v5463_v6  ;;  %6382 = vst [vmem:[#allocation39_spill] sm:$0xff] %v5472_v10  ;;  %6383 = vst [vmem:[#allocation40_spill] sm:$0xff] %v5475_v63  ;;  %v5478_v34 = vld [vmem:[#allocation10 + $0x180] ss:$16 sps:$4 sm:$0xff]   ;;  %v5481_v6 = vld [vmem:[#allocation10 + $0x188] ss:$16 sps:$4 sm:$0xff]  }
 0x784   :  { %6384 = vst [vmem:[#allocation41_spill] sm:$0xff] %v5478_v34  ;;  %6385 = vst [vmem:[#allocation42_spill] sm:$0xff] %v5481_v6 }
 0x786   :  { %2513 = vmatpush1.bf16.msra.mxu0 %v5466_v30  ;;  %2554 = vmatpush1.bf16.msra.mxu1 %v5469_v54  ;;  %v5484_v30 = vld [vmem:[#allocation10 + $0x1a4] ss:$16 sps:$4 sm:$0xff]   ;;  %v5487_v54 = vld [vmem:[#allocation10 + $0x1ac] ss:$16 sps:$4 sm:$0xff]  }
 0x787   :  { %2514 = vmatprep.subr.bf16.mxu0 %v5472_v10  ;;  %2555 = vmatprep.subr.bf16.mxu1 %v5475_v63  ;;  %6386 = vst [vmem:[#allocation43_spill] sm:$0xff] %v5484_v30  ;;  %6387 = vst [vmem:[#allocation44_spill] sm:$0xff] %v5487_v54  ;;  %v5490_v10 = vld [vmem:[#allocation10 + $0x1a0] ss:$16 sps:$4 sm:$0xff]   ;;  %v5493_v63 = vld [vmem:[#allocation10 + $0x1a8] ss:$16 sps:$4 sm:$0xff]  }
 0x788   :  { %6388 = vst [vmem:[#allocation45_spill] sm:$0xff] %v5490_v10  ;;  %6389 = vst [vmem:[#allocation46_spill] sm:$0xff] %v5493_v63 }
 0x78a   :  { %2515 = vmatpush1.bf16.msra.mxu0 %v5478_v34  ;;  %2556 = vmatpush1.bf16.msra.mxu1 %v5481_v6  ;;  %v5496_v34 = vld [vmem:[#allocation10 + $0x1c4] ss:$16 sps:$4 sm:$0xff]   ;;  %v5499_v6 = vld [vmem:[#allocation10 + $0x1cc] ss:$16 sps:$4 sm:$0xff]  }
 0x78b   :  { %2516 = vmatprep.subr.bf16.mxu0 %v5484_v30  ;;  %2557 = vmatprep.subr.bf16.mxu1 %v5487_v54  ;;  %6390 = vst [vmem:[#allocation47_spill] sm:$0xff] %v5496_v34  ;;  %6391 = vst [vmem:[#allocation48_spill] sm:$0xff] %v5499_v6  ;;  %v5502_v30 = vld [vmem:[#allocation10 + $0x1c0] ss:$16 sps:$4 sm:$0xff]   ;;  %v5505_v54 = vld [vmem:[#allocation10 + $0x1c8] ss:$16 sps:$4 sm:$0xff]  }
 0x78c   :  { %6392 = vst [vmem:[#allocation49_spill] sm:$0xff] %v5502_v30  ;;  %6393 = vst [vmem:[#allocation50_spill] sm:$0xff] %v5505_v54 }
 0x78e   :  { %2517 = vmatpush1.bf16.msra.mxu0 %v5490_v10  ;;  %2558 = vmatpush1.bf16.msra.mxu1 %v5493_v63  ;;  %v5508_v10 = vld [vmem:[#allocation10 + $0x1e4] ss:$16 sps:$4 sm:$0xff]   ;;  %v5511_v63 = vld [vmem:[#allocation10 + $0x1ec] ss:$16 sps:$4 sm:$0xff]  }
 0x78f   :  { %2518 = vmatprep.subr.bf16.mxu0 %v5496_v34  ;;  %2559 = vmatprep.subr.bf16.mxu1 %v5499_v6  ;;  %6394 = vst [vmem:[#allocation51_spill] sm:$0xff] %v5508_v10  ;;  %6395 = vst [vmem:[#allocation52_spill] sm:$0xff] %v5511_v63  ;;  %v5514_v34 = vld [vmem:[#allocation10 + $0x1e0] ss:$16 sps:$4 sm:$0xff]   ;;  %v5517_v6 = vld [vmem:[#allocation10 + $0x1e8] ss:$16 sps:$4 sm:$0xff]  }
 0x790   :  { %6396 = vst [vmem:[#allocation53_spill] sm:$0xff] %v5514_v34  ;;  %6397 = vst [vmem:[#allocation54_spill] sm:$0xff] %v5517_v6 }
 0x792   :  { %2519 = vmatpush1.bf16.msra.mxu0 %v5502_v30  ;;  %2560 = vmatpush1.bf16.msra.mxu1 %v5505_v54 }
 0x793   :  { %2520 = vmatprep.subr.bf16.mxu0 %v5508_v10  ;;  %2561 = vmatprep.subr.bf16.mxu1 %v5511_v63  ;;  %v5525_v10 = vld [vmem:[%s5704_s1] sm:$0xff] }
 0x794   :  { %6398 = vst [vmem:[#allocation55_spill] sm:$0xff] %v5525_v10  ;;  %vm2806_vm0 = vcmp.gt.s32.totalorder %v5525_v10, 0  ;;  %vm2807_vm1 = vcmp.gt.s32.totalorder %v5525_v10, 1  ;;  %vm2808_vm2 = vcmp.gt.s32.totalorder %v5525_v10, 2  ;;  %vm2809_vm3 = vcmp.gt.s32.totalorder %v5525_v10, 3 }
 0x795   :  { %vm2811_vm4 = vcmp.gt.s32.totalorder %v5525_v10, 5  ;;  %vm2810_vm5 = vcmp.gt.s32.totalorder %v5525_v10, 4 }
 0x796   :  { %2521 = vmatpush1.bf16.msra.mxu0 %v5514_v34  ;;  %2562 = vmatpush1.bf16.msra.mxu1 %v5517_v6  ;;  %v2822_v34 = vsel %vm2806_vm0, 1, %v6060_v51  ;;  %v2824_v6 = vsel %vm2808_vm2, 1, %v6060_v51  ;;  %v2827_v63 = vsel %vm2811_vm4, 1, %v6060_v51  ;;  %v2826_v54 = vsel %vm2810_vm5, 1, %v6060_v51 }
 0x797   :  { %2597 = vmatprep.subr.bf16.mxu0 %v6340_v55  ;;  %2638 = vmatprep.subr.bf16.mxu1 %v5243_v0  ;;  %v2823_v55 = vsel %vm2807_vm1, 1, %v6060_v51  ;;  %v2825_v0 = vsel %vm2809_vm3, 1, %v6060_v51 }
 0x798   :  { %2831 = vperm.xlu0 %3235, %v2822_v34   ;;  %2837 = vperm.xlu1 %3236, %v2824_v6  }
 0x79c   :  { %2834 = vperm.xlu0 %3235, %v2823_v55   ;;  %2840 = vperm.xlu1 %3236, %v2825_v0  }
 0x7a0   :  { %2846 = vperm.xlu1 %3236, %v2827_v63   ;;  %2843 = vperm.xlu0 %3235, %v2826_v54  }
 0x80c   :  { %v2311_v30 = vpop.f32.mrb[44].mxu0  ;;  %v2352_v41 = vpop.f32.mrb[76].mxu1 }
 0x80d   :  { %v2312_v34 = vadd.f32 %v2311_v30, %v6341_v3  ;;  %v2313_v6 = vpop.f32.mrb[45].mxu0  ;;  %v2354_v7 = vpop.f32.mrb[77].mxu1  ;;  %v2353_v27 = vadd.f32 %v2352_v41, %v6343_v15 }
 0x80e   :  { %v2314_v62 = vadd.f32 %v2313_v6, %v6342_v26  ;;  %v2315_v12 = vpop.f32.mrb[46].mxu0  ;;  %v2356_v32 = vpop.f32.mrb[78].mxu1  ;;  %v2355_v63 = vadd.f32 %v2354_v7, %v6344_v19  ;;  %v6402_v19 = vld [vmem:[#allocation76_spill] sm:$0xff] }
 0x80f   :  { %v2359_v28 = vmul.f32 0.5, %v2312_v34  ;;  %v2316_v10 = vpop.f32.mrb[47].mxu0  ;;  %v2357_v55 = vpop.f32.mrb[79].mxu1 }
 0x810   :  { %v2363_v0 = vmul.f32 0.5, %v2314_v62  ;;  %v2368_v54 = vmul.f32 0.5, %v2355_v63  ;;  %v6400_v55 = vld [vmem:[#allocation75_spill] sm:$0xff]  ;;  %v6401_v63 = vld [vmem:[#allocation89_spill] sm:$0xff] }
 0x811   :  { %3547 = vtanh.f32 %v2359_v28 }
 0x812   :  { %3549 = vtanh.f32 %v2363_v0 }
 0x813   :  { %3551 = vtanh.f32 %v2353_v27 }
 0x814   :  { %3553 = vtanh.f32 %v2368_v54 }
 0x81b   :  { %v3548_v24 = vpop.eup %3547 }
 0x81c   :  { %v3550_v30 = vpop.eup %3549  ;;  %v2361_v3 = vmul.f32 0.5, %v3548_v24 }
 0x81d   :  { %v2365_v20 = vmul.f32 0.5, %v3550_v30  ;;  %v3552_v12 = vpop.eup %3551 }
 0x81e   :  { %v2362_v6 = vadd.f32 0.5, %v2361_v3  ;;  %v3554_v28 = vpop.eup %3553 }
 0x81f   :  { %v2366_v32 = vadd.f32 0.5, %v2365_v20  ;;  %v2370_v27 = vmul.f32 0.5, %v3554_v28 }
 0x820   :  { %v2373_v34 = vmul.f32 %v3552_v12, %v2362_v6  ;;  %v6403_v6 = vld [vmem:[#allocation90_spill] sm:$0xff] }
 0x821   :  { %v2372_v10 = vmul.f32 %v2366_v32, %v5251_v5  ;;  %v2371_v3 = vadd.f32 0.5, %v2370_v27 }
 0x823   :  { %v5544_v62 = vadd.f32 %v2373_v34, %v2372_v10 }
 0x825   :  { %6399 = vst [vmem:[#allocation56_spill] sm:$0xff] %v5544_v62  ;;  %3555 = vtanh.f32 %v5544_v62 }
 0x82c   :  { %v2418_v41 = vpop.f32.mrb[48].mxu0  ;;  %v2459_v7 = vpop.f32.mrb[80].mxu1 }
 0x82d   :  { %v2466_v0 = vadd.f32 %v2418_v41, %v6400_v55  ;;  %v2468_v24 = vadd.f32 %v2459_v7, %v6401_v63  ;;  %v2420_v30 = vpop.f32.mrb[49].mxu0  ;;  %v2461_v54 = vpop.f32.mrb[81].mxu1 }
 0x82e   :  { %v2467_v20 = vadd.f32 %v2420_v30, %v6402_v19  ;;  %v2469_v12 = vadd.f32 %v2461_v54, %v6403_v6  ;;  %v2422_v5 = vpop.f32.mrb[50].mxu0  ;;  %v2463_v32 = vpop.f32.mrb[82].mxu1 }
 0x82f   :  { %v3556_v34 = vpop.eup %3555  ;;  %v2470_v10 = vmul.f32 0.5, %v2466_v0  ;;  %v2423_v62 = vpop.f32.mrb[51].mxu0 }
 0x830   :  { %v2464_v15 = vpop.f32.mrb[83].mxu1  ;;  %v2474_v28 = vmul.f32 0.5, %v2467_v20  ;;  %v5551_v26 = vmul.f32 %v3556_v34, %v2371_v3  ;;  %v2479_v19 = vmul.f32 0.5, %v2469_v12  ;;  %v3789_v34 = vld [vmem:[#allocation9] ss:$16 sps:$4 sm:$0xff]  }
 0x831   :  { %3557 = vtanh.f32 %v2470_v10  ;;  %v3790_v10 = vld [vmem:[#allocation9 + $0x24] ss:$16 sps:$4 sm:$0xff]  }
 0x832   :  { %3559 = vtanh.f32 %v2474_v28  ;;  %v2489_v41 = vpack.c.bf16 %v5551_v26, %v5551_v26  ;;  %v3792_v28 = vld [vmem:[#allocation9 + $0x44] ss:$16 sps:$4 sm:$0xff]  }
 0x833   :  { %3561 = vtanh.f32 %v2468_v24 }
 0x834   :  { %2522 = vmatprep.mubr.bf16.mxu0 %v2489_v41  ;;  %2563 = vmatprep.mubr.bf16.mxu1 %v2489_v41  ;;  %3563 = vtanh.f32 %v2479_v19  ;;  %v3793_v41 = vld [vmem:[#allocation9 + $0x40] ss:$16 sps:$4 sm:$0xff]  }
 0x835   :  { %v6442_v19 = vld [vmem:[#allocation46_spill] sm:$0xff] }
 0x83b   :  { %v3558_v27 = vpop.eup %3557 }
 0x83c   :  { %v3560_v7 = vpop.eup %3559  ;;  %v2472_v55 = vmul.f32 0.5, %v3558_v27  ;;  %v6443_v27 = vld [vmem:[#allocation47_spill] sm:$0xff] }
 0x83d   :  { %v2476_v63 = vmul.f32 0.5, %v3560_v7  ;;  %v3562_v62 = vpop.eup %3561  ;;  %v6444_v7 = vld [vmem:[#allocation48_spill] sm:$0xff] }
 0x83e   :  { %v2473_v0 = vadd.f32 0.5, %v2472_v55  ;;  %v3564_v20 = vpop.eup %3563  ;;  %v6445_v55 = vld [vmem:[#allocation49_spill] sm:$0xff] }
 0x83f   :  { %v2477_v15 = vadd.f32 0.5, %v2476_v63  ;;  %v2481_v6 = vmul.f32 0.5, %v3564_v20  ;;  %v6446_v63 = vld [vmem:[#allocation50_spill] sm:$0xff]  ;;  %v6451_v20 = vld [vmem:[#allocation55_spill] sm:$0xff] }
 0x840   :  { %v2484_v30 = vmul.f32 %v3562_v62, %v2473_v0  ;;  %v6447_v0 = vld [vmem:[#allocation51_spill] sm:$0xff]  ;;  %v6448_v62 = vld [vmem:[#allocation52_spill] sm:$0xff]  ;;  %vm2813_vm6 = vcmp.gt.s32.totalorder %v6451_v20, 7  ;;  %vm2812_vm7 = vcmp.gt.s32.totalorder %v6451_v20, 6 }
 0x841   :  { %v2483_v54 = vmul.f32 %v2477_v15, %v5263_v18  ;;  %v2482_v5 = vadd.f32 0.5, %v2481_v6  ;;  %v3791_v18 = vld [vmem:[#allocation9 + $0x20] ss:$16 sps:$4 sm:$0xff]   ;;  %v6449_v15 = vld [vmem:[#allocation53_spill] sm:$0xff]  ;;  %v2829_v6 = vsel %vm2813_vm6, 1, %v6060_v51 }
 0x842   :  { %2852 = vperm.xlu1 %3236, %v2829_v6  }
 0x843   :  { %v5556_v3 = vadd.f32 %v2484_v30, %v2483_v54  ;;  %v6450_v30 = vld [vmem:[#allocation54_spill] sm:$0xff] }
 0x844   :  { %v5648_v54 = vld [vmem:[#allocation12] sm:$0xff]  }
 0x845   :  { %3565 = vtanh.f32 %v5556_v3 }
 0x84f   :  { %v3566_v24 = vpop.eup %3565 }
 0x850   :  { %v2487_v12 = vmul.f32 %v3566_v24, %v2482_v5  ;;  %v2828_v5 = vsel %vm2812_vm7, 1, %v6060_v51 }
 0x851   :  { %2849 = vperm.xlu0 %3235, %v2828_v5  }
 0x852   :  { %v2488_v32 = vpack.c.bf16 %v2487_v12, %v2487_v12 }
 0x854   :  { %2523 = vmatmul.mubr.bf16.vlgmr.msra.gmra.mrb[52].mxu0 %v2488_v32  ;;  %2564 = vmatmul.mubr.bf16.vlgmr.msra.gmra.mrb[84].mxu1 %v2488_v32 }
 0x855   :  { %2598 = vmatpush1.bf16.msra.mxu0 %v3789_v34  ;;  %2639 = vmatpush1.bf16.msra.mxu1 %v5267_v43  ;;  %v3794_v43 = vld [vmem:[#allocation9 + $0x64] ss:$16 sps:$4 sm:$0xff]  }
 0x856   :  { %2599 = vmatprep.subr.bf16.mxu0 %v3790_v10  ;;  %2640 = vmatprep.subr.bf16.mxu1 %v5271_v9  ;;  %v3795_v9 = vld [vmem:[#allocation9 + $0x60] ss:$16 sps:$4 sm:$0xff]  }
 0x857   :  { %2629 = vmatprep.mubr.bf16.mxu0 %v6060_v51  ;;  %2670 = vmatprep.mubr.bf16.mxu1 %v6060_v51  ;;  %v6455_v51 = vld [vmem:[#allocation96_spill] sm:$0xff] }
 0x859   :  { %2600 = vmatpush1.bf16.msra.mxu0 %v3791_v18  ;;  %2641 = vmatpush1.bf16.msra.mxu1 %v5277_v44  ;;  %v6412_v44 = vld [vmem:[#allocation85_spill] sm:$0xff] }
 0x85a   :  { %2601 = vmatprep.subr.bf16.mxu0 %v3792_v28  ;;  %2642 = vmatprep.subr.bf16.mxu1 %v5281_v23  ;;  %v6413_v23 = vld [vmem:[#allocation72_spill] sm:$0xff]  ;;  %v6453_v28 = vld [vmem:[#allocation94_spill] sm:$0xff] }
 0x85d   :  { %2602 = vmatpush1.bf16.msra.mxu0 %v3793_v41  ;;  %2643 = vmatpush1.bf16.msra.mxu1 %v5285_v38  ;;  %v6414_v38 = vld [vmem:[#allocation86_spill] sm:$0xff] }
 0x85e   :  { %2603 = vmatprep.subr.bf16.mxu0 %v3794_v43  ;;  %2644 = vmatprep.subr.bf16.mxu1 %v5289_v40  ;;  %v6415_v40 = vld [vmem:[#allocation19_spill] sm:$0xff] }
 0x861   :  { %2604 = vmatpush1.bf16.msra.mxu0 %v3795_v9  ;;  %2645 = vmatpush1.bf16.msra.mxu1 %v5293_v48  ;;  %v6416_v48 = vld [vmem:[#allocation20_spill] sm:$0xff] }
 0x862   :  { %2605 = vmatprep.subr.bf16.mxu0 %v5146_v21  ;;  %2646 = vmatprep.subr.bf16.mxu1 %v5297_v37  ;;  %v6404_v21 = vld [vmem:[#allocation69_spill] sm:$0xff] }
 0x863   :  { %v6417_v37 = vld [vmem:[#allocation21_spill] sm:$0xff] }
 0x865   :  { %2606 = vmatpush1.bf16.msra.mxu0 %v5150_v47  ;;  %2647 = vmatpush1.bf16.msra.mxu1 %v5301_v25  ;;  %v6405_v47 = vld [vmem:[#allocation83_spill] sm:$0xff]  ;;  %v6418_v25 = vld [vmem:[#allocation22_spill] sm:$0xff] }
 0x866   :  { %2607 = vmatprep.subr.bf16.mxu0 %v5154_v61  ;;  %2648 = vmatprep.subr.bf16.mxu1 %v5305_v33  ;;  %v6406_v61 = vld [vmem:[#allocation70_spill] sm:$0xff]  ;;  %v6419_v33 = vld [vmem:[#allocation23_spill] sm:$0xff] }
 0x869   :  { %2608 = vmatpush1.bf16.msra.mxu0 %v5158_v60  ;;  %2649 = vmatpush1.bf16.msra.mxu1 %v5309_v39  ;;  %v6407_v60 = vld [vmem:[#allocation84_spill] sm:$0xff] }
 0x86a   :  { %2609 = vmatprep.subr.bf16.mxu0 %v5162_v42  ;;  %2650 = vmatprep.subr.bf16.mxu1 %v5313_v8  ;;  %v6408_v42 = vld [vmem:[#allocation80_spill] sm:$0xff]  ;;  %v6421_v8 = vld [vmem:[#allocation25_spill] sm:$0xff] }
 0x86b   :  { %v6420_v39 = vld [vmem:[#allocation24_spill] sm:$0xff] }
 0x86d   :  { %2610 = vmatpush1.bf16.msra.mxu0 %v5166_v57  ;;  %2651 = vmatpush1.bf16.msra.mxu1 %v5317_v56  ;;  %v6409_v57 = vld [vmem:[#allocation79_spill] sm:$0xff]  ;;  %v6422_v56 = vld [vmem:[#allocation26_spill] sm:$0xff] }
 0x86e   :  { %2611 = vmatprep.subr.bf16.mxu0 %v5170_v45  ;;  %2652 = vmatprep.subr.bf16.mxu1 %v5321_v4  ;;  %v6410_v45 = vld [vmem:[#allocation93_spill] sm:$0xff]  ;;  %v6423_v4 = vld [vmem:[#allocation27_spill] sm:$0xff] }
 0x871   :  { %2612 = vmatpush1.bf16.msra.mxu0 %v5174_v58  ;;  %2653 = vmatpush1.bf16.msra.mxu1 %v5325_v1  ;;  %v6411_v58 = vld [vmem:[#allocation71_spill] sm:$0xff]  ;;  %v6424_v1 = vld [vmem:[#allocation28_spill] sm:$0xff] }
 0x872   :  { %2703 = vmatprep.subr.bf16.mxu0 %v5328_v59  ;;  %2744 = vmatprep.subr.bf16.mxu1 %v5331_v16  ;;  %v6425_v59 = vld [vmem:[#allocation29_spill] sm:$0xff]  ;;  %v6426_v16 = vld [vmem:[#allocation30_spill] sm:$0xff] }
 0x874   :  { %2630 = vmatmul.mubr.bf16.vlgmr.msra.gmra.mrb[56].mxu0 %v2488_v32  ;;  %2671 = vmatmul.mubr.bf16.vlgmr.msra.gmra.mrb[88].mxu1 %v2488_v32  ;;  %v6452_v32 = vld [vmem:[#allocation18_spill] sm:$0xff] }
 0x875   :  { %2704 = vmatpush1.bf16.msra.mxu0 %v5334_v2  ;;  %2745 = vmatpush1.bf16.msra.mxu1 %v5337_v22  ;;  %v6427_v2 = vld [vmem:[#allocation31_spill] sm:$0xff]  ;;  %v6428_v22 = vld [vmem:[#allocation32_spill] sm:$0xff] }
 0x876   :  { %2705 = vmatprep.subr.bf16.mxu0 %v5340_v36  ;;  %2746 = vmatprep.subr.bf16.mxu1 %v5343_v46  ;;  %v6429_v36 = vld [vmem:[#allocation33_spill] sm:$0xff]  ;;  %v6430_v46 = vld [vmem:[#allocation34_spill] sm:$0xff] }
 0x879   :  { %2706 = vmatpush1.bf16.msra.mxu0 %v5346_v52  ;;  %2747 = vmatpush1.bf16.msra.mxu1 %v5349_v53  ;;  %v6431_v52 = vld [vmem:[#allocation35_spill] sm:$0xff]  ;;  %v6432_v53 = vld [vmem:[#allocation36_spill] sm:$0xff] }
 0x87a   :  { %2707 = vmatprep.subr.bf16.mxu0 %v5352_v35  ;;  %2748 = vmatprep.subr.bf16.mxu1 %v5355_v31  ;;  %v6433_v35 = vld [vmem:[#allocation37_spill] sm:$0xff]  ;;  %v6434_v31 = vld [vmem:[#allocation38_spill] sm:$0xff] }
 0x87d   :  { %2708 = vmatpush1.bf16.msra.mxu0 %v5358_v49  ;;  %2749 = vmatpush1.bf16.msra.mxu1 %v5361_v29  ;;  %v6435_v49 = vld [vmem:[#allocation39_spill] sm:$0xff]  ;;  %v6436_v29 = vld [vmem:[#allocation40_spill] sm:$0xff] }
 0x87e   :  { %2709 = vmatprep.subr.bf16.mxu0 %v5364_v50  ;;  %2750 = vmatprep.subr.bf16.mxu1 %v5367_v11  ;;  %v6437_v50 = vld [vmem:[#allocation41_spill] sm:$0xff]  ;;  %v6438_v11 = vld [vmem:[#allocation42_spill] sm:$0xff] }
 0x881   :  { %2710 = vmatpush1.bf16.msra.mxu0 %v5370_v13  ;;  %2751 = vmatpush1.bf16.msra.mxu1 %v5373_v14  ;;  %v6439_v13 = vld [vmem:[#allocation43_spill] sm:$0xff]  ;;  %v6440_v14 = vld [vmem:[#allocation44_spill] sm:$0xff] }
 0x882   :  { %2711 = vmatprep.subr.bf16.mxu0 %v5376_v17  ;;  %2752 = vmatprep.subr.bf16.mxu1 %v6404_v21  ;;  %v6441_v17 = vld [vmem:[#allocation45_spill] sm:$0xff] }
 0x885   :  { %2712 = vmatpush1.bf16.msra.mxu0 %v6405_v47  ;;  %2753 = vmatpush1.bf16.msra.mxu1 %v6406_v61 }
 0x886   :  { %2713 = vmatprep.subr.bf16.mxu0 %v6407_v60  ;;  %2754 = vmatprep.subr.bf16.mxu1 %v6408_v42  ;;  %v6454_v42 = vld [vmem:[#allocation95_spill] sm:$0xff] }
 0x889   :  { %2714 = vmatpush1.bf16.msra.mxu0 %v6409_v57  ;;  %2755 = vmatpush1.bf16.msra.mxu1 %v6410_v45 }
 0x88a   :  { %2715 = vmatprep.subr.bf16.mxu0 %v6411_v58  ;;  %2756 = vmatprep.subr.bf16.mxu1 %v6412_v44 }
 0x88d   :  { %2716 = vmatpush1.bf16.msra.mxu0 %v6413_v23  ;;  %2757 = vmatpush1.bf16.msra.mxu1 %v6414_v38 }
 0x88e   :  { %2717 = vmatprep.subr.bf16.mxu0 %v6415_v40  ;;  %2758 = vmatprep.subr.bf16.mxu1 %v6416_v48 }
 0x891   :  { %2718 = vmatpush1.bf16.msra.mxu0 %v6417_v37  ;;  %2759 = vmatpush1.bf16.msra.mxu1 %v6418_v25 }
 0x892   :  { %2719 = vmatprep.subr.bf16.mxu0 %v6419_v33  ;;  %2760 = vmatprep.subr.bf16.mxu1 %v6420_v39  ;;  %v6456_v39 = vld [vmem:[#allocation56_spill] sm:$0xff] }
 0x895   :  { %2720 = vmatpush1.bf16.msra.mxu0 %v6421_v8  ;;  %2761 = vmatpush1.bf16.msra.mxu1 %v6422_v56 }
 0x896   :  { %2721 = vmatprep.subr.bf16.mxu0 %v6423_v4  ;;  %2762 = vmatprep.subr.bf16.mxu1 %v6424_v1 }
 0x899   :  { %2722 = vmatpush1.bf16.msra.mxu0 %v6425_v59  ;;  %2763 = vmatpush1.bf16.msra.mxu1 %v6426_v16 }
 0x89a   :  { %2723 = vmatprep.subr.bf16.mxu0 %v6427_v2  ;;  %2764 = vmatprep.subr.bf16.mxu1 %v6428_v22  ;;  %v6457_v2 = vld [vmem:[#allocation77_spill] sm:$0xff] }
 0x89d   :  { %2724 = vmatpush1.bf16.msra.mxu0 %v6429_v36  ;;  %2765 = vmatpush1.bf16.msra.mxu1 %v6430_v46  ;;  %v6458_v36 = vld [vmem:[#allocation91_spill] sm:$0xff] }
 0x89e   :  { %2725 = vmatprep.subr.bf16.mxu0 %v6431_v52  ;;  %2766 = vmatprep.subr.bf16.mxu1 %v6432_v53 }
 0x8a1   :  { %2726 = vmatpush1.bf16.msra.mxu0 %v6433_v35  ;;  %2767 = vmatpush1.bf16.msra.mxu1 %v6434_v31  ;;  %v6459_v31 = vld [vmem:[#allocation78_spill] sm:$0xff] }
 0x8a2   :  { %2727 = vmatprep.subr.bf16.mxu0 %v6435_v49  ;;  %2768 = vmatprep.subr.bf16.mxu1 %v6436_v29  ;;  %v6460_v29 = vld [vmem:[#allocation92_spill] sm:$0xff] }
 0x8a5   :  { %2728 = vmatpush1.bf16.msra.mxu0 %v6437_v50  ;;  %2769 = vmatpush1.bf16.msra.mxu1 %v6438_v11 }
 0x8a6   :  { %2729 = vmatprep.subr.bf16.mxu0 %v6439_v13  ;;  %2770 = vmatprep.subr.bf16.mxu1 %v6440_v14 }
 0x8a9   :  { %2730 = vmatpush1.bf16.msra.mxu0 %v6441_v17  ;;  %2771 = vmatpush1.bf16.msra.mxu1 %v6442_v19 }
 0x8aa   :  { %2731 = vmatprep.subr.bf16.mxu0 %v6443_v27  ;;  %2772 = vmatprep.subr.bf16.mxu1 %v6444_v7 }
 0x8ad   :  { %2732 = vmatpush1.bf16.msra.mxu0 %v6445_v55  ;;  %2773 = vmatpush1.bf16.msra.mxu1 %v6446_v63 }
 0x8ae   :  { %2733 = vmatprep.subr.bf16.mxu0 %v6447_v0  ;;  %2774 = vmatprep.subr.bf16.mxu1 %v6448_v62 }
 0x8b1   :  { %2734 = vmatpush1.bf16.msra.mxu0 %v6449_v15  ;;  %2775 = vmatpush1.bf16.msra.mxu1 %v6450_v30 }
 0x8b2   :  { %3198 = vmatprep.subr.bf16.mxu0 %v5648_v54 }
 0x927   :  { %v2524_v24 = vpop.f32.mrb[52].mxu0  ;;  %v2565_v12 = vpop.f32.mrb[84].mxu1 }
 0x928   :  { %v2525_v34 = vadd.f32 %v2524_v24, %v6452_v32  ;;  %v2526_v10 = vpop.f32.mrb[53].mxu0  ;;  %v2567_v18 = vpop.f32.mrb[85].mxu1  ;;  %v2566_v57 = vadd.f32 %v2565_v12, %v6454_v42 }
 0x929   :  { %v2527_v41 = vadd.f32 %v2526_v10, %v6453_v28  ;;  %v2528_v43 = vpop.f32.mrb[54].mxu0  ;;  %v2569_v9 = vpop.f32.mrb[86].mxu1  ;;  %v2568_v45 = vadd.f32 %v2567_v18, %v6455_v51 }
 0x92a   :  { %v2572_v21 = vmul.f32 0.5, %v2525_v34  ;;  %v2529_v47 = vpop.f32.mrb[55].mxu0  ;;  %v2570_v61 = vpop.f32.mrb[87].mxu1 }
 0x92b   :  { %v2576_v60 = vmul.f32 0.5, %v2527_v41  ;;  %v2581_v58 = vmul.f32 0.5, %v2568_v45  ;;  %v2832_v18 = vpop.permute.xlu0 %2831  ;;  %v6461_v45 = vld [vmem:[#allocation65_spill] sm:$0xff] }
 0x92c   :  { %3567 = vtanh.f32 %v2572_v21  ;;  %vm2854_vm8 = vcmp.eq.s32.totalorder %v2832_v18, 1 }
 0x92d   :  { %3569 = vtanh.f32 %v2576_v60 }
 0x92e   :  { %3571 = vtanh.f32 %v2566_v57  ;;  %v3430_v57 = vld [vmem:[#allocation12 + $0x8] sm:$0xff]  }
 0x92f   :  { %3573 = vtanh.f32 %v2581_v58  ;;  %v2835_v9 = vpop.permute.xlu0 %2834  ;;  %v6462_v58 = vld [vmem:[#allocation66_spill] sm:$0xff] }
 0x930   :  { %vm2855_vm9 = vcmp.eq.s32.totalorder %v2835_v9, 1 }
 0x931   :  { %vm3174_vm10 = vmpackc.low %vm2855_vm9, %vm2854_vm8 }
 0x936   :  { %v3568_v44 = vpop.eup %3567 }
 0x937   :  { %v3570_v23 = vpop.eup %3569  ;;  %v2574_v38 = vmul.f32 0.5, %v3568_v44  ;;  %v3175_v44 = vpack.c.bf16 %v6462_v58, %v6461_v45 }
 0x938   :  { %v2578_v40 = vmul.f32 0.5, %v3570_v23  ;;  %v3572_v37 = vpop.eup %3571  ;;  %v3432_v23 = vld [vmem:[#allocation12 + $0x18] sm:$0xff]  }
 0x939   :  { %v2575_v48 = vadd.f32 0.5, %v2574_v38  ;;  %v3574_v4 = vpop.eup %3573  ;;  %v3433_v38 = vld [vmem:[#allocation12 + $0x20] sm:$0xff]  }
 0x93a   :  { %v2579_v25 = vadd.f32 0.5, %v2578_v40  ;;  %v2583_v1 = vmul.f32 0.5, %v3574_v4  ;;  %v2838_v40 = vpop.permute.xlu1 %2837  ;;  %v6464_v4 = vld [vmem:[#allocation68_spill] sm:$0xff] }
 0x93b   :  { %v2586_v33 = vmul.f32 %v3572_v37, %v2575_v48  ;;  %v3434_v48 = vld [vmem:[#allocation12 + $0x28] sm:$0xff]   ;;  %v3435_v37 = vld [vmem:[#allocation12 + $0x30] sm:$0xff]   ;;  %vm2856_vm11 = vcmp.eq.s32.totalorder %v2838_v40, 1 }
 0x93c   :  { %v2585_v8 = vmul.f32 %v2579_v25, %v6456_v39  ;;  %v2584_v35 = vadd.f32 0.5, %v2583_v1  ;;  %v2844_v39 = vpop.permute.xlu0 %2843 }
 0x93d   :  { %vm2858_vm14 = vcmp.eq.s32.totalorder %v2844_v39, 1 }
 0x93e   :  { %v5660_v56 = vadd.f32 %v2586_v33, %v2585_v8  ;;  %v2841_v25 = vpop.permute.xlu1 %2840  ;;  %v6463_v8 = vld [vmem:[#allocation97_spill] sm:$0xff] }
 0x93f   :  { %vm2857_vm12 = vcmp.eq.s32.totalorder %v2841_v25, 1  ;;  %v3178_v1 = vpack.c.bf16 %v6464_v4, %v6463_v8 }
 0x940   :  { %3575 = vtanh.f32 %v5660_v56  ;;  %vm3177_vm15 = vmpackc.low %vm2857_vm12, %vm2856_vm11 }
 0x942   :  { %v2847_v33 = vpop.permute.xlu1 %2846 }
 0x943   :  { %vm2859_vm13 = vcmp.eq.s32.totalorder %v2847_v33, 1 }
 0x944   :  { %vm3180_vm0 = vmpackc.low %vm2859_vm13, %vm2858_vm14 }
 0x947   :  { %v2631_v59 = vpop.f32.mrb[56].mxu0  ;;  %v2672_v16 = vpop.f32.mrb[88].mxu1 }
 0x948   :  { %v2679_v22 = vadd.f32 %v2631_v59, %v6457_v2  ;;  %v2681_v46 = vadd.f32 %v2672_v16, %v6458_v36  ;;  %v2633_v52 = vpop.f32.mrb[57].mxu0  ;;  %v2674_v53 = vpop.f32.mrb[89].mxu1  ;;  %v6465_v59 = vld [vmem:[#allocation82_spill] sm:$0xff] }
 0x949   :  { %v2680_v49 = vadd.f32 %v2633_v52, %v6459_v31  ;;  %v2682_v50 = vadd.f32 %v2674_v53, %v6460_v29  ;;  %v2635_v11 = vpop.f32.mrb[58].mxu0  ;;  %v2676_v13 = vpop.f32.mrb[90].mxu1  ;;  %v3181_v16 = vpack.c.bf16 %v5551_v26, %v6465_v59 }
 0x94a   :  { %v3576_v14 = vpop.eup %3575  ;;  %v2683_v17 = vmul.f32 0.5, %v2679_v22  ;;  %v2636_v19 = vpop.f32.mrb[59].mxu0 }
 0x94b   :  { %v2677_v27 = vpop.f32.mrb[91].mxu1  ;;  %v2687_v7 = vmul.f32 0.5, %v2680_v49  ;;  %v5667_v55 = vmul.f32 %v3576_v14, %v2584_v35  ;;  %v2692_v0 = vmul.f32 0.5, %v2682_v50 }
 0x94c   :  { %3577 = vtanh.f32 %v2683_v17 }
 0x94d   :  { %3579 = vtanh.f32 %v2687_v7  ;;  %v2702_v63 = vpack.c.bf16 %v5667_v55, %v5667_v55 }
 0x94e   :  { %3581 = vtanh.f32 %v2681_v46 }
 0x94f   :  { %2735 = vmatprep.mubr.bf16.mxu0 %v2702_v63  ;;  %2776 = vmatprep.mubr.bf16.mxu1 %v2702_v63  ;;  %3583 = vtanh.f32 %v2692_v0 }
 0x956   :  { %v3578_v62 = vpop.eup %3577 }
 0x957   :  { %v3580_v15 = vpop.eup %3579  ;;  %v2685_v30 = vmul.f32 0.5, %v3578_v62 }
 0x958   :  { %v2689_v20 = vmul.f32 0.5, %v3580_v15  ;;  %v3582_v5 = vpop.eup %3581 }
 0x959   :  { %v2686_v6 = vadd.f32 0.5, %v2685_v30  ;;  %v3584_v41 = vpop.eup %3583 }
 0x95a   :  { %v2690_v24 = vadd.f32 0.5, %v2689_v20  ;;  %v2694_v43 = vmul.f32 0.5, %v3584_v41  ;;  %v2853_v20 = vpop.permute.xlu1 %2852 }
 0x95b   :  { %v2697_v12 = vmul.f32 %v3582_v5, %v2686_v6  ;;  %v2850_v5 = vpop.permute.xlu0 %2849  ;;  %vm2861_vm1 = vcmp.eq.s32.totalorder %v2853_v20, 1 }
 0x95c   :  { %v2696_v34 = vmul.f32 %v2690_v24, %v5556_v3  ;;  %v2695_v21 = vadd.f32 0.5, %v2694_v43  ;;  %v3431_v3 = vld [vmem:[#allocation12 + $0x10] sm:$0xff]   ;;  %vm2860_vm2 = vcmp.eq.s32.totalorder %v2850_v5, 1 }
 0x95d   :  { %vm3183_vm3 = vmpackc.low %vm2861_vm1, %vm2860_vm2 }
 0x95e   :  { %v2698_v10 = vadd.f32 %v2697_v12, %v2696_v34 }
 0x960   :  { %3585 = vtanh.f32 %v2698_v10 }
 0x96a   :  { %v3586_v47 = vpop.eup %3585 }
 0x96b   :  { %v2700_v61 = vmul.f32 %v3586_v47, %v2695_v21 }
 0x96d   :  { %v2701_v60 = vpack.c.bf16 %v2700_v61, %v2700_v61 }
 0x96f   :  { %2736 = vmatmul.mubr.bf16.vlgmr.msra.gmra.mrb[60].mxu0 %v2701_v60  ;;  %2777 = vmatmul.mubr.bf16.vlgmr.msra.gmra.mrb[92].mxu1 %v2701_v60 }
 0x970   :  { %3199 = vmatpush3.bf16.msra.mxu0 %v5648_v54  ;;  %3214 = vmatprep.mubr.msk.bf16.mxu0 %vm3174_vm10, %v3175_v44  ;;  %v3436_v54 = vld [vmem:[#allocation12 + $0x38] sm:$0xff]  }
 0x971   :  { %3200 = vmatprep.subr.bf16.mxu0 %v3430_v57 }
 0x974   :  { %3201 = vmatpush3.bf16.msra.mxu0 %v3430_v57 }
 0x975   :  { %3202 = vmatprep.subr.bf16.mxu0 %v3431_v3 }
 0x978   :  { %3203 = vmatpush3.bf16.msra.mxu0 %v3431_v3 }
 0x979   :  { %3204 = vmatprep.subr.bf16.mxu0 %v3432_v23 }
 0x97c   :  { %3205 = vmatpush3.bf16.msra.mxu0 %v3432_v23 }
 0x97d   :  { %3206 = vmatprep.subr.bf16.mxu0 %v3433_v38 }
 0x980   :  { %3207 = vmatpush3.bf16.msra.mxu0 %v3433_v38 }
 0x981   :  { %3208 = vmatprep.subr.bf16.mxu0 %v3434_v48 }
 0x984   :  { %3209 = vmatpush3.bf16.msra.mxu0 %v3434_v48 }
 0x985   :  { %3210 = vmatprep.subr.bf16.mxu0 %v3435_v37 }
 0x988   :  { %3211 = vmatpush3.bf16.msra.mxu0 %v3435_v37 }
 0x989   :  { %3212 = vmatprep.subr.bf16.mxu0 %v3436_v54 }
 0x98c   :  { %3213 = vmatpush3.bf16.msra.mxu0 %v3436_v54 }
 0x98f   :  { %3215 = vmatmul.mubr.msk.bf16.vlgmr.msra.gmra.mrb[64].mxu0 %vm3177_vm15, %v3178_v1 }
 0x990   :  { %3218 = vmatprep.mubr.msk.bf16.mxu0 %vm3180_vm0, %v3181_v16 }
 0xa42   :  { %v2737_v2 = vpop.f32.mrb[60].mxu0  ;;  %v2778_v22 = vpop.f32.mrb[92].mxu1 }
 0xa43   :  { %v2738_v36 = vadd.f32 %v2737_v2, %v6452_v32  ;;  %v2739_v46 = vpop.f32.mrb[61].mxu0  ;;  %v2780_v52 = vpop.f32.mrb[93].mxu1  ;;  %v2779_v13 = vadd.f32 %v2778_v22, %v6454_v42 }
 0xa44   :  { %v2740_v53 = vadd.f32 %v2739_v46, %v6453_v28  ;;  %v2741_v35 = vpop.f32.mrb[62].mxu0  ;;  %v2782_v31 = vpop.f32.mrb[94].mxu1  ;;  %v2781_v26 = vadd.f32 %v2780_v52, %v6455_v51  ;;  %v3165_v51 = vld [vmem:[%s5711_s8] ss:$0 sm:$0xff]  ;;  %s3948_s8 = smov [#allocation13]  }
 0xa45   :  { %v2785_v49 = vmul.f32 0.5, %v2738_v36  ;;  %v2742_v29 = vpop.f32.mrb[63].mxu0  ;;  %v2783_v50 = vpop.f32.mrb[95].mxu1  ;;  %s3023_s14 = sshll.u32 %s3948_s8, 4  ;;  %s3024_s14 = int_to_ptr.vmem [resolvable:$true] %s3023_s14 }
 0xa46   :  { %v2789_v11 = vmul.f32 0.5, %v2740_v53  ;;  %v2794_v14 = vmul.f32 0.5, %v2781_v26  ;;  %s3906_s15 = scalar_lea.vmem %s3024_s14, 1024  ;;  %p3911_p13 = scmp.lt.s32.totalorder %s3024_s14, %s3024_s14 }
 0xa47   :  { %3587 = vtanh.f32 %v2785_v49  ;;  %p3907_p12 = scmp.ne.s32.totalorder %s3024_s14, %s3906_s15  ;;  %p3912_p0 = scmp.lt.s32.totalorder %s3906_s15, %s3906_s15 }
 0xa48   :  { %3589 = vtanh.f32 %v2789_v11 }
 0xa49   :  { %3591 = vtanh.f32 %v2779_v13  ;;  %p3913_p1 = por %p3912_p0, %p3911_p13 }
 0xa4a   :  { %3593 = vtanh.f32 %v2794_v14 }
 0xa4b   :  { %p3914_p2 = pnand %p3913_p1, %p3907_p12 }
 0xa51   :  { %v3588_v17 = vpop.eup %3587 }
 0xa52   :  { %v3590_v32 = vpop.eup %3589  ;;  %v2787_v19 = vmul.f32 0.5, %v3588_v17 }
 0xa53   :  { %v2791_v27 = vmul.f32 0.5, %v3590_v32  ;;  %v3592_v7 = vpop.eup %3591 }
 0xa54   :  { %v2788_v28 = vadd.f32 0.5, %v2787_v19  ;;  %v3594_v30 = vpop.eup %3593 }
 0xa55   :  { %v2792_v63 = vadd.f32 0.5, %v2791_v27  ;;  %v2796_v42 = vmul.f32 0.5, %v3594_v30 }
 0xa56   :  { %v2799_v0 = vmul.f32 %v3592_v7, %v2788_v28 }
 0xa57   :  { %v2798_v62 = vmul.f32 %v2792_v63, %v5660_v56  ;;  %v2797_v34 = vadd.f32 0.5, %v2796_v42 }
 0xa59   :  { %v2800_v15 = vadd.f32 %v2799_v0, %v2798_v62 }
 0xa5b   :  { %3595 = vtanh.f32 %v2800_v15 }
 0xa62   :  { %v3216_v6 = vpop.f32.mrb[64].mxu0 }
 0xa63   :  { %v2988_v24 = vadd.f32 %v3216_v6, %v3165_v51  ;;  %v2979_v12 = vpop.f32.mrb[65].mxu0 }
 0xa64   :  { %v2980_v10 = vadd.f32 %v3165_v51, %v2979_v12  ;;  %v3217_v18 = vpop.f32.mrb[66].mxu0 }
 0xa65   :  { %v3596_v41 = vpop.eup %3595  ;;  %3012 = vst [vmem:[#allocation13 + $0x10] sm:$0xff] %v2988_v24  ;;  %v2991_v43 = vadd.f32 %v3217_v18, %v3165_v51  ;;  %v2982_v56 = vpop.f32.mrb[67].mxu0 }
 0xa66   :  { %v2802_v9 = vmul.f32 %v3596_v41, %v2797_v34  ;;  %3010 = vst [vmem:[#allocation13] sm:$0xff] %v2980_v10  ;;  %v2983_v21 = vadd.f32 %v3165_v51, %v2982_v56 }
 0xa67   :  { %3013 = vst [vmem:[#allocation13 + $0x18] sm:$0xff] %v2991_v43 }
 0xa68   :  { %3011 = vst [vmem:[#allocation13 + $0x8] sm:$0xff] %v2983_v21  ;;  %v3184_v47 = vpack.c.bf16 %v2802_v9, %v5667_v55 }
 0xa6a   :  { %3219 = vmatmul.mubr.msk.bf16.gmra.mrb[68].mxu0 %vm3183_vm3, %v3184_v47 }
 0xb3d   :  { %v3220_v61 = vpop.f32.mrb[68].mxu0 }
 0xb3e   :  { %v3004_v60 = vadd.f32 %v3220_v61, %v3165_v51  ;;  %v2995_v57 = vpop.f32.mrb[69].mxu0 }
 0xb3f   :  { %v2996_v45 = vadd.f32 %v3165_v51, %v2995_v57  ;;  %v3221_v58 = vpop.f32.mrb[70].mxu0 }
 0xb40   :  { %3016 = vst [vmem:[#allocation13 + $0x30] sm:$0xff] %v3004_v60  ;;  %v3007_v44 = vadd.f32 %v3221_v58, %v3165_v51  ;;  %v2998_v3 = vpop.f32.mrb[71].mxu0 }
 0xb41   :  { %3014 = vst [vmem:[#allocation13 + $0x20] sm:$0xff] %v2996_v45  ;;  %v2999_v23 = vadd.f32 %v3165_v51, %v2998_v3 }
 0xb42   :  { %3017 = vst [vmem:[#allocation13 + $0x38] sm:$0xff] %v3007_v44 }
 0xb43   :  { %3015 = vst [vmem:[#allocation13 + $0x28] sm:$0xff] %v2999_v23 }
 0xb44   :  { %3917 = shalt.err (!%p3914_p2)
}
 0xb45   :  { %s3918_s0 = scalar_lea.hbm %s5712_s9, 1024 }
 0xb46   :  { %p3919_p3 = scmp.ne.s32.totalorder %s5712_s9, %s3918_s0  ;;  %p3922_p4 = scmp.lt.u32.totalorder %s3918_s0, %s5712_s9 }
 0xb48   :  { %p3924_p5 = pnand %p3922_p4, %p3919_p3 }
 0xb4a   :  { %3927 = shalt.err (!%p3924_p5)
}
 0xb4b   :  { %3029 = dma.vmem_to_hbm [thread:$0]  %s3024_s14, 1024, %s5712_s9, [#allocation6], %s3941_s5, %s3941_s5, %s3942_s24  }
 0xb4c   :  { %3934 = dma.done.wait [#allocation6], 1024  }
 0xb4d   :  { %3935 = vsyncadd [#allocation6], 4294966272 }
 0xb4e   :  { %3033 = vsyncpa [#allocation5], 1 }
 0xb4f   :  { %3034 = vsyncpa [#allocation8], 1 }
 0xb50   :  { %3035 = vsyncpa [#allocation11], 1 }
 0xb51   :  { %3036 = vsyncpa [#allocation6], 1 }

</bundles_post_ra>
